<compile_context>
chip_gen: v6e
topology: v6e:2x2x1
jax: 0.10.0
libtpu: 0.0.40
codegen_flags: <defaults>
</compile_context>

<pallas_src>
import functools

import jax
import jax.numpy as jnp
from jax.experimental import pallas as pl
from jax.experimental.pallas import tpu as pltpu

EPS = 1e-5
LANE = 128
# Scoped-VMEM budget: above the 16 MiB (v5e) / 32 MiB (v6e, v7x) defaults, and
# well under v7x's 64 MiB physical VMEM (headroom for larger channel counts).
VMEM_LIMIT_BYTES = 48 * 1024 * 1024


def _round_up(x, m):
    return (x + m - 1) // m * m


def _pick_tile_h(H, W, c_max):
    """Largest divisor of H (< H when possible, so every image gives >=2 pipeline
    steps) such that a (TH*W, c_max) f32 accumulator tile stays around <=1 MiB."""
    budget = max(8, (1 << 20) // max(1, W * c_max * 4))
    cands = [d for d in range(1, H) if H % d == 0 and d <= budget]
    if cands:
        return max(cands)
    return H if H <= budget else 1


# ---------------------------------------------------------------------------
# phase 1: conv1 with the 3x3 taps folded into K (single MXU dot) + bias
#          + per-tile BN1 partial statistics.  Input tiles carry a 1-row halo
#          (rows 0 and TH+1) so phase 2 never needs overlapping reads of y1.
# ---------------------------------------------------------------------------
def conv1_foldk_stats_kernel(p_ref, w_ref, b_ref, y_ref, s_ref, q_ref):
    # p_ref: (TH+2, W, K1) compute dtype  (im2col patches, K1 = pad(9*Cin))
    # w_ref: (K1, C1)      compute dtype  ; b_ref: (1, C1) f32
    # y_ref: (TH+2, W, C1) compute dtype out (pre-BN conv1, incl. halo rows)
    # s_ref / q_ref: (1, C1) f32 out (stats over the TH *own* rows only)
    TH2, W, K1 = p_ref.shape
    TH = TH2 - 2
    C1 = y_ref.shape[-1]

    x = p_ref[...].reshape(TH2 * W, K1)
    y = jnp.dot(x, w_ref[...], preferred_element_type=jnp.float32) + b_ref[...]
    y3 = y.reshape(TH2, W, C1)

    # BN statistics exclude the duplicated halo rows (each image row counted once)
    own = y3[1:TH + 1].reshape(TH * W, C1)
    s_ref[...] = jnp.sum(own, axis=0, keepdims=True)
    q_ref[...] = jnp.sum(own * own, axis=0, keepdims=True)

    y_ref[...] = y3.astype(y_ref.dtype)          # bf16 inter-phase activation


# ---------------------------------------------------------------------------
# phase 2: BN1+ReLU (folded global scale/shift) -> zero-halo scratch -> conv2
#          (per-tap MXU dots) + bias + per-tile BN2 partial statistics.
# ---------------------------------------------------------------------------
def bn_relu_conv2_stats_kernel(y1_ref, sc_ref, sh_ref, w_ref, b_ref,
                               y2_ref, s_ref, q_ref, pad_ref):
    # y1_ref : (TH+2, W, C1) compute dtype (tile with 1-row halo)
    # sc/sh  : (1, C1) f32 folded BN1 scale/shift (global)
    # w_ref  : (9, C1, C2) compute dtype ; b_ref: (1, C2) f32
    # y2_ref : (TH, W, C2) compute dtype out ; s/q: (1, C2) f32 out
    # pad_ref: VMEM scratch (TH+2, W+2, C1) compute dtype (zero W-halo columns)
    TH2, W, C1 = y1_ref.shape
    TH = TH2 - 2
    C2 = y2_ref.shape[-1]
    h = pl.program_id(1)
    nh = pl.num_programs(1)

    # Zero ONLY the two W-halo strips, once per image (scratch persists across
    # grid steps; the interior is rewritten in place every step).
    @pl.when(h == 0)
    def _zero_halo():
        pad_ref[:, 0:1, :] = jnp.zeros((TH2, 1, C1), pad_ref.dtype)
        pad_ref[:, W + 1:W + 2, :] = jnp.zeros((TH2, 1, C1), pad_ref.dtype)

    a = jnp.maximum(
        y1_ref[...].astype(jnp.float32) * sc_ref[...].reshape(1, 1, C1)
        + sh_ref[...].reshape(1, 1, C1), 0.0)

    # Image-boundary halo rows must be zero (conv2 zero-pads its input); the
    # interior halo rows are real BN'd neighbour rows and stay as-is.
    row = jax.lax.broadcasted_iota(jnp.int32, (TH2, 1, 1), 0)
    keep = jnp.logical_and(jnp.logical_or(row > 0, h > 0),
                           jnp.logical_or(row < TH2 - 1, h < nh - 1))
    a = jnp.where(keep, a, 0.0).astype(pad_ref.dtype)
    pad_ref[:, 1:W + 1, :] = a

    acc = jnp.zeros((TH * W, C2), jnp.float32)
    for t in range(9):                       # 9 MXU dots, K = C1, N = C2
        kh, kw = divmod(t, 3)
        patch = pad_ref[kh:kh + TH, kw:kw + W, :].reshape(TH * W, C1)
        acc = acc + jnp.dot(patch, w_ref[t], preferred_element_type=jnp.float32)

    y = acc + b_ref[...]                     # broadcast hoisted out of tap loop
    s_ref[...] = jnp.sum(y, axis=0, keepdims=True)
    q_ref[...] = jnp.sum(y * y, axis=0, keepdims=True)
    y2_ref[...] = y.reshape(TH, W, C2).astype(y2_ref.dtype)


# ---------------------------------------------------------------------------
# phase 3: final BN2 + ReLU (lane-dense elementwise)
# ---------------------------------------------------------------------------
def bn_relu_kernel(y_ref, sc_ref, sh_ref, o_ref):
    C = y_ref.shape[-1]
    o_ref[...] = jnp.maximum(
        y_ref[...].astype(jnp.float32) * sc_ref[...].reshape(1, 1, C)
        + sh_ref[...].reshape(1, 1, C), 0.0).astype(o_ref.dtype)


@functools.partial(jax.jit, static_argnames="compute_dtype")
def double_conv(x_nchw, params, compute_dtype=jnp.bfloat16):
    """x_nchw: (N, Cin, H, W) f32 -> (N, Cout, H, W) f32 (training-mode BN)."""
    N, Cin, H, W = x_nchw.shape
    Cout = params["w1"].shape[-1]
    K1 = _round_up(9 * Cin, LANE)          # conv1 contraction dim (taps folded)
    C1 = _round_up(Cout, LANE)             # lane-dense channel padding
    C2 = C1
    NHW = N * H * W
    itemsize = jnp.dtype(compute_dtype).itemsize

    TH = _pick_tile_h(H, W, max(K1, C1))
    nH = H // TH
    cparams = pltpu.CompilerParams(
        dimension_semantics=("parallel", "arbitrary"),
        vmem_limit_bytes=VMEM_LIMIT_BYTES)

    # ---- wrapper layout plumbing: im2col for conv1, H-tiles with 1-row halo ----
    x = jnp.transpose(x_nchw, (0, 2, 3, 1))                      # NHWC
    xp = jnp.pad(x, ((0, 0), (1, 1), (1, 1), (0, 0)))
    taps = [xp[:, kh:kh + H, kw:kw + W, :] for kh in range(3) for kw in range(3)]
    p = jnp.concatenate(taps, axis=-1)                           # (N,H,W,9*Cin)
    p = jnp.pad(p, ((0, 0), (0, 0), (0, 0), (0, K1 - 9 * Cin))).astype(compute_dtype)
    p = jnp.pad(p, ((0, 0), (1, 1), (0, 0), (0, 0)))             # (N,H+2,W,K1)
    rows = jnp.arange(nH)[:, None] * TH + jnp.arange(TH + 2)[None, :]
    p_tiled = p[:, rows]                                         # (N,nH,TH+2,W,K1)

    def pad_vec(v, c):                                           # (1,c_real)->(1,c) f32
        return jnp.pad(v.astype(jnp.float32), ((0, 0), (0, c - v.shape[-1])))

    w1f = jnp.pad(params["w1"].reshape(9 * Cin, Cout),
                  ((0, K1 - 9 * Cin), (0, C1 - Cout))).astype(compute_dtype)
    b1 = pad_vec(params["b1"], C1)
    g1, bt1 = pad_vec(params["g1"], C1), pad_vec(params["bt1"], C1)   # gamma pads=0
    w2f = jnp.pad(params["w2"], ((0, 0), (0, 0), (0, C1 - Cout), (0, C2 - Cout)))
    w2f = w2f.reshape(9, C1, C2).astype(compute_dtype)
    b2 = pad_vec(params["b2"], C2)
    g2, bt2 = pad_vec(params["g2"], C2), pad_vec(params["bt2"], C2)

    # ---- phase 1: conv1 (folded-K single dot) + bias + BN1 partial stats ----
    y1, s1, q1 = pl.pallas_call(
        conv1_foldk_stats_kernel,
        grid=(N, nH),
        in_specs=[
            pl.BlockSpec((None, None, TH + 2, W, K1), lambda n, h: (n, h, 0, 0, 0)),
            pl.BlockSpec((K1, C1), lambda n, h: (0, 0)),
            pl.BlockSpec((1, C1), lambda n, h: (0, 0)),
        ],
        out_specs=[
            pl.BlockSpec((None, None, TH + 2, W, C1), lambda n, h: (n, h, 0, 0, 0)),
            pl.BlockSpec((None, None, 1, C1), lambda n, h: (n, h, 0, 0)),
            pl.BlockSpec((None, None, 1, C1), lambda n, h: (n, h, 0, 0)),
        ],
        out_shape=[
            jax.ShapeDtypeStruct((N, nH, TH + 2, W, C1), compute_dtype),
            jax.ShapeDtypeStruct((N, nH, 1, C1), jnp.float32),
            jax.ShapeDtypeStruct((N, nH, 1, C1), jnp.float32),
        ],
        compiler_params=cparams,
        cost_estimate=pl.CostEstimate(
            flops=2 * N * nH * (TH + 2) * W * K1 * C1, transcendentals=0,
            bytes_accessed=(p_tiled.size + w1f.size
                            + N * nH * (TH + 2) * W * C1) * itemsize
                           + 4 * (C1 + 2 * N * nH * C1)),
    )(p_tiled, w1f, b1)

    # global BN1 stats -> folded scale/shift (training-mode biased variance)
    mean1 = jnp.sum(s1, axis=(0, 1)) / NHW
    var1 = jnp.maximum(jnp.sum(q1, axis=(0, 1)) / NHW - mean1 * mean1, 0.0)
    scale1 = g1 * jax.lax.rsqrt(var1 + EPS)
    shift1 = bt1 - mean1 * scale1

    # ---- phase 2: BN1+ReLU -> halo scratch -> conv2 + bias + BN2 partial stats ----
    y2, s2, q2 = pl.pallas_call(
        bn_relu_conv2_stats_kernel,
        grid=(N, nH),
        in_specs=[
            pl.BlockSpec((None, None, TH + 2, W, C1), lambda n, h: (n, h, 0, 0, 0)),
            pl.BlockSpec((1, C1), lambda n, h: (0, 0)),
            pl.BlockSpec((1, C1), lambda n, h: (0, 0)),
            pl.BlockSpec((9, C1, C2), lambda n, h: (0, 0, 0)),
            pl.BlockSpec((1, C2), lambda n, h: (0, 0)),
        ],
        out_specs=[
            pl.BlockSpec((None, TH, W, C2), lambda n, h: (n, h, 0, 0)),
            pl.BlockSpec((None, None, 1, C2), lambda n, h: (n, h, 0, 0)),
            pl.BlockSpec((None, None, 1, C2), lambda n, h: (n, h, 0, 0)),
        ],
        out_shape=[
            jax.ShapeDtypeStruct((N, H, W, C2), compute_dtype),
            jax.ShapeDtypeStruct((N, nH, 1, C2), jnp.float32),
            jax.ShapeDtypeStruct((N, nH, 1, C2), jnp.float32),
        ],
        scratch_shapes=[pltpu.VMEM((TH + 2, W + 2, C1), compute_dtype)],
        compiler_params=cparams,
        cost_estimate=pl.CostEstimate(
            flops=2 * NHW * 9 * C1 * C2 + 6 * N * nH * (TH + 2) * W * C1,
            transcendentals=0,
            bytes_accessed=(N * nH * (TH + 2) * W * C1 + w2f.size
                            + NHW * C2) * itemsize
                           + 4 * (2 * C1 + C2 + 2 * N * nH * C2)),
    )(y1, scale1, shift1, w2f, b2)

    mean2 = jnp.sum(s2, axis=(0, 1)) / NHW
    var2 = jnp.maximum(jnp.sum(q2, axis=(0, 1)) / NHW - mean2 * mean2, 0.0)
    scale2 = g2 * jax.lax.rsqrt(var2 + EPS)
    shift2 = bt2 - mean2 * scale2

    # ---- phase 3: final BN2 + ReLU ----
    out = pl.pallas_call(
        bn_relu_kernel,
        grid=(N, nH),
        in_specs=[
            pl.BlockSpec((None, TH, W, C2), lambda n, h: (n, h, 0, 0)),
            pl.BlockSpec((1, C2), lambda n, h: (0, 0)),
            pl.BlockSpec((1, C2), lambda n, h: (0, 0)),
        ],
        out_specs=pl.BlockSpec((None, TH, W, C2), lambda n, h: (n, h, 0, 0)),
        out_shape=jax.ShapeDtypeStruct((N, H, W, C2), jnp.float32),
        compiler_params=cparams,
        cost_estimate=pl.CostEstimate(
            flops=3 * NHW * C2, transcendentals=0,
            bytes_accessed=NHW * C2 * (itemsize + 4) + 8 * C2),
    )(y2, scale2, shift2)

    # strip channel padding, back to NCHW
    return jnp.transpose(out[..., :Cout], (0, 3, 1, 2))


def ref_double_conv(x_nchw, p):
    """Pure-JAX f32 reference (same math as PyTorch DoubleConv, training mode)."""
    x = jnp.transpose(x_nchw, (0, 2, 3, 1))

    def conv(x, w, b):
        y = jax.lax.conv_general_dilated(
            x, w, window_strides=(1, 1), padding="SAME",
            dimension_numbers=("NHWC", "HWIO", "NHWC"))
        return y + b.reshape(1, 1, 1, -1)

    def bn_relu(y, g, bt):
        m = jnp.mean(y, axis=(0, 1, 2), keepdims=True)
        v = jnp.mean((y - m) ** 2, axis=(0, 1, 2), keepdims=True)
        y = (y - m) * jax.lax.rsqrt(v + EPS)
        y = y * g.reshape(1, 1, 1, -1) + bt.reshape(1, 1, 1, -1)
        return jnp.maximum(y, 0.0)

    y = bn_relu(conv(x, p["w1"], p["b1"]), p["g1"], p["bt1"])
    y = bn_relu(conv(y, p["w2"], p["b2"]), p["g2"], p["bt2"])
    return jnp.transpose(y, (0, 3, 1, 2))


def make_params(key, in_channels, out_channels):
    k1, k2, k3, k4 = jax.random.split(key, 4)
    fan1 = in_channels * 9
    fan2 = out_channels * 9
    return {
        "w1": jax.random.uniform(k1, (3, 3, in_channels, out_channels),
                                 jnp.float32, -1.0, 1.0) / jnp.sqrt(fan1),
        "b1": (jax.random.uniform(k2, (1, out_channels), jnp.float32, -1.0, 1.0)
               / jnp.sqrt(fan1)),
        "g1": jnp.ones((1, out_channels), jnp.float32),
        "bt1": jnp.zeros((1, out_channels), jnp.float32),
        "w2": jax.random.uniform(k3, (3, 3, out_channels, out_channels),
                                 jnp.float32, -1.0, 1.0) / jnp.sqrt(fan2),
        "b2": (jax.random.uniform(k4, (1, out_channels), jnp.float32, -1.0, 1.0)
               / jnp.sqrt(fan2)),
        "g2": jnp.ones((1, out_channels), jnp.float32),
        "bt2": jnp.zeros((1, out_channels), jnp.float32),
    }


if __name__ == "__main__":
    key = jax.random.PRNGKey(0)
    kx, kp = jax.random.split(key)

    N, Cin, Cout, H, W = 2, 4, 8, 16, 16
    x = jax.random.normal(kx, (N, Cin, H, W), jnp.float32)
    params = make_params(kp, Cin, Cout)

    ref = jax.block_until_ready(ref_double_conv(x, params))

    # exactness check: f32 MXU operands / f32 intermediates vs. the f32 reference
    out_f32 = jax.block_until_ready(double_conv(x, params, compute_dtype=jnp.float32))
    assert out_f32.shape == (N, Cout, H, W), out_f32.shape
    assert jnp.allclose(out_f32, ref, atol=1e-3, rtol=1e-3), (
        float(jnp.max(jnp.abs(out_f32 - ref))))

    # fast path: bf16 MXU operands AND bf16 inter-phase activations (BN statistics
    # and accumulation stay f32); extra bf16 roundings of y1/y2 vs. the pure-f32
    # reference motivate the looser tolerance here.
    out = jax.block_until_ready(double_conv(x, params, compute_dtype=jnp.bfloat16))
    assert out.shape == (N, Cout, H, W), out.shape
    assert jnp.allclose(out, ref, atol=4e-2, rtol=4e-2), (
        float(jnp.max(jnp.abs(out - ref))))

    print("KERNEL_OK")
</pallas_src>

<mosaic_0001>
module attributes {stable_mosaic.version = 11 : i64} {
  func.func @conv1_foldk_stats_kernel(%arg0: i32, %arg1: i32, %arg2: memref<1x1x10x16x128xf32, #tpu.memory_space<vmem>>, %arg3: memref<128x128xf32, #tpu.memory_space<vmem>>, %arg4: memref<1x128xf32, #tpu.memory_space<vmem>>, %arg5: memref<1x1x10x16x128xf32, #tpu.memory_space<vmem>>, %arg6: memref<1x1x1x128xf32, #tpu.memory_space<vmem>>, %arg7: memref<1x1x1x128xf32, #tpu.memory_space<vmem>>) attributes {dimension_semantics = [#tpu.dimension_semantics<parallel>, #tpu.dimension_semantics<arbitrary>], iteration_bounds = array<i64: 2, 2>, scalar_prefetch = 0 : i64, scratch_operands = 0 : i64, tpu.core_type = #tpu.core_type<tc>, window_params = [{transform_indices = @transform_0, window_bounds = array<i64: 1, 1, 10, 16, 128>}, {pipeline_mode = #tpu.pipeline_mode<synchronous>, transform_indices = @transform_1, window_bounds = array<i64: 128, 128>}, {pipeline_mode = #tpu.pipeline_mode<synchronous>, transform_indices = @transform_2, window_bounds = array<i64: 1, 128>}, {transform_indices = @transform_3, window_bounds = array<i64: 1, 1, 10, 16, 128>}, {transform_indices = @transform_4, window_bounds = array<i64: 1, 1, 1, 128>}, {transform_indices = @transform_5, window_bounds = array<i64: 1, 1, 1, 128>}]} {
    %c0 = arith.constant 0 : index
    %c0_0 = arith.constant 0 : index
    %c0_1 = arith.constant 0 : index
    %c0_2 = arith.constant 0 : index
    %c0_3 = arith.constant 0 : index
    %0 = vector.load %arg2[%c0, %c0_0, %c0_1, %c0_2, %c0_3] : memref<1x1x10x16x128xf32, #tpu.memory_space<vmem>>, vector<1x1x10x16x128xf32>
    %1 = vector.shape_cast %0 : vector<1x1x10x16x128xf32> to vector<10x16x128xf32>
    %2 = vector.shape_cast %1 : vector<10x16x128xf32> to vector<160x128xf32>
    %c0_4 = arith.constant 0 : index
    %c0_5 = arith.constant 0 : index
    %3 = vector.load %arg3[%c0_4, %c0_5] : memref<128x128xf32, #tpu.memory_space<vmem>>, vector<128x128xf32>
    %cst = arith.constant dense<0.000000e+00> : vector<160x128xf32>
    %4 = tpu.matmul %2, %3, %cst {dimension_numbers = #tpu.dot_dimension_numbers<[1], [0], [0], [1], [0, 0, 1, 1], [], []>} : vector<160x128xf32>, vector<128x128xf32>, vector<160x128xf32> -> vector<160x128xf32>
    %c0_6 = arith.constant 0 : index
    %c0_7 = arith.constant 0 : index
    %5 = vector.load %arg4[%c0_6, %c0_7] : memref<1x128xf32, #tpu.memory_space<vmem>>, vector<1x128xf32>
    %6 = vector.broadcast %5 : vector<1x128xf32> to vector<160x128xf32>
    %7 = arith.addf %4, %6 : vector<160x128xf32>
    %8 = vector.shape_cast %7 : vector<160x128xf32> to vector<10x16x128xf32>
    %9 = vector.extract_strided_slice %8 {offsets = [1, 0, 0], sizes = [8, 16, 128], strides = [1, 1, 1]} : vector<10x16x128xf32> to vector<8x16x128xf32>
    %10 = vector.shape_cast %9 : vector<8x16x128xf32> to vector<128x128xf32>
    %cst_8 = arith.constant dense<0.000000e+00> : vector<128xf32>
    %11 = vector.multi_reduction <add>, %10, %cst_8 [0] : vector<128x128xf32> to vector<128xf32>
    %12 = vector.shape_cast %11 : vector<128xf32> to vector<1x128xf32>
    %c0_9 = arith.constant 0 : index
    %c0_10 = arith.constant 0 : index
    %c0_11 = arith.constant 0 : index
    %c0_12 = arith.constant 0 : index
    %13 = vector.load %arg6[%c0_9, %c0_10, %c0_11, %c0_12] : memref<1x1x1x128xf32, #tpu.memory_space<vmem>>, vector<1x1x1x128xf32>
    %14 = vector.shape_cast %13 : vector<1x1x1x128xf32> to vector<1x128xf32>
    %15 = vector.shape_cast %12 : vector<1x128xf32> to vector<1x1x1x128xf32>
    tpu.vector_store %arg6[%c0_9, %c0_10, %c0_11, %c0_12], %15 {strides = array<i32>} : memref<1x1x1x128xf32, #tpu.memory_space<vmem>>, vector<1x1x1x128xf32>,
    %16 = arith.mulf %10, %10 : vector<128x128xf32>
    %cst_13 = arith.constant dense<0.000000e+00> : vector<128xf32>
    %17 = vector.multi_reduction <add>, %16, %cst_13 [0] : vector<128x128xf32> to vector<128xf32>
    %18 = vector.shape_cast %17 : vector<128xf32> to vector<1x128xf32>
    %c0_14 = arith.constant 0 : index
    %c0_15 = arith.constant 0 : index
    %c0_16 = arith.constant 0 : index
    %c0_17 = arith.constant 0 : index
    %19 = vector.load %arg7[%c0_14, %c0_15, %c0_16, %c0_17] : memref<1x1x1x128xf32, #tpu.memory_space<vmem>>, vector<1x1x1x128xf32>
    %20 = vector.shape_cast %19 : vector<1x1x1x128xf32> to vector<1x128xf32>
    %21 = vector.shape_cast %18 : vector<1x128xf32> to vector<1x1x1x128xf32>
    tpu.vector_store %arg7[%c0_14, %c0_15, %c0_16, %c0_17], %21 {strides = array<i32>} : memref<1x1x1x128xf32, #tpu.memory_space<vmem>>, vector<1x1x1x128xf32>,
    %c0_18 = arith.constant 0 : index
    %c0_19 = arith.constant 0 : index
    %c0_20 = arith.constant 0 : index
    %c0_21 = arith.constant 0 : index
    %c0_22 = arith.constant 0 : index
    %22 = vector.load %arg5[%c0_18, %c0_19, %c0_20, %c0_21, %c0_22] : memref<1x1x10x16x128xf32, #tpu.memory_space<vmem>>, vector<1x1x10x16x128xf32>
    %23 = vector.shape_cast %22 : vector<1x1x10x16x128xf32> to vector<10x16x128xf32>
    %24 = vector.shape_cast %8 : vector<10x16x128xf32> to vector<1x1x10x16x128xf32>
    tpu.vector_store %arg5[%c0_18, %c0_19, %c0_20, %c0_21, %c0_22], %24 {strides = array<i32>} : memref<1x1x10x16x128xf32, #tpu.memory_space<vmem>>, vector<1x1x10x16x128xf32>,
    return
  }
  func.func @transform_0(%arg0: i32, %arg1: i32) -> (i32, i32, i32, i32, i32) {
    %c0_i32 = arith.constant 0 : i32
    %c0_i32_0 = arith.constant 0 : i32
    %c0_i32_1 = arith.constant 0 : i32
    %c0_i32_2 = arith.constant 0 : i32
    return %arg0, %arg1, %c0_i32, %c0_i32_0, %c0_i32_1 : i32, i32, i32, i32, i32
  }
  func.func @transform_1(%arg0: i32, %arg1: i32) -> (i32, i32) {
    %c0_i32 = arith.constant 0 : i32
    %c0_i32_0 = arith.constant 0 : i32
    %c0_i32_1 = arith.constant 0 : i32
    return %c0_i32, %c0_i32_0 : i32, i32
  }
  func.func @transform_2(%arg0: i32, %arg1: i32) -> (i32, i32) {
    %c0_i32 = arith.constant 0 : i32
    %c0_i32_0 = arith.constant 0 : i32
    %c0_i32_1 = arith.constant 0 : i32
    return %c0_i32, %c0_i32_0 : i32, i32
  }
  func.func @transform_3(%arg0: i32, %arg1: i32) -> (i32, i32, i32, i32, i32) {
    %c0_i32 = arith.constant 0 : i32
    %c0_i32_0 = arith.constant 0 : i32
    %c0_i32_1 = arith.constant 0 : i32
    %c0_i32_2 = arith.constant 0 : i32
    return %arg0, %arg1, %c0_i32, %c0_i32_0, %c0_i32_1 : i32, i32, i32, i32, i32
  }
  func.func @transform_4(%arg0: i32, %arg1: i32) -> (i32, i32, i32, i32) {
    %c0_i32 = arith.constant 0 : i32
    %c0_i32_0 = arith.constant 0 : i32
    %c0_i32_1 = arith.constant 0 : i32
    return %arg0, %arg1, %c0_i32, %c0_i32_0 : i32, i32, i32, i32
  }
  func.func @transform_5(%arg0: i32, %arg1: i32) -> (i32, i32, i32, i32) {
    %c0_i32 = arith.constant 0 : i32
    %c0_i32_0 = arith.constant 0 : i32
    %c0_i32_1 = arith.constant 0 : i32
    return %arg0, %arg1, %c0_i32, %c0_i32_0 : i32, i32, i32, i32
  }
}

module attributes {stable_mosaic.version = 11 : i64} {
  func.func @bn_relu_conv2_stats_kernel(%arg0: i32, %arg1: i32, %arg2: memref<1x1x10x16x128xf32, #tpu.memory_space<vmem>>, %arg3: memref<1x128xf32, #tpu.memory_space<vmem>>, %arg4: memref<1x128xf32, #tpu.memory_space<vmem>>, %arg5: memref<9x128x128xf32, #tpu.memory_space<vmem>>, %arg6: memref<1x128xf32, #tpu.memory_space<vmem>>, %arg7: memref<1x8x16x128xf32, #tpu.memory_space<vmem>>, %arg8: memref<1x1x1x128xf32, #tpu.memory_space<vmem>>, %arg9: memref<1x1x1x128xf32, #tpu.memory_space<vmem>>, %arg10: memref<10x18x128xf32, #tpu.memory_space<vmem>>) attributes {dimension_semantics = [#tpu.dimension_semantics<parallel>, #tpu.dimension_semantics<arbitrary>], iteration_bounds = array<i64: 2, 2>, scalar_prefetch = 0 : i64, scratch_operands = 1 : i64, tpu.core_type = #tpu.core_type<tc>, window_params = [{transform_indices = @transform_0, window_bounds = array<i64: 1, 1, 10, 16, 128>}, {pipeline_mode = #tpu.pipeline_mode<synchronous>, transform_indices = @transform_1, window_bounds = array<i64: 1, 128>}, {pipeline_mode = #tpu.pipeline_mode<synchronous>, transform_indices = @transform_2, window_bounds = array<i64: 1, 128>}, {pipeline_mode = #tpu.pipeline_mode<synchronous>, transform_indices = @transform_3, window_bounds = array<i64: 9, 128, 128>}, {pipeline_mode = #tpu.pipeline_mode<synchronous>, transform_indices = @transform_4, window_bounds = array<i64: 1, 128>}, {transform_indices = @transform_5, window_bounds = array<i64: 1, 8, 16, 128>}, {transform_indices = @transform_6, window_bounds = array<i64: 1, 1, 1, 128>}, {transform_indices = @transform_7, window_bounds = array<i64: 1, 1, 1, 128>}]} {
    %c0_i32 = arith.constant 0 : i32
    %0 = arith.cmpi eq, %arg1, %c0_i32 : i32
    %1 = arith.extui %0 : i1 to i32
    %c0_i32_0 = arith.constant 0 : i32
    %2 = arith.cmpi ne, %1, %c0_i32_0 : i32
    scf.if %2 {
      %cst_87 = arith.constant 0.000000e+00 : f32
      %105 = vector.broadcast %cst_87 : f32 to vector<10x1x128xf32>
      %c0_88 = arith.constant 0 : index
      %c0_89 = arith.constant 0 : index
      %c0_90 = arith.constant 0 : index
      %106 = vector.load %arg10[%c0_88, %c0_89, %c0_90] : memref<10x18x128xf32, #tpu.memory_space<vmem>>, vector<10x1x128xf32>
      tpu.vector_store %arg10[%c0_88, %c0_89, %c0_90], %105 {strides = array<i32>} : memref<10x18x128xf32, #tpu.memory_space<vmem>>, vector<10x1x128xf32>,
      %cst_91 = arith.constant 0.000000e+00 : f32
      %107 = vector.broadcast %cst_91 : f32 to vector<10x1x128xf32>
      %c0_92 = arith.constant 0 : index
      %c17 = arith.constant 17 : index
      %c0_93 = arith.constant 0 : index
      %108 = vector.load %arg10[%c0_92, %c17, %c0_93] : memref<10x18x128xf32, #tpu.memory_space<vmem>>, vector<10x1x128xf32>
      tpu.vector_store %arg10[%c0_92, %c17, %c0_93], %107 {strides = array<i32>} : memref<10x18x128xf32, #tpu.memory_space<vmem>>, vector<10x1x128xf32>,
    } else {
    }
    %c0 = arith.constant 0 : index
    %c0_1 = arith.constant 0 : index
    %c0_2 = arith.constant 0 : index
    %c0_3 = arith.constant 0 : index
    %c0_4 = arith.constant 0 : index
    %3 = vector.load %arg2[%c0, %c0_1, %c0_2, %c0_3, %c0_4] : memref<1x1x10x16x128xf32, #tpu.memory_space<vmem>>, vector<1x1x10x16x128xf32>
    %4 = vector.shape_cast %3 : vector<1x1x10x16x128xf32> to vector<10x16x128xf32>
    %c0_5 = arith.constant 0 : index
    %c0_6 = arith.constant 0 : index
    %5 = vector.load %arg3[%c0_5, %c0_6] : memref<1x128xf32, #tpu.memory_space<vmem>>, vector<1x128xf32>
    %6 = vector.shape_cast %5 : vector<1x128xf32> to vector<1x1x128xf32>
    %7 = vector.broadcast %6 : vector<1x1x128xf32> to vector<10x16x128xf32>
    %8 = arith.mulf %4, %7 : vector<10x16x128xf32>
    %c0_7 = arith.constant 0 : index
    %c0_8 = arith.constant 0 : index
    %9 = vector.load %arg4[%c0_7, %c0_8] : memref<1x128xf32, #tpu.memory_space<vmem>>, vector<1x128xf32>
    %10 = vector.shape_cast %9 : vector<1x128xf32> to vector<1x1x128xf32>
    %11 = vector.broadcast %10 : vector<1x1x128xf32> to vector<10x16x128xf32>
    %12 = arith.addf %8, %11 : vector<10x16x128xf32>
    %cst = arith.constant 0.000000e+00 : f32
    %13 = vector.broadcast %cst : f32 to vector<10x16x128xf32>
    %14 = arith.maximumf %12, %13 : vector<10x16x128xf32>
    %15 = tpu.iota {dimensions = array<i32: 0>} : vector<10x1x1xi32>
    %c0_i32_9 = arith.constant 0 : i32
    %16 = vector.broadcast %c0_i32_9 : i32 to vector<10x1x1xi32>
    %17 = arith.cmpi sgt, %15, %16 : vector<10x1x1xi32>
    %c0_i32_10 = arith.constant 0 : i32
    %18 = arith.cmpi sgt, %arg1, %c0_i32_10 : i32
    %19 = vector.broadcast %18 : i1 to vector<10x1x1xi1>
    %20 = arith.ori %17, %19 : vector<10x1x1xi1>
    %c9_i32 = arith.constant 9 : i32
    %21 = vector.broadcast %c9_i32 : i32 to vector<10x1x1xi32>
    %22 = arith.cmpi slt, %15, %21 : vector<10x1x1xi32>
    %c1_i32 = arith.constant 1 : i32
    %23 = arith.cmpi slt, %arg1, %c1_i32 : i32
    %24 = vector.broadcast %23 : i1 to vector<10x1x1xi1>
    %25 = arith.ori %22, %24 : vector<10x1x1xi1>
    %26 = arith.andi %20, %25 : vector<10x1x1xi1>
    %cst_11 = arith.constant 0.000000e+00 : f32
    %27 = vector.shape_cast %26 : vector<10x1x1xi1> to vector<10x1x1xi1>
    %28 = vector.broadcast %27 : vector<10x1x1xi1> to vector<10x16x128xi1>
    %29 = vector.broadcast %cst_11 : f32 to vector<10x16x128xf32>
    %30 = arith.select %28, %14, %29 : vector<10x16x128xi1>, vector<10x16x128xf32>
    %c0_12 = arith.constant 0 : index
    %c1 = arith.constant 1 : index
    %c0_13 = arith.constant 0 : index
    %31 = vector.load %arg10[%c0_12, %c1, %c0_13] : memref<10x18x128xf32, #tpu.memory_space<vmem>>, vector<10x16x128xf32>
    tpu.vector_store %arg10[%c0_12, %c1, %c0_13], %30 {strides = array<i32>} : memref<10x18x128xf32, #tpu.memory_space<vmem>>, vector<10x16x128xf32>,
    %cst_14 = arith.constant 0.000000e+00 : f32
    %32 = vector.broadcast %cst_14 : f32 to vector<128x128xf32>
    %c0_15 = arith.constant 0 : index
    %c0_16 = arith.constant 0 : index
    %c0_17 = arith.constant 0 : index
    %33 = vector.load %arg10[%c0_15, %c0_16, %c0_17] : memref<10x18x128xf32, #tpu.memory_space<vmem>>, vector<8x16x128xf32>
    %34 = vector.shape_cast %33 : vector<8x16x128xf32> to vector<128x128xf32>
    %c0_18 = arith.constant 0 : index
    %c0_19 = arith.constant 0 : index
    %c0_20 = arith.constant 0 : index
    %35 = vector.load %arg5[%c0_18, %c0_19, %c0_20] : memref<9x128x128xf32, #tpu.memory_space<vmem>>, vector<1x128x128xf32>
    %36 = vector.shape_cast %35 : vector<1x128x128xf32> to vector<128x128xf32>
    %cst_21 = arith.constant dense<0.000000e+00> : vector<128x128xf32>
    %37 = tpu.matmul %34, %36, %cst_21 {dimension_numbers = #tpu.dot_dimension_numbers<[1], [0], [0], [1], [0, 0, 1, 1], [], []>} : vector<128x128xf32>, vector<128x128xf32>, vector<128x128xf32> -> vector<128x128xf32>
    %38 = arith.addf %32, %37 : vector<128x128xf32>
    %c0_22 = arith.constant 0 : index
    %c1_23 = arith.constant 1 : index
    %c0_24 = arith.constant 0 : index
    %39 = vector.load %arg10[%c0_22, %c1_23, %c0_24] : memref<10x18x128xf32, #tpu.memory_space<vmem>>, vector<8x16x128xf32>
    %40 = vector.shape_cast %39 : vector<8x16x128xf32> to vector<128x128xf32>
    %c1_25 = arith.constant 1 : index
    %c0_26 = arith.constant 0 : index
    %c0_27 = arith.constant 0 : index
    %41 = vector.load %arg5[%c1_25, %c0_26, %c0_27] : memref<9x128x128xf32, #tpu.memory_space<vmem>>, vector<1x128x128xf32>
    %42 = vector.shape_cast %41 : vector<1x128x128xf32> to vector<128x128xf32>
    %cst_28 = arith.constant dense<0.000000e+00> : vector<128x128xf32>
    %43 = tpu.matmul %40, %42, %cst_28 {dimension_numbers = #tpu.dot_dimension_numbers<[1], [0], [0], [1], [0, 0, 1, 1], [], []>} : vector<128x128xf32>, vector<128x128xf32>, vector<128x128xf32> -> vector<128x128xf32>
    %44 = arith.addf %38, %43 : vector<128x128xf32>
    %c0_29 = arith.constant 0 : index
    %c2 = arith.constant 2 : index
    %c0_30 = arith.constant 0 : index
    %45 = vector.load %arg10[%c0_29, %c2, %c0_30] : memref<10x18x128xf32, #tpu.memory_space<vmem>>, vector<8x16x128xf32>
    %46 = vector.shape_cast %45 : vector<8x16x128xf32> to vector<128x128xf32>
    %c2_31 = arith.constant 2 : index
    %c0_32 = arith.constant 0 : index
    %c0_33 = arith.constant 0 : index
    %47 = vector.load %arg5[%c2_31, %c0_32, %c0_33] : memref<9x128x128xf32, #tpu.memory_space<vmem>>, vector<1x128x128xf32>
    %48 = vector.shape_cast %47 : vector<1x128x128xf32> to vector<128x128xf32>
    %cst_34 = arith.constant dense<0.000000e+00> : vector<128x128xf32>
    %49 = tpu.matmul %46, %48, %cst_34 {dimension_numbers = #tpu.dot_dimension_numbers<[1], [0], [0], [1], [0, 0, 1, 1], [], []>} : vector<128x128xf32>, vector<128x128xf32>, vector<128x128xf32> -> vector<128x128xf32>
    %50 = arith.addf %44, %49 : vector<128x128xf32>
    %c1_35 = arith.constant 1 : index
    %c0_36 = arith.constant 0 : index
    %c0_37 = arith.constant 0 : index
    %51 = vector.load %arg10[%c1_35, %c0_36, %c0_37] : memref<10x18x128xf32, #tpu.memory_space<vmem>>, vector<8x16x128xf32>
    %52 = vector.shape_cast %51 : vector<8x16x128xf32> to vector<128x128xf32>
    %c3 = arith.constant 3 : index
    %c0_38 = arith.constant 0 : index
    %c0_39 = arith.constant 0 : index
    %53 = vector.load %arg5[%c3, %c0_38, %c0_39] : memref<9x128x128xf32, #tpu.memory_space<vmem>>, vector<1x128x128xf32>
    %54 = vector.shape_cast %53 : vector<1x128x128xf32> to vector<128x128xf32>
    %cst_40 = arith.constant dense<0.000000e+00> : vector<128x128xf32>
    %55 = tpu.matmul %52, %54, %cst_40 {dimension_numbers = #tpu.dot_dimension_numbers<[1], [0], [0], [1], [0, 0, 1, 1], [], []>} : vector<128x128xf32>, vector<128x128xf32>, vector<128x128xf32> -> vector<128x128xf32>
    %56 = arith.addf %50, %55 : vector<128x128xf32>
    %c1_41 = arith.constant 1 : index
    %c1_42 = arith.constant 1 : index
    %c0_43 = arith.constant 0 : index
    %57 = vector.load %arg10[%c1_41, %c1_42, %c0_43] : memref<10x18x128xf32, #tpu.memory_space<vmem>>, vector<8x16x128xf32>
    %58 = vector.shape_cast %57 : vector<8x16x128xf32> to vector<128x128xf32>
    %c4 = arith.constant 4 : index
    %c0_44 = arith.constant 0 : index
    %c0_45 = arith.constant 0 : index
    %59 = vector.load %arg5[%c4, %c0_44, %c0_45] : memref<9x128x128xf32, #tpu.memory_space<vmem>>, vector<1x128x128xf32>
    %60 = vector.shape_cast %59 : vector<1x128x128xf32> to vector<128x128xf32>
    %cst_46 = arith.constant dense<0.000000e+00> : vector<128x128xf32>
    %61 = tpu.matmul %58, %60, %cst_46 {dimension_numbers = #tpu.dot_dimension_numbers<[1], [0], [0], [1], [0, 0, 1, 1], [], []>} : vector<128x128xf32>, vector<128x128xf32>, vector<128x128xf32> -> vector<128x128xf32>
    %62 = arith.addf %56, %61 : vector<128x128xf32>
    %c1_47 = arith.constant 1 : index
    %c2_48 = arith.constant 2 : index
    %c0_49 = arith.constant 0 : index
    %63 = vector.load %arg10[%c1_47, %c2_48, %c0_49] : memref<10x18x128xf32, #tpu.memory_space<vmem>>, vector<8x16x128xf32>
    %64 = vector.shape_cast %63 : vector<8x16x128xf32> to vector<128x128xf32>
    %c5 = arith.constant 5 : index
    %c0_50 = arith.constant 0 : index
    %c0_51 = arith.constant 0 : index
    %65 = vector.load %arg5[%c5, %c0_50, %c0_51] : memref<9x128x128xf32, #tpu.memory_space<vmem>>, vector<1x128x128xf32>
    %66 = vector.shape_cast %65 : vector<1x128x128xf32> to vector<128x128xf32>
    %cst_52 = arith.constant dense<0.000000e+00> : vector<128x128xf32>
    %67 = tpu.matmul %64, %66, %cst_52 {dimension_numbers = #tpu.dot_dimension_numbers<[1], [0], [0], [1], [0, 0, 1, 1], [], []>} : vector<128x128xf32>, vector<128x128xf32>, vector<128x128xf32> -> vector<128x128xf32>
    %68 = arith.addf %62, %67 : vector<128x128xf32>
    %c2_53 = arith.constant 2 : index
    %c0_54 = arith.constant 0 : index
    %c0_55 = arith.constant 0 : index
    %69 = vector.load %arg10[%c2_53, %c0_54, %c0_55] : memref<10x18x128xf32, #tpu.memory_space<vmem>>, vector<8x16x128xf32>
    %70 = vector.shape_cast %69 : vector<8x16x128xf32> to vector<128x128xf32>
    %c6 = arith.constant 6 : index
    %c0_56 = arith.constant 0 : index
    %c0_57 = arith.constant 0 : index
    %71 = vector.load %arg5[%c6, %c0_56, %c0_57] : memref<9x128x128xf32, #tpu.memory_space<vmem>>, vector<1x128x128xf32>
    %72 = vector.shape_cast %71 : vector<1x128x128xf32> to vector<128x128xf32>
    %cst_58 = arith.constant dense<0.000000e+00> : vector<128x128xf32>
    %73 = tpu.matmul %70, %72, %cst_58 {dimension_numbers = #tpu.dot_dimension_numbers<[1], [0], [0], [1], [0, 0, 1, 1], [], []>} : vector<128x128xf32>, vector<128x128xf32>, vector<128x128xf32> -> vector<128x128xf32>
    %74 = arith.addf %68, %73 : vector<128x128xf32>
    %c2_59 = arith.constant 2 : index
    %c1_60 = arith.constant 1 : index
    %c0_61 = arith.constant 0 : index
    %75 = vector.load %arg10[%c2_59, %c1_60, %c0_61] : memref<10x18x128xf32, #tpu.memory_space<vmem>>, vector<8x16x128xf32>
    %76 = vector.shape_cast %75 : vector<8x16x128xf32> to vector<128x128xf32>
    %c7 = arith.constant 7 : index
    %c0_62 = arith.constant 0 : index
    %c0_63 = arith.constant 0 : index
    %77 = vector.load %arg5[%c7, %c0_62, %c0_63] : memref<9x128x128xf32, #tpu.memory_space<vmem>>, vector<1x128x128xf32>
    %78 = vector.shape_cast %77 : vector<1x128x128xf32> to vector<128x128xf32>
    %cst_64 = arith.constant dense<0.000000e+00> : vector<128x128xf32>
    %79 = tpu.matmul %76, %78, %cst_64 {dimension_numbers = #tpu.dot_dimension_numbers<[1], [0], [0], [1], [0, 0, 1, 1], [], []>} : vector<128x128xf32>, vector<128x128xf32>, vector<128x128xf32> -> vector<128x128xf32>
    %80 = arith.addf %74, %79 : vector<128x128xf32>
    %c2_65 = arith.constant 2 : index
    %c2_66 = arith.constant 2 : index
    %c0_67 = arith.constant 0 : index
    %81 = vector.load %arg10[%c2_65, %c2_66, %c0_67] : memref<10x18x128xf32, #tpu.memory_space<vmem>>, vector<8x16x128xf32>
    %82 = vector.shape_cast %81 : vector<8x16x128xf32> to vector<128x128xf32>
    %c8 = arith.constant 8 : index
    %c0_68 = arith.constant 0 : index
    %c0_69 = arith.constant 0 : index
    %83 = vector.load %arg5[%c8, %c0_68, %c0_69] : memref<9x128x128xf32, #tpu.memory_space<vmem>>, vector<1x128x128xf32>
    %84 = vector.shape_cast %83 : vector<1x128x128xf32> to vector<128x128xf32>
    %cst_70 = arith.constant dense<0.000000e+00> : vector<128x128xf32>
    %85 = tpu.matmul %82, %84, %cst_70 {dimension_numbers = #tpu.dot_dimension_numbers<[1], [0], [0], [1], [0, 0, 1, 1], [], []>} : vector<128x128xf32>, vector<128x128xf32>, vector<128x128xf32> -> vector<128x128xf32>
    %86 = arith.addf %80, %85 : vector<128x128xf32>
    %c0_71 = arith.constant 0 : index
    %c0_72 = arith.constant 0 : index
    %87 = vector.load %arg6[%c0_71, %c0_72] : memref<1x128xf32, #tpu.memory_space<vmem>>, vector<1x128xf32>
    %88 = vector.broadcast %87 : vector<1x128xf32> to vector<128x128xf32>
    %89 = arith.addf %86, %88 : vector<128x128xf32>
    %cst_73 = arith.constant dense<0.000000e+00> : vector<128xf32>
    %90 = vector.multi_reduction <add>, %89, %cst_73 [0] : vector<128x128xf32> to vector<128xf32>
    %91 = vector.shape_cast %90 : vector<128xf32> to vector<1x128xf32>
    %c0_74 = arith.constant 0 : index
    %c0_75 = arith.constant 0 : index
    %c0_76 = arith.constant 0 : index
    %c0_77 = arith.constant 0 : index
    %92 = vector.load %arg8[%c0_74, %c0_75, %c0_76, %c0_77] : memref<1x1x1x128xf32, #tpu.memory_space<vmem>>, vector<1x1x1x128xf32>
    %93 = vector.shape_cast %92 : vector<1x1x1x128xf32> to vector<1x128xf32>
    %94 = vector.shape_cast %91 : vector<1x128xf32> to vector<1x1x1x128xf32>
    tpu.vector_store %arg8[%c0_74, %c0_75, %c0_76, %c0_77], %94 {strides = array<i32>} : memref<1x1x1x128xf32, #tpu.memory_space<vmem>>, vector<1x1x1x128xf32>,
    %95 = arith.mulf %89, %89 : vector<128x128xf32>
    %cst_78 = arith.constant dense<0.000000e+00> : vector<128xf32>
    %96 = vector.multi_reduction <add>, %95, %cst_78 [0] : vector<128x128xf32> to vector<128xf32>
    %97 = vector.shape_cast %96 : vector<128xf32> to vector<1x128xf32>
    %c0_79 = arith.constant 0 : index
    %c0_80 = arith.constant 0 : index
    %c0_81 = arith.constant 0 : index
    %c0_82 = arith.constant 0 : index
    %98 = vector.load %arg9[%c0_79, %c0_80, %c0_81, %c0_82] : memref<1x1x1x128xf32, #tpu.memory_space<vmem>>, vector<1x1x1x128xf32>
    %99 = vector.shape_cast %98 : vector<1x1x1x128xf32> to vector<1x128xf32>
    %100 = vector.shape_cast %97 : vector<1x128xf32> to vector<1x1x1x128xf32>
    tpu.vector_store %arg9[%c0_79, %c0_80, %c0_81, %c0_82], %100 {strides = array<i32>} : memref<1x1x1x128xf32, #tpu.memory_space<vmem>>, vector<1x1x1x128xf32>,
    %101 = vector.shape_cast %89 : vector<128x128xf32> to vector<8x16x128xf32>
    %c0_83 = arith.constant 0 : index
    %c0_84 = arith.constant 0 : index
    %c0_85 = arith.constant 0 : index
    %c0_86 = arith.constant 0 : index
    %102 = vector.load %arg7[%c0_83, %c0_84, %c0_85, %c0_86] : memref<1x8x16x128xf32, #tpu.memory_space<vmem>>, vector<1x8x16x128xf32>
    %103 = vector.shape_cast %102 : vector<1x8x16x128xf32> to vector<8x16x128xf32>
    %104 = vector.shape_cast %101 : vector<8x16x128xf32> to vector<1x8x16x128xf32>
    tpu.vector_store %arg7[%c0_83, %c0_84, %c0_85, %c0_86], %104 {strides = array<i32>} : memref<1x8x16x128xf32, #tpu.memory_space<vmem>>, vector<1x8x16x128xf32>,
    return
  }
  func.func @transform_0(%arg0: i32, %arg1: i32) -> (i32, i32, i32, i32, i32) {
    %c0_i32 = arith.constant 0 : i32
    %c0_i32_0 = arith.constant 0 : i32
    %c0_i32_1 = arith.constant 0 : i32
    %c0_i32_2 = arith.constant 0 : i32
    return %arg0, %arg1, %c0_i32, %c0_i32_0, %c0_i32_1 : i32, i32, i32, i32, i32
  }
  func.func @transform_1(%arg0: i32, %arg1: i32) -> (i32, i32) {
    %c0_i32 = arith.constant 0 : i32
    %c0_i32_0 = arith.constant 0 : i32
    %c0_i32_1 = arith.constant 0 : i32
    return %c0_i32, %c0_i32_0 : i32, i32
  }
  func.func @transform_2(%arg0: i32, %arg1: i32) -> (i32, i32) {
    %c0_i32 = arith.constant 0 : i32
    %c0_i32_0 = arith.constant 0 : i32
    %c0_i32_1 = arith.constant 0 : i32
    return %c0_i32, %c0_i32_0 : i32, i32
  }
  func.func @transform_3(%arg0: i32, %arg1: i32) -> (i32, i32, i32) {
    %c0_i32 = arith.constant 0 : i32
    %c0_i32_0 = arith.constant 0 : i32
    %c0_i32_1 = arith.constant 0 : i32
    %c0_i32_2 = arith.constant 0 : i32
    return %c0_i32, %c0_i32_0, %c0_i32_1 : i32, i32, i32
  }
  func.func @transform_4(%arg0: i32, %arg1: i32) -> (i32, i32) {
    %c0_i32 = arith.constant 0 : i32
    %c0_i32_0 = arith.constant 0 : i32
    %c0_i32_1 = arith.constant 0 : i32
    return %c0_i32, %c0_i32_0 : i32, i32
  }
  func.func @transform_5(%arg0: i32, %arg1: i32) -> (i32, i32, i32, i32) {
    %c0_i32 = arith.constant 0 : i32
    %c0_i32_0 = arith.constant 0 : i32
    %c0_i32_1 = arith.constant 0 : i32
    return %arg0, %arg1, %c0_i32, %c0_i32_0 : i32, i32, i32, i32
  }
  func.func @transform_6(%arg0: i32, %arg1: i32) -> (i32, i32, i32, i32) {
    %c0_i32 = arith.constant 0 : i32
    %c0_i32_0 = arith.constant 0 : i32
    %c0_i32_1 = arith.constant 0 : i32
    return %arg0, %arg1, %c0_i32, %c0_i32_0 : i32, i32, i32, i32
  }
  func.func @transform_7(%arg0: i32, %arg1: i32) -> (i32, i32, i32, i32) {
    %c0_i32 = arith.constant 0 : i32
    %c0_i32_0 = arith.constant 0 : i32
    %c0_i32_1 = arith.constant 0 : i32
    return %arg0, %arg1, %c0_i32, %c0_i32_0 : i32, i32, i32, i32
  }
}

module attributes {stable_mosaic.version = 11 : i64} {
  func.func @bn_relu_kernel(%arg0: i32, %arg1: i32, %arg2: memref<1x8x16x128xf32, #tpu.memory_space<vmem>>, %arg3: memref<1x128xf32, #tpu.memory_space<vmem>>, %arg4: memref<1x128xf32, #tpu.memory_space<vmem>>, %arg5: memref<1x8x16x128xf32, #tpu.memory_space<vmem>>) attributes {dimension_semantics = [#tpu.dimension_semantics<parallel>, #tpu.dimension_semantics<arbitrary>], iteration_bounds = array<i64: 2, 2>, scalar_prefetch = 0 : i64, scratch_operands = 0 : i64, tpu.core_type = #tpu.core_type<tc>, window_params = [{transform_indices = @transform_0, window_bounds = array<i64: 1, 8, 16, 128>}, {pipeline_mode = #tpu.pipeline_mode<synchronous>, transform_indices = @transform_1, window_bounds = array<i64: 1, 128>}, {pipeline_mode = #tpu.pipeline_mode<synchronous>, transform_indices = @transform_2, window_bounds = array<i64: 1, 128>}, {transform_indices = @transform_3, window_bounds = array<i64: 1, 8, 16, 128>}]} {
    %c0 = arith.constant 0 : index
    %c0_0 = arith.constant 0 : index
    %c0_1 = arith.constant 0 : index
    %c0_2 = arith.constant 0 : index
    %0 = vector.load %arg2[%c0, %c0_0, %c0_1, %c0_2] : memref<1x8x16x128xf32, #tpu.memory_space<vmem>>, vector<1x8x16x128xf32>
    %1 = vector.shape_cast %0 : vector<1x8x16x128xf32> to vector<8x16x128xf32>
    %c0_3 = arith.constant 0 : index
    %c0_4 = arith.constant 0 : index
    %2 = vector.load %arg3[%c0_3, %c0_4] : memref<1x128xf32, #tpu.memory_space<vmem>>, vector<1x128xf32>
    %3 = vector.shape_cast %2 : vector<1x128xf32> to vector<1x1x128xf32>
    %4 = vector.broadcast %3 : vector<1x1x128xf32> to vector<8x16x128xf32>
    %5 = arith.mulf %1, %4 : vector<8x16x128xf32>
    %c0_5 = arith.constant 0 : index
    %c0_6 = arith.constant 0 : index
    %6 = vector.load %arg4[%c0_5, %c0_6] : memref<1x128xf32, #tpu.memory_space<vmem>>, vector<1x128xf32>
    %7 = vector.shape_cast %6 : vector<1x128xf32> to vector<1x1x128xf32>
    %8 = vector.broadcast %7 : vector<1x1x128xf32> to vector<8x16x128xf32>
    %9 = arith.addf %5, %8 : vector<8x16x128xf32>
    %cst = arith.constant 0.000000e+00 : f32
    %10 = vector.broadcast %cst : f32 to vector<8x16x128xf32>
    %11 = arith.maximumf %9, %10 : vector<8x16x128xf32>
    %c0_7 = arith.constant 0 : index
    %c0_8 = arith.constant 0 : index
    %c0_9 = arith.constant 0 : index
    %c0_10 = arith.constant 0 : index
    %12 = vector.load %arg5[%c0_7, %c0_8, %c0_9, %c0_10] : memref<1x8x16x128xf32, #tpu.memory_space<vmem>>, vector<1x8x16x128xf32>
    %13 = vector.shape_cast %12 : vector<1x8x16x128xf32> to vector<8x16x128xf32>
    %14 = vector.shape_cast %11 : vector<8x16x128xf32> to vector<1x8x16x128xf32>
    tpu.vector_store %arg5[%c0_7, %c0_8, %c0_9, %c0_10], %14 {strides = array<i32>} : memref<1x8x16x128xf32, #tpu.memory_space<vmem>>, vector<1x8x16x128xf32>,
    return
  }
  func.func @transform_0(%arg0: i32, %arg1: i32) -> (i32, i32, i32, i32) {
    %c0_i32 = arith.constant 0 : i32
    %c0_i32_0 = arith.constant 0 : i32
    %c0_i32_1 = arith.constant 0 : i32
    return %arg0, %arg1, %c0_i32, %c0_i32_0 : i32, i32, i32, i32
  }
  func.func @transform_1(%arg0: i32, %arg1: i32) -> (i32, i32) {
    %c0_i32 = arith.constant 0 : i32
    %c0_i32_0 = arith.constant 0 : i32
    %c0_i32_1 = arith.constant 0 : i32
    return %c0_i32, %c0_i32_0 : i32, i32
  }
  func.func @transform_2(%arg0: i32, %arg1: i32) -> (i32, i32) {
    %c0_i32 = arith.constant 0 : i32
    %c0_i32_0 = arith.constant 0 : i32
    %c0_i32_1 = arith.constant 0 : i32
    return %c0_i32, %c0_i32_0 : i32, i32
  }
  func.func @transform_3(%arg0: i32, %arg1: i32) -> (i32, i32, i32, i32) {
    %c0_i32 = arith.constant 0 : i32
    %c0_i32_0 = arith.constant 0 : i32
    %c0_i32_1 = arith.constant 0 : i32
    return %arg0, %arg1, %c0_i32, %c0_i32_0 : i32, i32, i32, i32
  }
}

</mosaic_0001>

<bundles_post_ra>
// kernel: double_conv.3
= control target key start
LH: loop header
LB: loop body
LE: loop exit
PB: predicated region body
PF: predicated region fallthrough
CT: control target
= control target key end

     0   :  { %s1017_s18 = smov 0   ;;  %s1019_s19 = smov 0   ;;  %s1230_s0 = inlined_call_operand.vmem [shape: f32[2,2,10,16,128], index: 0, kind: input, shape index: {}]   ;;  %s1231_s1 = inlined_call_operand.vmem [shape: f32[128,128], index: 1, kind: input, shape index: {}]   ;;  %s1232_s2 = inlined_call_operand.vmem [shape: f32[1,128], index: 2, kind: input, shape index: {}]   ;;  %s1233_s3 = inlined_call_operand.vmem [shape: f32[2,2,10,16,128], index: 3, kind: output, shape index: {0}]   ;;  %s1234_s4 = inlined_call_operand.vmem [shape: f32[2,2,1,128], index: 4, kind: output, shape index: {1}]   ;;  %s1235_s5 = inlined_call_operand.vmem [shape: f32[2,2,1,128], index: 5, kind: output, shape index: {2}]  }
   0x1   :  { %s1021_s20 = smov 0   ;;  %s1023_s21 = smov 0  }
   0x2   :  { %s1025_s22 = smov 0  }
   0x3 LB: > { %s25_s23 = sadd.s32 1, %s977_s20  ;;  %s28_s24 = sadd.s32 1, %s981_s21  ;;  %s985_s22 = sphi %s1025_s22, %s16_s22   ;;  %s981_s21 = sphi %s1023_s21, %s1239_s21   ;;  %s977_s20 = sphi %s1021_s20, %s1238_s20   ;;  %s973_s19 = sphi %s1019_s19, %s1237_s19   ;;  %s969_s18 = sphi %s1017_s18, %s1236_s18  }
   0x4   : > { %p26_p0 = scmp.ge.s32.totalorder %s25_s23, 2  ;;  %p767_p1 = scmp.ge.s32.totalorder %s985_s22, 1 }
   0x5   : > { %p216_p2 = scmp.lt.s32.totalorder %s985_s22, 5 }
   0x6   : > { %s1241_s23 = smov (%p26_p0, %s25_s23), 0  ;;  %s1243_s24 = smov (!%p26_p0, %s28_s24), %s981_s21 }
   0x7   : > { %p217_p3 = pnand %p767_p1, %p216_p2  ;;  %p30_p4 = scmp.ge.s32.totalorder %s1243_s24, 2 }
   0x8   : > { %p266_p5 = scmp.lt.s32.totalorder (!%p217_p3), %s973_s19, 1  ;;  %p268_p6 = scmp.lt.s32.totalorder (!%p217_p3), %s969_s18, 1 }
   0x9   : > { %s1245_s24 = smov (%p30_p4, %s1243_s24), 0  ;;  %220 = sbr.rel (%p217_p3) target bundleno = 295 (0x127), region = 32 }
   0xe   : > { %v333_v0 = vld [vmem:[%s1231_s1 + $0x78] sm:$0xff]  ;;  %v332_v1 = vld [vmem:[%s1231_s1 + $0x70] sm:$0xff]  ;;  %v331_v2 = vld [vmem:[%s1231_s1 + $0x68] sm:$0xff]  ;;  %s1247_s19 = smov (!%p266_p5, %s973_s19), 1  ;;  %s1249_s18 = smov (!%p268_p6, %s969_s18), 1 }
   0xf   : > { %811 = vmatprep.subr.mxu0 %v333_v0  ;;  %873 = vmatprep.subr.mxu1 %v333_v0  ;;  %v330_v3 = vld [vmem:[%s1231_s1 + $0x60] sm:$0xff]  ;;  %s906_s8 = smul.u32 40, %s1247_s19  ;;  %v329_v4 = vld [vmem:[%s1231_s1 + $0x58] sm:$0xff]  ;;  %v328_v5 = vld [vmem:[%s1231_s1 + $0x50] sm:$0xff] }
  0x10   : > { %812 = vmatpush3.msra.mxu0 %v333_v0  ;;  %889 = vmatpush3.msra.mxu1 %v333_v0  ;;  %s905_s9 = smul.u32 20, %s1249_s18  ;;  %v327_v6 = vld [vmem:[%s1231_s1 + $0x48] sm:$0xff]  ;;  %v326_v7 = vld [vmem:[%s1231_s1 + $0x40] sm:$0xff]  ;;  %v325_v9 = vld [vmem:[%s1231_s1 + $0x38] sm:$0xff] }
  0x11   : > { %813 = vmatprep.subr.mxu0 %v332_v1  ;;  %874 = vmatprep.subr.mxu1 %v332_v1  ;;  %v324_v10 = vld [vmem:[%s1231_s1 + $0x30] sm:$0xff]  ;;  %v323_v11 = vld [vmem:[%s1231_s1 + $0x28] sm:$0xff]  ;;  %v322_v12 = vld [vmem:[%s1231_s1 + $0x20] sm:$0xff] }
  0x12   : > { %814 = vmatpush3.msra.mxu0 %v332_v1  ;;  %890 = vmatpush3.msra.mxu1 %v332_v1  ;;  %s1068_s12 = sadd.s32 %s906_s8, %s905_s9  ;;  %v321_v13 = vld [vmem:[%s1231_s1 + $0x18] sm:$0xff]  ;;  %v320_v14 = vld [vmem:[%s1231_s1 + $0x10] sm:$0xff]  ;;  %v319_v15 = vld [vmem:[%s1231_s1 + $0x8] sm:$0xff] }
  0x13   : > { %815 = vmatprep.subr.mxu0 %v331_v2  ;;  %875 = vmatprep.subr.mxu1 %v331_v2  ;;  %s768_s15 = sshll.u32 %s1068_s12, 3  ;;  %v318_v16 = vld [vmem:[%s1231_s1] sm:$0xff]  ;;  %s770_s12 = sshll.u32 %s1247_s19, 1 }
  0x14   : > { %816 = vmatpush3.msra.mxu0 %v331_v2  ;;  %891 = vmatpush3.msra.mxu1 %v331_v2  ;;  %s1079_s25 = scalar_lea.vmem %s1230_s0, %s768_s15  ;;  %v1134_v36 = vld [vmem:[%s1232_s2] ss:$0 sm:$0xff]  ;;  %s1141_s10 = scalar_lea.vmem %s1233_s3, %s768_s15 }
  0x15   : > { %817 = vmatprep.subr.mxu0 %v330_v3  ;;  %876 = vmatprep.subr.mxu1 %v330_v3  ;;  %v298_v8 = vld [vmem:[%s1079_s25] sm:$0xff]  ;;  %v299_v17 = vld [vmem:[%s1079_s25 + $0x8] sm:$0xff]  ;;  %v300_v18 = vld [vmem:[%s1079_s25 + $0x10] sm:$0xff]  ;;  %s289_s15 = sadd.s32 %s770_s12, %s1249_s18 }
  0x16   : > { %818 = vmatpush3.msra.mxu0 %v330_v3  ;;  %892 = vmatpush3.msra.mxu1 %v330_v3  ;;  %v308_v19 = vld [vmem:[%s1079_s25 + $0x50] sm:$0xff]  ;;  %v309_v20 = vld [vmem:[%s1079_s25 + $0x58] sm:$0xff]  ;;  %v310_v21 = vld [vmem:[%s1079_s25 + $0x60] sm:$0xff]  ;;  %s290_s13 = scalar_lea.vmem %s1234_s4, %s289_s15  ;;  %s297_s17 = scalar_lea.vmem %s1235_s5, %s289_s15 }
  0x17   : > { %819 = vmatprep.subr.mxu0 %v329_v4  ;;  %877 = vmatprep.subr.mxu1 %v329_v4  ;;  %v301_v22 = vld [vmem:[%s1079_s25 + $0x18] sm:$0xff]  ;;  %v302_v23 = vld [vmem:[%s1079_s25 + $0x20] sm:$0xff]  ;;  %v311_v24 = vld [vmem:[%s1079_s25 + $0x68] sm:$0xff] }
  0x18   : > { %820 = vmatpush3.msra.mxu0 %v329_v4  ;;  %893 = vmatpush3.msra.mxu1 %v329_v4  ;;  %v312_v25 = vld [vmem:[%s1079_s25 + $0x70] sm:$0xff]  ;;  %v303_v26 = vld [vmem:[%s1079_s25 + $0x28] sm:$0xff]  ;;  %v313_v28 = vld [vmem:[%s1079_s25 + $0x78] sm:$0xff] }
  0x19   : > { %821 = vmatprep.subr.mxu0 %v328_v5  ;;  %878 = vmatprep.subr.mxu1 %v328_v5  ;;  %v304_v27 = vld [vmem:[%s1079_s25 + $0x30] sm:$0xff]  ;;  %v314_v29 = vld [vmem:[%s1079_s25 + $0x80] sm:$0xff]  ;;  %v305_v30 = vld [vmem:[%s1079_s25 + $0x38] sm:$0xff] }
  0x1a   : > { %822 = vmatpush3.msra.mxu0 %v328_v5  ;;  %894 = vmatpush3.msra.mxu1 %v328_v5  ;;  %v306_v31 = vld [vmem:[%s1079_s25 + $0x40] sm:$0xff]  ;;  %v315_v32 = vld [vmem:[%s1079_s25 + $0x88] sm:$0xff]  ;;  %v316_v33 = vld [vmem:[%s1079_s25 + $0x90] sm:$0xff] }
  0x1b   : > { %823 = vmatprep.subr.mxu0 %v327_v6  ;;  %879 = vmatprep.subr.mxu1 %v327_v6  ;;  %v307_v34 = vld [vmem:[%s1079_s25 + $0x48] sm:$0xff]  ;;  %v317_v35 = vld [vmem:[%s1079_s25 + $0x98] sm:$0xff] }
  0x1c   : > { %824 = vmatpush3.msra.mxu0 %v327_v6  ;;  %895 = vmatpush3.msra.mxu1 %v327_v6 }
  0x1d   : > { %825 = vmatprep.subr.mxu0 %v326_v7  ;;  %843 = vmatprep.mubr.f32.mxu0 %v298_v8 }
  0x1e   : > { %826 = vmatpush3.msra.mxu0 %v326_v7  ;;  %880 = vmatprep.subr.mxu1 %v326_v7 }
  0x1f   : > { %827 = vmatprep.subr.mxu0 %v325_v9  ;;  %896 = vmatpush3.msra.mxu1 %v326_v7 }
  0x20   : > { %828 = vmatpush3.msra.mxu0 %v325_v9  ;;  %881 = vmatprep.subr.mxu1 %v325_v9 }
  0x21   : > { %829 = vmatprep.subr.mxu0 %v324_v10  ;;  %897 = vmatpush3.msra.mxu1 %v325_v9 }
  0x22   : > { %830 = vmatpush3.msra.mxu0 %v324_v10  ;;  %882 = vmatprep.subr.mxu1 %v324_v10 }
  0x23   : > { %831 = vmatprep.subr.mxu0 %v323_v11  ;;  %898 = vmatpush3.msra.mxu1 %v324_v10 }
  0x24   : > { %832 = vmatpush3.msra.mxu0 %v323_v11  ;;  %883 = vmatprep.subr.mxu1 %v323_v11 }
  0x25   : > { %833 = vmatprep.subr.mxu0 %v322_v12  ;;  %899 = vmatpush3.msra.mxu1 %v323_v11 }
  0x26   : > { %834 = vmatpush3.msra.mxu0 %v322_v12  ;;  %884 = vmatprep.subr.mxu1 %v322_v12 }
  0x27   : > { %835 = vmatprep.subr.mxu0 %v321_v13  ;;  %900 = vmatpush3.msra.mxu1 %v322_v12 }
  0x28   : > { %836 = vmatpush3.msra.mxu0 %v321_v13  ;;  %885 = vmatprep.subr.mxu1 %v321_v13 }
  0x29   : > { %837 = vmatprep.subr.mxu0 %v320_v14  ;;  %901 = vmatpush3.msra.mxu1 %v321_v13 }
  0x2a   : > { %838 = vmatpush3.msra.mxu0 %v320_v14  ;;  %886 = vmatprep.subr.mxu1 %v320_v14 }
  0x2b   : > { %839 = vmatprep.subr.mxu0 %v319_v15  ;;  %902 = vmatpush3.msra.mxu1 %v320_v14 }
  0x2c   : > { %840 = vmatpush3.msra.mxu0 %v319_v15  ;;  %887 = vmatprep.subr.mxu1 %v319_v15 }
  0x2d   : > { %841 = vmatprep.subr.mxu0 %v318_v16  ;;  %903 = vmatpush3.msra.mxu1 %v319_v15 }
  0x2e   : > { %842 = vmatpush3.msra.mxu0 %v318_v16  ;;  %888 = vmatprep.subr.mxu1 %v318_v16 }
  0x2f   : > { %844 = vmatmul.mubr.f32.vlgmr.msra.gmra.mxu0 %v299_v17  ;;  %904 = vmatpush3.msra.mxu1 %v318_v16 }
  0x30   : > { %846 = vmatprep.mubr.f32.mxu0 %v300_v18  ;;  %858 = vmatprep.mubr.f32.mxu1 %v308_v19 }
  0x31   : > { %859 = vmatmul.mubr.f32.vlgmr.msra.gmra.mxu1 %v309_v20 }
  0x32   : > { %861 = vmatprep.mubr.f32.mxu1 %v310_v21 }
  0x33   : > { %847 = vmatmul.mubr.f32.gmra.mxu0 %v301_v22 }
  0x34   : > { %849 = vmatprep.mubr.f32.mxu0 %v302_v23 }
  0x35   : > { %862 = vmatmul.mubr.f32.gmra.mxu1 %v311_v24 }
  0x36   : > { %864 = vmatprep.mubr.f32.mxu1 %v312_v25 }
  0x37   : > { %850 = vmatmul.mubr.f32.gmra.mxu0 %v303_v26 }
  0x38   : > { %852 = vmatprep.mubr.f32.mxu0 %v304_v27 }
  0x39   : > { %865 = vmatmul.mubr.f32.gmra.mxu1 %v313_v28 }
  0x3a   : > { %867 = vmatprep.mubr.f32.mxu1 %v314_v29 }
  0x3b   : > { %853 = vmatmul.mubr.f32.gmra.mxu0 %v305_v30 }
  0x3c   : > { %855 = vmatprep.mubr.f32.mxu0 %v306_v31 }
  0x3d   : > { %868 = vmatmul.mubr.f32.gmra.mxu1 %v315_v32 }
  0x3e   : > { %870 = vmatprep.mubr.f32.mxu1 %v316_v33 }
  0x3f   : > { %856 = vmatmul.mubr.f32.gmra.mxu0 %v307_v34 }
  0x41   : > { %871 = vmatmul.mubr.f32.gmra.mxu1 %v317_v35 }
  0xef   : > { %v845_v37 = vpop.f32.mrf.mxu0 }
  0xf0   : > { %v413_v38 = vadd.f32 %v845_v37, %v1134_v36 }
  0xf1   : > { %v407_v39 = vpop.f32.mrf.mxu0  ;;  %v860_v40 = vpop.f32.mrf.mxu1 }
  0xf2   : > { %567 = vst [vmem:[%s1141_s10 + $0x8] sm:$0xff] %v413_v38  ;;  %v408_v41 = vadd.f32 %v1134_v36, %v407_v39  ;;  %v1147_v42 = vadd.f32 %v860_v40, %v1134_v36 }
  0xf3   : > { %v848_v43 = vpop.f32.mrf.mxu0  ;;  %v457_v44 = vpop.f32.mrf.mxu1 }
  0xf4   : > { %566 = vst [vmem:[%s1141_s10] sm:$0xff] %v408_v41  ;;  %v423_v45 = vadd.f32 %v848_v43, %v1134_v36  ;;  %577 = vst [vmem:[%s1141_s10 + $0x58] sm:$0xff] %v1147_v42  ;;  %v1154_v46 = vadd.f32 %v1134_v36, %v457_v44  ;;  %v537_v38 = vmul.f32 %v1147_v42, %v1147_v42 }
  0xf5   : > { %v417_v47 = vpop.f32.mrf.mxu0  ;;  %v863_v48 = vpop.f32.mrf.mxu1 }
  0xf6   : > { %569 = vst [vmem:[%s1141_s10 + $0x18] sm:$0xff] %v423_v45  ;;  %v418_v49 = vadd.f32 %v1134_v36, %v417_v47  ;;  %576 = vst [vmem:[%s1141_s10 + $0x50] sm:$0xff] %v1154_v46  ;;  %v1161_v50 = vadd.f32 %v863_v48, %v1134_v36  ;;  %v529_v58 = vmul.f32 %v423_v45, %v423_v45 }
  0xf7   : > { %v851_v51 = vpop.f32.mrf.mxu0  ;;  %v467_v52 = vpop.f32.mrf.mxu1  ;;  %v536_v35 = vmul.f32 %v1154_v46, %v1154_v46 }
  0xf8   : > { %v528_v53 = vmul.f32 %v418_v49, %v418_v49  ;;  %568 = vst [vmem:[%s1141_s10 + $0x10] sm:$0xff] %v418_v49  ;;  %v433_v54 = vadd.f32 %v851_v51, %v1134_v36  ;;  %579 = vst [vmem:[%s1141_s10 + $0x68] sm:$0xff] %v1161_v50  ;;  %v468_v56 = vadd.f32 %v1134_v36, %v467_v52 }
  0xf9   : > { %v427_v55 = vpop.f32.mrf.mxu0  ;;  %v866_v57 = vpop.f32.mrf.mxu1  ;;  %v506_v59 = vadd.f32 %v423_v45, %v418_v49  ;;  %v539_v44 = vmul.f32 %v1161_v50, %v1161_v50 }
  0xfa   : > { %571 = vst [vmem:[%s1141_s10 + $0x28] sm:$0xff] %v433_v54  ;;  %v428_v60 = vadd.f32 %v1134_v36, %v427_v55  ;;  %v1171_v61 = vadd.f32 %v866_v57, %v1134_v36  ;;  %578 = vst [vmem:[%s1141_s10 + $0x60] sm:$0xff] %v468_v56  ;;  %v544_v0 = vadd.f32 %v529_v58, %v528_v53 }
  0xfb   : > { %v854_v62 = vpop.f32.mrf.mxu0  ;;  %v477_v63 = vpop.f32.mrf.mxu1  ;;  %v531_v7 = vmul.f32 %v433_v54, %v433_v54  ;;  %v538_v43 = vmul.f32 %v468_v56, %v468_v56 }
  0xfc   : > { %v507_v1 = vadd.f32 %v506_v59, %v428_v60  ;;  %v530_v2 = vmul.f32 %v428_v60, %v428_v60  ;;  %570 = vst [vmem:[%s1141_s10 + $0x20] sm:$0xff] %v428_v60  ;;  %v443_v3 = vadd.f32 %v854_v62, %v1134_v36  ;;  %581 = vst [vmem:[%s1141_s10 + $0x78] sm:$0xff] %v1171_v61 }
  0xfd   : > { %v437_v4 = vpop.f32.mrf.mxu0  ;;  %v478_v5 = vadd.f32 %v1134_v36, %v477_v63  ;;  %v869_v6 = vpop.f32.mrf.mxu1  ;;  %v541_v51 = vmul.f32 %v1171_v61, %v1171_v61 }
  0xfe   : > { %v545_v8 = vadd.f32 %v544_v0, %v530_v2  ;;  %573 = vst [vmem:[%s1141_s10 + $0x38] sm:$0xff] %v443_v3  ;;  %v438_v9 = vadd.f32 %v1134_v36, %v437_v4  ;;  %v508_v10 = vadd.f32 %v507_v1, %v433_v54  ;;  %v493_v12 = vadd.f32 %v869_v6, %v1134_v36 }
  0xff   : > { %v857_v11 = vpop.f32.mrf.mxu0  ;;  %580 = vst [vmem:[%s1141_s10 + $0x70] sm:$0xff] %v478_v5  ;;  %v487_v13 = vpop.f32.mrf.mxu1  ;;  %v533_v21 = vmul.f32 %v443_v3, %v443_v3  ;;  %v540_v49 = vmul.f32 %v478_v5, %v478_v5 }
 0x100   : > { %v509_v14 = vadd.f32 %v508_v10, %v438_v9  ;;  %v532_v15 = vmul.f32 %v438_v9, %v438_v9  ;;  %v546_v16 = vadd.f32 %v545_v8, %v531_v7  ;;  %572 = vst [vmem:[%s1141_s10 + $0x30] sm:$0xff] %v438_v9  ;;  %v453_v17 = vadd.f32 %v857_v11, %v1134_v36 }
 0x101   : > { %v447_v18 = vpop.f32.mrf.mxu0  ;;  %583 = vst [vmem:[%s1141_s10 + $0x88] sm:$0xff] %v493_v12  ;;  %v488_v19 = vadd.f32 %v1134_v36, %v487_v13  ;;  %v872_v20 = vpop.f32.mrf.mxu1 }
 0x102   : > { %v547_v22 = vadd.f32 %v546_v16, %v532_v15  ;;  %575 = vst [vmem:[%s1141_s10 + $0x48] sm:$0xff] %v453_v17  ;;  %v448_v23 = vadd.f32 %v1134_v36, %v447_v18  ;;  %v510_v24 = vadd.f32 %v509_v14, %v443_v3  ;;  %v503_v25 = vadd.f32 %v872_v20, %v1134_v36 }
 0x103   : > { %582 = vst [vmem:[%s1141_s10 + $0x80] sm:$0xff] %v488_v19  ;;  %v497_v26 = vpop.f32.mrf.mxu1  ;;  %v535_v31 = vmul.f32 %v453_v17, %v453_v17  ;;  %v542_v54 = vmul.f32 %v488_v19, %v488_v19 }
 0x104   : > { %v511_v27 = vadd.f32 %v510_v24, %v448_v23  ;;  %v534_v28 = vmul.f32 %v448_v23, %v448_v23  ;;  %v548_v29 = vadd.f32 %v547_v22, %v533_v21  ;;  %574 = vst [vmem:[%s1141_s10 + $0x40] sm:$0xff] %v448_v23  ;;  %v498_v30 = vadd.f32 %v1134_v36, %v497_v26 }
 0x105   : > { %585 = vst [vmem:[%s1141_s10 + $0x98] sm:$0xff] %v503_v25 }
 0x106   : > { %v549_v32 = vadd.f32 %v548_v29, %v534_v28  ;;  %v512_v33 = vadd.f32 %v511_v27, %v453_v17  ;;  %584 = vst [vmem:[%s1141_s10 + $0x90] sm:$0xff] %v498_v30 }
 0x108   : > { %v513_v34 = vadd.f32 %v512_v33, %v1154_v46  ;;  %v550_v37 = vadd.f32 %v549_v32, %v535_v31 }
 0x10a   : > { %v551_v39 = vadd.f32 %v550_v37, %v536_v35  ;;  %v514_v40 = vadd.f32 %v513_v34, %v1147_v42 }
 0x10c   : > { %v515_v41 = vadd.f32 %v514_v40, %v468_v56  ;;  %v552_v36 = vadd.f32 %v551_v39, %v537_v38  ;;  %v543_v56 = vmul.f32 %v493_v12, %v493_v12 }
 0x10e   : > { %v553_v45 = vadd.f32 %v552_v36, %v538_v43  ;;  %v516_v47 = vadd.f32 %v515_v41, %v1161_v50 }
 0x110   : > { %v517_v48 = vadd.f32 %v516_v47, %v478_v5  ;;  %v554_v46 = vadd.f32 %v553_v45, %v539_v44 }
 0x112   : > { %v555_v52 = vadd.f32 %v554_v46, %v540_v49  ;;  %v518_v42 = vadd.f32 %v517_v48, %v1171_v61 }
 0x114   : > { %v519_v53 = vadd.f32 %v518_v42, %v488_v19  ;;  %v556_v55 = vadd.f32 %v555_v52, %v541_v51 }
 0x116   : > { %v520_v57 = vadd.f32 %v519_v53, %v493_v12  ;;  %v557_v58 = vadd.f32 %v556_v55, %v542_v54 }
 0x118   : > { %v521_v59 = vrot.slane %v520_v57, 4  ;;  %v558_v60 = vadd.f32 %v557_v58, %v543_v56 }
 0x11a   : > { %v522_v50 = vadd.f32 %v521_v59, %v520_v57  ;;  %v559_v62 = vrot.slane %v558_v60, 4 }
 0x11c   : > { %v523_v63 = vrot.slane %v522_v50, 2  ;;  %v560_v0 = vadd.f32 %v559_v62, %v558_v60 }
 0x11e   : > { %v524_v1 = vadd.f32 %v523_v63, %v522_v50  ;;  %v561_v2 = vrot.slane %v560_v0, 2 }
 0x120   : > { %v525_v3 = vrot.slane %v524_v1, 1  ;;  %v562_v4 = vadd.f32 %v561_v2, %v560_v0 }
 0x122   : > { %v526_v61 = vadd.f32 %v525_v3, %v524_v1  ;;  %v563_v5 = vrot.slane %v562_v4, 1 }
 0x124   : > { %527 = vst [vmem:[%s290_s13] sm:$0x1] %v526_v61  ;;  %v564_v6 = vadd.f32 %v563_v5, %v562_v4 }
 0x126   : > { %565 = vst [vmem:[%s297_s17] sm:$0x1] %v564_v6 }
 0x127 PF: > { %s16_s22 = sadd.s32 1, %s985_s22   ;;  %s1236_s18 = smov %s977_s20 }
 0x128   : > { %p13_p7 = scmp.ge.s32.totalorder %s16_s22, 6   ;;  %s1237_s19 = smov %s981_s21 }
 0x129   : > { %s1238_s20 = smov %s1241_s23  ;;  %s1239_s21 = smov %s1245_s24 }
 0x12a   :  { %15 = sbr.rel (!%p13_p7) target bundleno = 3 (0x3), region = 86 }

// kernel: double_conv.5
= control target key start
LH: loop header
LB: loop body
LE: loop exit
PB: predicated region body
PF: predicated region fallthrough
CT: control target
= control target key end

     0   :  { %s525_s12 = smov 0   ;;  %s527_s13 = smov 0   ;;  %s654_s0 = inlined_call_operand.vmem [shape: f32[2,16,16,128], index: 0, kind: input, shape index: {}]   ;;  %s655_s1 = inlined_call_operand.vmem [shape: f32[1,128], index: 1, kind: input, shape index: {}]   ;;  %s656_s2 = inlined_call_operand.vmem [shape: f32[1,128], index: 2, kind: input, shape index: {}]   ;;  %s657_s3 = inlined_call_operand.vmem [shape: f32[2,16,16,128], index: 3, kind: output, shape index: {}]  }
   0x1   :  { %s529_s14 = smov 0   ;;  %s531_s15 = smov 0  }
   0x2   :  { %s533_s16 = smov 0  }
   0x3 LB: > { %s22_s17 = sadd.s32 1, %s495_s14  ;;  %s25_s18 = sadd.s32 1, %s499_s15  ;;  %s503_s16 = sphi %s533_s16, %s13_s16   ;;  %s499_s15 = sphi %s531_s15, %s661_s15   ;;  %s495_s14 = sphi %s529_s14, %s660_s14   ;;  %s491_s13 = sphi %s527_s13, %s659_s13   ;;  %s487_s12 = sphi %s525_s12, %s658_s12  }
   0x4   : > { %p23_p0 = scmp.ge.s32.totalorder %s22_s17, 2  ;;  %p412_p1 = scmp.ge.s32.totalorder %s503_s16, 1 }
   0x5   : > { %p159_p2 = scmp.lt.s32.totalorder %s503_s16, 5 }
   0x6   : > { %s663_s17 = smov (%p23_p0, %s22_s17), 0  ;;  %s665_s18 = smov (!%p23_p0, %s25_s18), %s499_s15 }
   0x7   : > { %p160_p3 = pnand %p412_p1, %p159_p2  ;;  %p27_p4 = scmp.ge.s32.totalorder %s665_s18, 2 }
   0x8   : > { %s413_s19 = sshll.u32 (!%p160_p3), %s487_s12, 3  ;;  %p194_p5 = scmp.lt.s32.totalorder (!%p160_p3), %s491_s13, 1 }
   0x9   : > { %s667_s18 = smov (%p27_p4, %s665_s18), 0  ;;  %163 = sbr.rel (%p160_p3) target bundleno = 37 (0x25), region = 32 }
   0xa   : > { %p196_p6 = scmp.lt.s32.totalorder (!%p160_p3), %s413_s19, 15 }
   0xe   : > { %s669_s13 = smov (!%p194_p5, %s491_s13), 1  ;;  %s671_s19 = smov (!%p196_p6, %s413_s19), 15  ;;  %v558_v0 = vld [vmem:[%s655_s1] ss:$0 sm:$0xff] }
   0xf   : > { %s415_s20 = sshll.u32 %s669_s13, 5  ;;  %s414_s21 = sshll.u32 %s671_s19, 1  ;;  %v568_v1 = vld [vmem:[%s656_s2] ss:$0 sm:$0xff] }
  0x10   : > { %s200_s22 = sadd.s32 %s415_s20, %s414_s21 }
  0x11   : > { %s416_s23 = sshll.u32 %s200_s22, 3 }
  0x12   : > { %s563_s28 = scalar_lea.vmem %s654_s0, %s416_s23  ;;  %s591_s6 = scalar_lea.vmem %s657_s3, %s416_s23 }
  0x13   : > { %v215_v2 = vld [vmem:[%s563_s28] sm:$0xff]  ;;  %v216_v3 = vld [vmem:[%s563_s28 + $0x8] sm:$0xff]  ;;  %v217_v4 = vld [vmem:[%s563_s28 + $0x10] sm:$0xff] }
  0x14   : > { %v238_v5 = vmul.f32 %v558_v0, %v215_v2  ;;  %v239_v6 = vmul.f32 %v558_v0, %v216_v3  ;;  %v240_v7 = vmul.f32 %v558_v0, %v217_v4  ;;  %v218_v8 = vld [vmem:[%s563_s28 + $0x18] sm:$0xff]  ;;  %v219_v9 = vld [vmem:[%s563_s28 + $0x20] sm:$0xff]  ;;  %v220_v10 = vld [vmem:[%s563_s28 + $0x28] sm:$0xff] }
  0x15   : > { %v241_v11 = vmul.f32 %v558_v0, %v218_v8  ;;  %v242_v12 = vmul.f32 %v558_v0, %v219_v9  ;;  %v243_v13 = vmul.f32 %v558_v0, %v220_v10  ;;  %v221_v14 = vld [vmem:[%s563_s28 + $0x30] sm:$0xff]  ;;  %v222_v15 = vld [vmem:[%s563_s28 + $0x38] sm:$0xff]  ;;  %v223_v24 = vld [vmem:[%s563_s28 + $0x40] sm:$0xff] }
  0x16   : > { %v261_v16 = vadd.f32 %v568_v1, %v238_v5  ;;  %v262_v17 = vadd.f32 %v568_v1, %v239_v6  ;;  %v263_v18 = vadd.f32 %v568_v1, %v240_v7  ;;  %v244_v19 = vmul.f32 %v558_v0, %v221_v14  ;;  %v224_v25 = vld [vmem:[%s563_s28 + $0x48] sm:$0xff]  ;;  %v225_v26 = vld [vmem:[%s563_s28 + $0x50] sm:$0xff]  ;;  %v226_v31 = vld [vmem:[%s563_s28 + $0x58] sm:$0xff] }
  0x17   : > { %v264_v20 = vadd.f32 %v568_v1, %v241_v11  ;;  %v265_v21 = vadd.f32 %v568_v1, %v242_v12  ;;  %v266_v22 = vadd.f32 %v568_v1, %v243_v13  ;;  %v245_v23 = vmul.f32 %v558_v0, %v222_v15  ;;  %v227_v32 = vld [vmem:[%s563_s28 + $0x60] sm:$0xff]  ;;  %v228_v33 = vld [vmem:[%s563_s28 + $0x68] sm:$0xff]  ;;  %v229_v38 = vld [vmem:[%s563_s28 + $0x70] sm:$0xff] }
  0x18   : > { %v277_v27 = vmax.f32 %v261_v16, 0.0  ;;  %v278_v28 = vmax.f32 %v262_v17, 0.0  ;;  %v279_v29 = vmax.f32 %v263_v18, 0.0  ;;  %v267_v30 = vadd.f32 %v568_v1, %v244_v19  ;;  %v230_v43 = vld [vmem:[%s563_s28 + $0x78] sm:$0xff] }
  0x19   : > { %v280_v34 = vmax.f32 %v264_v20, 0.0  ;;  %v281_v35 = vmax.f32 %v265_v21, 0.0  ;;  %v282_v36 = vmax.f32 %v266_v22, 0.0  ;;  %v268_v37 = vadd.f32 %v568_v1, %v245_v23 }
  0x1a   : > { %293 = vst [vmem:[%s591_s6] sm:$0xff] %v277_v27  ;;  %294 = vst [vmem:[%s591_s6 + $0x8] sm:$0xff] %v278_v28  ;;  %v283_v39 = vmax.f32 %v267_v30, 0.0  ;;  %v246_v40 = vmul.f32 %v558_v0, %v223_v24  ;;  %v247_v41 = vmul.f32 %v558_v0, %v224_v25  ;;  %v248_v42 = vmul.f32 %v558_v0, %v225_v26 }
  0x1b   : > { %295 = vst [vmem:[%s591_s6 + $0x10] sm:$0xff] %v279_v29  ;;  %296 = vst [vmem:[%s591_s6 + $0x18] sm:$0xff] %v280_v34  ;;  %v284_v44 = vmax.f32 %v268_v37, 0.0  ;;  %v249_v45 = vmul.f32 %v558_v0, %v226_v31  ;;  %v250_v46 = vmul.f32 %v558_v0, %v227_v32  ;;  %v251_v47 = vmul.f32 %v558_v0, %v228_v33 }
  0x1c   : > { %297 = vst [vmem:[%s591_s6 + $0x20] sm:$0xff] %v281_v35  ;;  %298 = vst [vmem:[%s591_s6 + $0x28] sm:$0xff] %v282_v36  ;;  %v269_v48 = vadd.f32 %v568_v1, %v246_v40  ;;  %v270_v49 = vadd.f32 %v568_v1, %v247_v41  ;;  %v271_v50 = vadd.f32 %v568_v1, %v248_v42 }
  0x1d   : > { %299 = vst [vmem:[%s591_s6 + $0x30] sm:$0xff] %v283_v39  ;;  %v252_v51 = vmul.f32 %v558_v0, %v229_v38  ;;  %300 = vst [vmem:[%s591_s6 + $0x38] sm:$0xff] %v284_v44  ;;  %v272_v52 = vadd.f32 %v568_v1, %v249_v45  ;;  %v273_v53 = vadd.f32 %v568_v1, %v250_v46 }
  0x1e   : > { %v274_v54 = vadd.f32 %v568_v1, %v251_v47  ;;  %v253_v55 = vmul.f32 %v558_v0, %v230_v43  ;;  %v285_v56 = vmax.f32 %v269_v48, 0.0  ;;  %v286_v57 = vmax.f32 %v270_v49, 0.0 }
  0x1f   : > { %v287_v58 = vmax.f32 %v271_v50, 0.0  ;;  %v275_v59 = vadd.f32 %v568_v1, %v252_v51  ;;  %v288_v60 = vmax.f32 %v272_v52, 0.0  ;;  %v289_v61 = vmax.f32 %v273_v53, 0.0 }
  0x20   : > { %v290_v62 = vmax.f32 %v274_v54, 0.0  ;;  %v276_v63 = vadd.f32 %v568_v1, %v253_v55  ;;  %301 = vst [vmem:[%s591_s6 + $0x40] sm:$0xff] %v285_v56  ;;  %302 = vst [vmem:[%s591_s6 + $0x48] sm:$0xff] %v286_v57 }
  0x21   : > { %303 = vst [vmem:[%s591_s6 + $0x50] sm:$0xff] %v287_v58  ;;  %v291_v2 = vmax.f32 %v275_v59, 0.0  ;;  %304 = vst [vmem:[%s591_s6 + $0x58] sm:$0xff] %v288_v60 }
  0x22   : > { %305 = vst [vmem:[%s591_s6 + $0x60] sm:$0xff] %v289_v61  ;;  %306 = vst [vmem:[%s591_s6 + $0x68] sm:$0xff] %v290_v62  ;;  %v292_v0 = vmax.f32 %v276_v63, 0.0 }
  0x23   : > { %307 = vst [vmem:[%s591_s6 + $0x70] sm:$0xff] %v291_v2 }
  0x24   : > { %308 = vst [vmem:[%s591_s6 + $0x78] sm:$0xff] %v292_v0 }
  0x25 PF: > { %s13_s16 = sadd.s32 1, %s503_s16   ;;  %s658_s12 = smov %s495_s14 }
  0x26   : > { %p10_p7 = scmp.ge.s32.totalorder %s13_s16, 6   ;;  %s659_s13 = smov %s499_s15 }
  0x27   : > { %s660_s14 = smov %s663_s17  ;;  %s661_s15 = smov %s667_s18 }
  0x28   :  { %12 = sbr.rel (!%p10_p7) target bundleno = 3 (0x3), region = 62 }

// kernel: double_conv.4
= control target key start
LH: loop header
LB: loop body
LE: loop exit
PB: predicated region body
PF: predicated region fallthrough
CT: control target
= control target key end

     0   :  { %s3621_s24 = smov 0   ;;  %s3623_s25 = smov 0   ;;  %s4710_s0 = inlined_call_operand.vmem [shape: f32[2,2,10,16,128], index: 0, kind: input, shape index: {}]   ;;  %s4711_s1 = inlined_call_operand.vmem [shape: f32[1,128], index: 1, kind: input, shape index: {}]   ;;  %s4712_s2 = inlined_call_operand.vmem [shape: f32[1,128], index: 2, kind: input, shape index: {}]   ;;  %s4713_s3 = inlined_call_operand.vmem [shape: f32[9,128,128], index: 3, kind: input, shape index: {}]   ;;  %s4714_s4 = inlined_call_operand.vmem [shape: f32[1,128], index: 4, kind: input, shape index: {}]   ;;  %s4715_s5 = inlined_call_operand.vmem [shape: f32[2,16,16,128], index: 5, kind: output, shape index: {0}]   ;;  %s4716_s6 = inlined_call_operand.vmem [shape: f32[2,2,1,128], index: 6, kind: output, shape index: {1}]   ;;  %s4717_s7 = inlined_call_operand.vmem [shape: f32[2,2,1,128], index: 7, kind: output, shape index: {2}]  }
   0x1   :  { %s3625_s26 = smov 0   ;;  %s3627_s27 = smov 0  }
   0x2   :  { %s3629_s28 = smov 0  }
   0x3 LB: > { %s27_s29 = sadd.s32 1, %s3570_s26  ;;  %s30_s30 = sadd.s32 1, %s3574_s27  ;;  %s3578_s28 = sphi %s3629_s28, %s18_s28   ;;  %s3574_s27 = sphi %s3627_s27, %s4767_s27   ;;  %s3570_s26 = sphi %s3625_s26, %s4766_s26   ;;  %s3566_s25 = sphi %s3623_s25, %s4765_s25   ;;  %s3562_s24 = sphi %s3621_s24, %s4764_s24  }
   0x4   : > { %p28_p0 = scmp.ge.s32.totalorder %s27_s29, 2  ;;  %p2524_p1 = scmp.ge.s32.totalorder %s3578_s28, 1 }
   0x5   : > { %p266_p2 = scmp.lt.s32.totalorder %s3578_s28, 5 }
   0x6   : > { %s4769_s29 = smov (%p28_p0, %s27_s29), 0  ;;  %s4771_s30 = smov (!%p28_p0, %s30_s30), %s3574_s27 }
   0x7   : > { %4718 = sst [smem:[#allocation3_spill]] %s4769_s29  ;;  %p267_p3 = pnand %p2524_p1, %p266_p2 }
   0x8   : > { %p32_p4 = scmp.ge.s32.totalorder %s4771_s30, 2 }
   0x9   : > { %270 = sbr.rel (%p267_p3) target bundleno = 513 (0x201), region = 40 }
   0xa   : > { %s4773_s30 = smov (%p32_p4, %s4771_s30), 0 }
   0xb   : > { %4719 = sst [smem:[#allocation4_spill]] %s4773_s30 }
   0xe   : > { %p321_p5 = scmp.lt.s32.totalorder %s3566_s25, 1  ;;  %p323_p6 = scmp.lt.s32.totalorder %s3562_s24, 1 }
   0xf   : > { %s2526_s8 = sshll.u32 %s3562_s24, 3  ;;  %p2532_p8 = scmp.ne.s32.totalorder %s3562_s24, 0 }
  0x10   : > { %s4775_s25 = smov (!%p321_p5, %s3566_s25), 1  ;;  %p333_p7 = scmp.lt.s32.totalorder %s2526_s8, 15 }
  0x11   : > { %s324_s9 = scalar_select %p323_p6, %s3562_s24, 1 }
  0x12   : > { %s3491_s10 = smul.u32 40, %s4775_s25  ;;  %s2528_s12 = sshll.u32 %s4775_s25, 5 }
  0x13   : > { %s3490_s11 = smul.u32 20, %s324_s9  ;;  %s4777_s8 = smov (!%p333_p7, %s2526_s8), 15 }
  0x14   : > { %s2530_s14 = sshll.u32 %s4775_s25, 1  ;;  %s2527_s16 = sshll.u32 %s4777_s8, 1 }
  0x15   : > { %s327_s13 = sadd.s32 %s3491_s10, %s3490_s11  ;;  %s337_s20 = sadd.s32 %s2528_s12, %s2527_s16 }
  0x16   : > { %s2525_s15 = sshll.u32 %s327_s13, 3  ;;  %s2529_s21 = sshll.u32 %s337_s20, 3 }
  0x17   : > { %s3661_s19 = scalar_lea.vmem %s4710_s0, %s2525_s15  ;;  %s3663_s22 = sadd.s32 %s2530_s14, %s324_s9 }
  0x18   : > { %s3668_s29 = scalar_lea.vmem %s4715_s5, %s2529_s21  ;;  %s347_s8 = scalar_lea.vmem %s4716_s6, %s3663_s22 }
  0x19   : > { %s354_s15 = scalar_lea.vmem %s4717_s7, %s3663_s22  ;;  %358 = sbr.rel (%p2532_p8) target bundleno = 41 (0x29), region = 44 }
  0x1e   : > { %v3580_v0 = vmov 0.0  }
  0x1f   : > { %359 = vst [vmem:[#allocation2] sm:$0x1] %v3580_v0  ;;  %360 = vst [vmem:[#allocation2 + $0x18] sm:$0x1] %v3580_v0 }
  0x20   : > { %361 = vst [vmem:[#allocation2 + $0x30] sm:$0x1] %v3580_v0  ;;  %362 = vst [vmem:[#allocation2 + $0x48] sm:$0x1] %v3580_v0 }
  0x21   : > { %363 = vst [vmem:[#allocation2 + $0x60] sm:$0x1] %v3580_v0  ;;  %364 = vst [vmem:[#allocation2 + $0x78] sm:$0x1] %v3580_v0 }
  0x22   : > { %365 = vst [vmem:[#allocation2 + $0x90] sm:$0x1] %v3580_v0  ;;  %366 = vst [vmem:[#allocation2 + $0xa8] sm:$0x1] %v3580_v0 }
  0x23   : > { %367 = vst [vmem:[#allocation2 + $0xc0] sm:$0x1] %v3580_v0  ;;  %368 = vst [vmem:[#allocation2 + $0xd8] sm:$0x1] %v3580_v0 }
  0x24   : > { %369 = vst [vmem:[#allocation2 + $0x11] sm:$0x1] %v3580_v0  ;;  %370 = vst [vmem:[#allocation2 + $0x29] sm:$0x1] %v3580_v0 }
  0x25   : > { %371 = vst [vmem:[#allocation2 + $0x41] sm:$0x1] %v3580_v0  ;;  %372 = vst [vmem:[#allocation2 + $0x59] sm:$0x1] %v3580_v0 }
  0x26   : > { %373 = vst [vmem:[#allocation2 + $0x71] sm:$0x1] %v3580_v0  ;;  %374 = vst [vmem:[#allocation2 + $0x89] sm:$0x1] %v3580_v0 }
  0x27   : > { %375 = vst [vmem:[#allocation2 + $0xa1] sm:$0x1] %v3580_v0  ;;  %376 = vst [vmem:[#allocation2 + $0xb9] sm:$0x1] %v3580_v0 }
  0x28   : > { %377 = vst [vmem:[#allocation2 + $0xd1] sm:$0x1] %v3580_v0  ;;  %378 = vst [vmem:[#allocation2 + $0xe9] sm:$0x1] %v3580_v0 }
  0x29 PF: > { %v2550_v1 = vld [vmem:[%s4713_s3 + $0xf8] sm:$0xff]  ;;  %v2549_v3 = vld [vmem:[%s4713_s3 + $0xf0] sm:$0xff]  ;;  %v2548_v5 = vld [vmem:[%s4713_s3 + $0xe8] sm:$0xff]  ;;  %p473_p9 = scmp.gt.s32.totalorder %s3562_s24, 0 }
  0x2a   : > { %v556_v2 = vld [vmem:[%s4713_s3 + $0x78] sm:$0xff]  ;;  %2954 = vmatprep.subr.mxu0 %v2550_v1  ;;  %v555_v4 = vld [vmem:[%s4713_s3 + $0x70] sm:$0xff]  ;;  %v554_v6 = vld [vmem:[%s4713_s3 + $0x68] sm:$0xff]  ;;  %s478_s20 = scalar_select %p323_p6, 1, 0 }
  0x2b   : > { %3010 = vmatprep.subr.mxu1 %v556_v2  ;;  %2955 = vmatpush3.msra.mxu0 %v2550_v1  ;;  %v2547_v7 = vld [vmem:[%s4713_s3 + $0xe0] sm:$0xff]  ;;  %v2546_v9 = vld [vmem:[%s4713_s3 + $0xd8] sm:$0xff]  ;;  %v2545_v11 = vld [vmem:[%s4713_s3 + $0xd0] sm:$0xff]  ;;  %s3716_s10 = scalar_select %p473_p9, 1, 0 }
  0x2c   : > { %3011 = vmatpush3.msra.mxu1 %v556_v2  ;;  %2956 = vmatprep.subr.mxu0 %v2549_v3  ;;  %v553_v8 = vld [vmem:[%s4713_s3 + $0x60] sm:$0xff]  ;;  %v552_v10 = vld [vmem:[%s4713_s3 + $0x58] sm:$0xff]  ;;  %v551_v12 = vld [vmem:[%s4713_s3 + $0x50] sm:$0xff] }
  0x2d   : > { %3012 = vmatprep.subr.mxu1 %v555_v4  ;;  %2957 = vmatpush3.msra.mxu0 %v2549_v3  ;;  %v2544_v13 = vld [vmem:[%s4713_s3 + $0xc8] sm:$0xff]  ;;  %v379_v15 = vld [vmem:[%s3661_s19] sm:$0xff]  ;;  %v475_v22 = vstv %s3716_s10  ;;  %v381_v24 = vld [vmem:[%s3661_s19 + $0x10] sm:$0xff] }
  0x2e   : > { %3013 = vmatpush3.msra.mxu1 %v555_v4  ;;  %2958 = vmatprep.subr.mxu0 %v2548_v5  ;;  %v550_v14 = vld [vmem:[%s4713_s3 + $0x48] sm:$0xff]  ;;  %v3728_v16 = vld [vmem:[%s4711_s1] ss:$0 sm:$0xff]  ;;  %v382_v25 = vld [vmem:[%s3661_s19 + $0x18] sm:$0xff]  ;;  %vm3760_vm0 = vcmp.eq.s32.totalorder %v475_v22, 1 }
  0x2f   : > { %3014 = vmatprep.subr.mxu1 %v554_v6  ;;  %2959 = vmatpush3.msra.mxu0 %v2548_v5  ;;  %v3733_v17 = vld [vmem:[%s4712_s2] ss:$0 sm:$0xff]  ;;  %v380_v18 = vld [vmem:[%s3661_s19 + $0x8] sm:$0xff]  ;;  %v406_v21 = vmul.f32 %v3728_v16, %v379_v15  ;;  %v2542_v26 = vld [vmem:[%s4713_s3 + $0xb8] sm:$0xff]  ;;  %v408_v30 = vmul.f32 %v3728_v16, %v381_v24  ;;  %v409_v32 = vmul.f32 %v3728_v16, %v382_v25 }
  0x30   : > { %3015 = vmatpush3.msra.mxu1 %v554_v6  ;;  %2960 = vmatprep.subr.mxu0 %v2547_v7  ;;  %v2543_v19 = vld [vmem:[%s4713_s3 + $0xc0] sm:$0xff]  ;;  %v407_v23 = vmul.f32 %v3728_v16, %v380_v18  ;;  %v548_v27 = vld [vmem:[%s4713_s3 + $0x38] sm:$0xff]  ;;  %v384_v34 = vld [vmem:[%s3661_s19 + $0x28] sm:$0xff] }
  0x31   : > { %3016 = vmatprep.subr.mxu1 %v553_v8  ;;  %2961 = vmatpush3.msra.mxu0 %v2547_v7  ;;  %v549_v20 = vld [vmem:[%s4713_s3 + $0x40] sm:$0xff]  ;;  %v3754_v28 = vadd.f32 %v3733_v17, %v406_v21  ;;  %v2541_v35 = vld [vmem:[%s4713_s3 + $0xb0] sm:$0xff]  ;;  %v435_v39 = vadd.f32 %v3733_v17, %v408_v30  ;;  %v436_v41 = vadd.f32 %v3733_v17, %v409_v32  ;;  %v386_v44 = vld [vmem:[%s3661_s19 + $0x38] sm:$0xff] }
  0x32   : > { %3017 = vmatpush3.msra.mxu1 %v553_v8  ;;  %2962 = vmatprep.subr.mxu0 %v2546_v9  ;;  %v3757_v29 = vadd.f32 %v3733_v17, %v407_v23  ;;  %v383_v33 = vld [vmem:[%s3661_s19 + $0x20] sm:$0xff]  ;;  %v547_v36 = vld [vmem:[%s4713_s3 + $0x30] sm:$0xff]  ;;  %v411_v42 = vmul.f32 %v3728_v16, %v384_v34  ;;  %v2540_v45 = vld [vmem:[%s4713_s3 + $0xa8] sm:$0xff]  ;;  %v413_v54 = vmul.f32 %v3728_v16, %v386_v44 }
  0x33   : > { %3018 = vmatprep.subr.mxu1 %v552_v10  ;;  %2963 = vmatpush3.msra.mxu0 %v2546_v9  ;;  %v453_v37 = vmax.f32 %v3754_v28, 0.0  ;;  %v410_v40 = vmul.f32 %v3728_v16, %v383_v33  ;;  %v385_v43 = vld [vmem:[%s3661_s19 + $0x30] sm:$0xff]  ;;  %v546_v46 = vld [vmem:[%s4713_s3 + $0x28] sm:$0xff]  ;;  %v3795_v49 = vmax.f32 %v435_v39, 0.0  ;;  %v3798_v51 = vmax.f32 %v436_v41, 0.0  ;;  %v387_v55 = vld [vmem:[%s3661_s19 + $0x40] sm:$0xff] }
  0x34   : > { %3019 = vmatpush3.msra.mxu1 %v552_v10  ;;  %2964 = vmatprep.subr.mxu0 %v2545_v11  ;;  %v454_v38 = vmax.f32 %v3757_v29, 0.0  ;;  %v438_v52 = vadd.f32 %v3733_v17, %v411_v42  ;;  %v412_v53 = vmul.f32 %v3728_v16, %v385_v43  ;;  %v388_v56 = vld [vmem:[%s3661_s19 + $0x48] sm:$0xff]  ;;  %v2539_v57 = vld [vmem:[%s4713_s3 + $0xa0] sm:$0xff]  ;;  %v414_v60 = vmul.f32 %v3728_v16, %v387_v55  ;;  %v389_v1 = vld [vmem:[%s3661_s19 + $0x50] sm:$0xff] }
  0x35   : > { %3020 = vmatprep.subr.mxu1 %v551_v12  ;;  %2965 = vmatpush3.msra.mxu0 %v2545_v11  ;;  %v485_v47 = vsel %vm3760_vm0, %v453_v37, 0.0  ;;  %v437_v50 = vadd.f32 %v3733_v17, %v410_v40  ;;  %v545_v58 = vld [vmem:[%s4713_s3 + $0x20] sm:$0xff]  ;;  %507 = vst [vmem:[#allocation2 + $0x19] sm:$0xff] %v3795_v49  ;;  %v415_v61 = vmul.f32 %v3728_v16, %v388_v56  ;;  %508 = vst [vmem:[#allocation2 + $0x21] sm:$0xff] %v3798_v51  ;;  %v390_v2 = vld [vmem:[%s3661_s19 + $0x58] sm:$0xff] }
  0x36   : > { %3021 = vmatpush3.msra.mxu1 %v551_v12  ;;  %2966 = vmatprep.subr.mxu0 %v2544_v13  ;;  %v486_v48 = vsel %vm3760_vm0, %v454_v38, 0.0  ;;  %505 = vst [vmem:[#allocation2 + $0x1] sm:$0xff] %v485_v47  ;;  %v3817_v62 = vmax.f32 %v438_v52, 0.0  ;;  %v439_v63 = vadd.f32 %v3733_v17, %v412_v53  ;;  %v440_v0 = vadd.f32 %v3733_v17, %v413_v54  ;;  %v2538_v3 = vld [vmem:[%s4713_s3 + $0x98] sm:$0xff]  ;;  %v391_v11 = vld [vmem:[%s3661_s19 + $0x60] sm:$0xff]  ;;  %v392_v12 = vld [vmem:[%s3661_s19 + $0x68] sm:$0xff] }
  0x37   : > { %3022 = vmatprep.subr.mxu1 %v550_v14  ;;  %2967 = vmatpush3.msra.mxu0 %v2544_v13  ;;  %506 = vst [vmem:[#allocation2 + $0x9] sm:$0xff] %v486_v48  ;;  %v3812_v59 = vmax.f32 %v437_v50, 0.0  ;;  %v544_v4 = vld [vmem:[%s4713_s3 + $0x18] sm:$0xff]  ;;  %v441_v5 = vadd.f32 %v3733_v17, %v414_v60  ;;  %v442_v6 = vadd.f32 %v3733_v17, %v415_v61  ;;  %v2537_v13 = vld [vmem:[%s4713_s3 + $0x90] sm:$0xff]  ;;  %v2536_v25 = vld [vmem:[%s4713_s3 + $0x88] sm:$0xff] }
  0x38   : > { %3023 = vmatpush3.msra.mxu1 %v550_v14  ;;  %2968 = vmatprep.subr.mxu0 %v2543_v19  ;;  %v416_v7 = vmul.f32 %v3728_v16, %v389_v1  ;;  %510 = vst [vmem:[#allocation2 + $0x39] sm:$0xff] %v3817_v62  ;;  %v3834_v8 = vmax.f32 %v439_v63, 0.0  ;;  %v3836_v9 = vmax.f32 %v440_v0, 0.0  ;;  %v417_v10 = vmul.f32 %v3728_v16, %v390_v2  ;;  %v543_v14 = vld [vmem:[%s4713_s3 + $0x10] sm:$0xff]  ;;  %v394_v24 = vld [vmem:[%s3661_s19 + $0x78] sm:$0xff]  ;;  %v541_v39 = vld [vmem:[%s4713_s3] sm:$0xff] }
  0x39   : > { %3024 = vmatprep.subr.mxu1 %v549_v20  ;;  %2969 = vmatpush3.msra.mxu0 %v2543_v19  ;;  %509 = vst [vmem:[#allocation2 + $0x31] sm:$0xff] %v3812_v59  ;;  %v3847_v15 = vmax.f32 %v441_v5, 0.0  ;;  %v3849_v18 = vmax.f32 %v442_v6, 0.0  ;;  %v419_v22 = vmul.f32 %v3728_v16, %v392_v12  ;;  %v393_v23 = vld [vmem:[%s3661_s19 + $0x70] sm:$0xff]  ;;  %v421_v33 = vmul.f32 %v3728_v16, %v394_v24  ;;  %v2566_v48 = vld [vmem:[%s4713_s3 + $0x178] sm:$0xff]  ;;  %v2564_v31 = vld [vmem:[%s4713_s3 + $0x168] sm:$0xff] }
  0x3a   : > { %3025 = vmatpush3.msra.mxu1 %v549_v20  ;;  %2970 = vmatprep.subr.mxu0 %v2542_v26  ;;  %v443_v19 = vadd.f32 %v3733_v17, %v416_v7  ;;  %v418_v20 = vmul.f32 %v3728_v16, %v391_v11  ;;  %511 = vst [vmem:[#allocation2 + $0x49] sm:$0xff] %v3834_v8  ;;  %512 = vst [vmem:[#allocation2 + $0x51] sm:$0xff] %v3836_v9  ;;  %v2582_v50 = vld [vmem:[%s4713_s3 + $0x1f8] sm:$0xff]  ;;  %v2565_v28 = vld [vmem:[%s4713_s3 + $0x170] sm:$0xff] }
  0x3b   : > { %3026 = vmatprep.subr.mxu1 %v548_v27  ;;  %2971 = vmatpush3.msra.mxu0 %v2542_v26  ;;  %v444_v21 = vadd.f32 %v3733_v17, %v417_v10  ;;  %v542_v26 = vld [vmem:[%s4713_s3 + $0x8] sm:$0xff]  ;;  %513 = vst [vmem:[#allocation2 + $0x61] sm:$0xff] %v3847_v15  ;;  %514 = vst [vmem:[#allocation2 + $0x69] sm:$0xff] %v3849_v18  ;;  %v420_v32 = vmul.f32 %v3728_v16, %v393_v23  ;;  %v2563_v53 = vld [vmem:[%s4713_s3 + $0x160] sm:$0xff] }
  0x3c   : > { %3027 = vmatpush3.msra.mxu1 %v548_v27  ;;  %2972 = vmatprep.subr.mxu0 %v2541_v35  ;;  %v3867_v27 = vmax.f32 %v443_v19, 0.0  ;;  %v445_v30 = vadd.f32 %v3733_v17, %v418_v20  ;;  %v448_v42 = vadd.f32 %v3733_v17, %v421_v33  ;;  %v3917_v52 = vld [vmem:[#allocation2 + $0x18] sm:$0xff]  ;;  %v3919_v29 = vld [vmem:[#allocation2 + $0x20] sm:$0xff]  ;;  %v2561_v60 = vld [vmem:[%s4713_s3 + $0x150] sm:$0xff] }
  0x3d   : > { %3028 = vmatprep.subr.mxu1 %v547_v36  ;;  %2973 = vmatpush3.msra.mxu0 %v2541_v35  ;;  %v3872_v34 = vmax.f32 %v444_v21, 0.0  ;;  %v446_v35 = vadd.f32 %v3733_v17, %v419_v22  ;;  %v447_v41 = vadd.f32 %v3733_v17, %v420_v32  ;;  %v525_v44 = vld [vmem:[#allocation2] sm:$0xff]  ;;  %v2577_v61 = vld [vmem:[%s4713_s3 + $0x1d0] sm:$0xff]  ;;  %v396_v1 = vld [vmem:[%s3661_s19 + $0x88] sm:$0xff] }
  0x3e   : > { %3029 = vmatpush3.msra.mxu1 %v547_v36  ;;  %2974 = vmatprep.subr.mxu0 %v2540_v45  ;;  %v2535_v36 = vld [vmem:[%s4713_s3 + $0x80] sm:$0xff]  ;;  %515 = vst [vmem:[#allocation2 + $0x79] sm:$0xff] %v3867_v27  ;;  %v3882_v40 = vmax.f32 %v445_v30, 0.0  ;;  %v526_v47 = vld [vmem:[#allocation2 + $0x8] sm:$0xff]  ;;  %v2558_v21 = vld [vmem:[%s4713_s3 + $0x138] sm:$0xff] }
  0x3f   : > { %3030 = vmatprep.subr.mxu1 %v546_v46  ;;  %2975 = vmatpush3.msra.mxu0 %v2540_v45  ;;  %516 = vst [vmem:[#allocation2 + $0x81] sm:$0xff] %v3872_v34  ;;  %v3887_v43 = vmax.f32 %v446_v35, 0.0  ;;  %v3890_v45 = vmax.f32 %v447_v41, 0.0  ;;  %v2579_v54 = vld [vmem:[%s4713_s3 + $0x1e0] sm:$0xff]  ;;  %v2560_v5 = vld [vmem:[%s4713_s3 + $0x148] sm:$0xff]  ;;  %v2574_v22 = vld [vmem:[%s4713_s3 + $0x1b8] sm:$0xff] }
  0x40   : > { %3031 = vmatpush3.msra.mxu1 %v546_v46  ;;  %2976 = vmatprep.subr.mxu0 %v2539_v57  ;;  %517 = vst [vmem:[#allocation2 + $0x91] sm:$0xff] %v3882_v40  ;;  %v3892_v46 = vmax.f32 %v448_v42, 0.0  ;;  %v3937_v55 = vld [vmem:[#allocation2 + $0x30] sm:$0xff]  ;;  %v3939_v56 = vld [vmem:[#allocation2 + $0x38] sm:$0xff]  ;;  %v395_v0 = vld [vmem:[%s3661_s19 + $0x80] sm:$0xff] }
  0x41   : > { %3032 = vmatprep.subr.mxu1 %v545_v58  ;;  %2977 = vmatpush3.msra.mxu0 %v2539_v57  ;;  %518 = vst [vmem:[#allocation2 + $0x99] sm:$0xff] %v3887_v43  ;;  %519 = vst [vmem:[#allocation2 + $0xa9] sm:$0xff] %v3890_v45  ;;  %v2562_v57 = vld [vmem:[%s4713_s3 + $0x158] sm:$0xff]  ;;  %v3957_v63 = vld [vmem:[#allocation2 + $0x48] sm:$0xff]  ;;  %v422_v2 = vmul.f32 %v3728_v16, %v395_v0 }
  0x42   : > { %3033 = vmatpush3.msra.mxu1 %v545_v58  ;;  %2978 = vmatprep.subr.mxu0 %v2538_v3  ;;  %520 = vst [vmem:[#allocation2 + $0xb1] sm:$0xff] %v3892_v46  ;;  %v2578_v58 = vld [vmem:[%s4713_s3 + $0x1d8] sm:$0xff]  ;;  %v2576_v6 = vld [vmem:[%s4713_s3 + $0x1c8] sm:$0xff]  ;;  %v2559_v11 = vld [vmem:[%s4713_s3 + $0x140] sm:$0xff] }
  0x43   : > { %3034 = vmatprep.subr.mxu1 %v544_v4  ;;  %2979 = vmatpush3.msra.mxu0 %v2538_v3  ;;  %v423_v3 = vmul.f32 %v3728_v16, %v396_v1  ;;  %v449_v7 = vadd.f32 %v3733_v17, %v422_v2  ;;  %v2575_v12 = vld [vmem:[%s4713_s3 + $0x1c0] sm:$0xff]  ;;  %v3991_v20 = vld [vmem:[#allocation2 + $0x68] sm:$0xff]  ;;  %v2557_v23 = vld [vmem:[%s4713_s3 + $0x130] sm:$0xff]  ;;  %v479_v2 = vstv %s478_s20 }
  0x44   : > { %3035 = vmatpush3.msra.mxu1 %v544_v4  ;;  %2980 = vmatprep.subr.mxu0 %v2537_v13  ;;  %v3963_v4 = vld [vmem:[#allocation2 + $0x50] sm:$0xff]  ;;  %v3987_v19 = vld [vmem:[#allocation2 + $0x60] sm:$0xff]  ;;  %v2556_v30 = vld [vmem:[%s4713_s3 + $0x128] sm:$0xff]  ;;  %vm4088_vm1 = vcmp.eq.s32.totalorder %v479_v2, 1 }
  0x45   : > { %3036 = vmatprep.subr.mxu1 %v543_v14  ;;  %2981 = vmatpush3.msra.mxu0 %v2537_v13  ;;  %v450_v10 = vadd.f32 %v3733_v17, %v423_v3  ;;  %v3983_v13 = vmax.f32 %v449_v7, 0.0  ;;  %v2573_v24 = vld [vmem:[%s4713_s3 + $0x1b0] sm:$0xff]  ;;  %v2572_v32 = vld [vmem:[%s4713_s3 + $0x1a8] sm:$0xff]  ;;  %v2555_v33 = vld [vmem:[%s4713_s3 + $0x120] sm:$0xff] }
  0x46   : > { %3037 = vmatpush3.msra.mxu1 %v543_v14  ;;  %2982 = vmatprep.subr.mxu0 %v2536_v25  ;;  %v2571_v35 = vld [vmem:[%s4713_s3 + $0x1a0] sm:$0xff]  ;;  %v2554_v41 = vld [vmem:[%s4713_s3 + $0x118] sm:$0xff]  ;;  %v881_v0 = vld [vmem:[#allocation2 + $0xa] sm:$0xff] }
  0x47   : > { %3038 = vmatprep.subr.mxu1 %v542_v26  ;;  %2983 = vmatpush3.msra.mxu0 %v2536_v25  ;;  %v3985_v14 = vmax.f32 %v450_v10, 0.0  ;;  %521 = vst [vmem:[#allocation2 + $0xc1] sm:$0xff] %v3983_v13  ;;  %v4009_v25 = vld [vmem:[#allocation2 + $0x78] sm:$0xff]  ;;  %v2597_v10 = vld [vmem:[%s4713_s3 + $0x270] sm:$0xff] }
  0x48   : > { %3039 = vmatpush3.msra.mxu1 %v542_v26  ;;  %2984 = vmatprep.subr.mxu0 %v2535_v36  ;;  %v4011_v26 = vld [vmem:[#allocation2 + $0x80] sm:$0xff]  ;;  %v2570_v42 = vld [vmem:[%s4713_s3 + $0x198] sm:$0xff] }
  0x49   : > { %3040 = vmatprep.subr.mxu1 %v541_v39  ;;  %2985 = vmatpush3.msra.mxu0 %v2535_v36  ;;  %522 = vst [vmem:[#allocation2 + $0xc9] sm:$0xff] %v3985_v14  ;;  %v4029_v36 = vld [vmem:[#allocation2 + $0x90] sm:$0xff]  ;;  %v4189_v2 = vld [vmem:[#allocation2 + $0x7a] sm:$0xff] }
  0x4a   : > { %3536 = vmatprep.mubr.msk.f32.mxu0 %vm3760_vm0, %v453_v37  ;;  %3041 = vmatpush3.msra.mxu1 %v541_v39  ;;  %v2581_v37 = vld [vmem:[%s4713_s3 + $0x1f0] sm:$0xff]  ;;  %v4031_v39 = vld [vmem:[#allocation2 + $0x98] sm:$0xff] }
  0x4b   : > { %3042 = vmatprep.mubr.f32.mxu1 %v525_v44  ;;  %3537 = vmatmul.mubr.msk.f32.vlgmr.msra.gmra.mxu0 %vm3760_vm0, %v454_v38  ;;  %v2580_v38 = vld [vmem:[%s4713_s3 + $0x1e8] sm:$0xff]  ;;  %v2553_v44 = vld [vmem:[%s4713_s3 + $0x110] sm:$0xff] }
  0x4c   : > { %3043 = vmatmul.mubr.f32.vlgmr.msra.gmra.mxu1 %v526_v47  ;;  %3066 = vmatprep.subr.mxu0 %v2566_v48  ;;  %v2569_v47 = vld [vmem:[%s4713_s3 + $0x190] sm:$0xff] }
  0x4d   : > { %3122 = vmatprep.subr.mxu1 %v2582_v50  ;;  %3067 = vmatpush3.msra.mxu0 %v2566_v48  ;;  %v4049_v48 = vld [vmem:[#allocation2 + $0xa8] sm:$0xff] }
  0x4e   : > { %3123 = vmatpush3.msra.mxu1 %v2582_v50  ;;  %3068 = vmatprep.subr.mxu0 %v2565_v28  ;;  %v4051_v50 = vld [vmem:[#allocation2 + $0xb0] sm:$0xff] }
  0x4f   : > { %3124 = vmatprep.subr.mxu1 %v2581_v37  ;;  %2989 = vmatprep.mubr.f32.mxu0 %v3795_v49 }
  0x50   : > { %3045 = vmatprep.mubr.f32.mxu1 %v3917_v52  ;;  %3069 = vmatpush3.msra.mxu0 %v2565_v28  ;;  %v2552_v28 = vld [vmem:[%s4713_s3 + $0x108] sm:$0xff] }
  0x51   : > { %3125 = vmatpush3.msra.mxu1 %v2581_v37  ;;  %2990 = vmatmul.mubr.f32.gmra.mxu0 %v3798_v51  ;;  %v2568_v37 = vld [vmem:[%s4713_s3 + $0x188] sm:$0xff] }
  0x52   : > { %3046 = vmatmul.mubr.f32.gmra.mxu1 %v3919_v29  ;;  %3070 = vmatprep.subr.mxu0 %v2564_v31 }
  0x53   : > { %3126 = vmatprep.subr.mxu1 %v2580_v38  ;;  %3071 = vmatpush3.msra.mxu0 %v2564_v31  ;;  %v397_v31 = vld [vmem:[%s3661_s19 + $0x90] sm:$0xff] }
  0x54   : > { %3127 = vmatpush3.msra.mxu1 %v2580_v38  ;;  %3072 = vmatprep.subr.mxu0 %v2563_v53  ;;  %v424_v38 = vmul.f32 %v3728_v16, %v397_v31  ;;  %v2591_v31 = vld [vmem:[%s4713_s3 + $0x240] sm:$0xff] }
  0x55   : > { %3128 = vmatprep.subr.mxu1 %v2579_v54  ;;  %2992 = vmatprep.mubr.f32.mxu0 %v3812_v59 }
  0x56   : > { %3048 = vmatprep.mubr.f32.mxu1 %v3937_v55  ;;  %3073 = vmatpush3.msra.mxu0 %v2563_v53  ;;  %v2551_v53 = vld [vmem:[%s4713_s3 + $0x100] sm:$0xff] }
  0x57   : > { %3129 = vmatpush3.msra.mxu1 %v2579_v54  ;;  %2993 = vmatmul.mubr.f32.gmra.mxu0 %v3817_v62  ;;  %v2567_v54 = vld [vmem:[%s4713_s3 + $0x180] sm:$0xff] }
  0x58   : > { %3049 = vmatmul.mubr.f32.gmra.mxu1 %v3939_v56  ;;  %3074 = vmatprep.subr.mxu0 %v2562_v57 }
  0x59   : > { %3130 = vmatprep.subr.mxu1 %v2578_v58  ;;  %3075 = vmatpush3.msra.mxu0 %v2562_v57  ;;  %v398_v57 = vld [vmem:[%s3661_s19 + $0x98] sm:$0xff] }
  0x5a   : > { %3131 = vmatpush3.msra.mxu1 %v2578_v58  ;;  %3076 = vmatprep.subr.mxu0 %v2561_v60  ;;  %v880_v58 = vld [vmem:[#allocation2 + $0x2] sm:$0xff] }
  0x5b   : > { %3132 = vmatprep.subr.mxu1 %v2577_v61  ;;  %2995 = vmatprep.mubr.f32.mxu0 %v3834_v8 }
  0x5c   : > { %3051 = vmatprep.mubr.f32.mxu1 %v3957_v63  ;;  %3077 = vmatpush3.msra.mxu0 %v2561_v60  ;;  %v4073_v60 = vadd.f32 %v3733_v17, %v424_v38  ;;  %v2607_v38 = vld [vmem:[%s4713_s3 + $0x2c0] sm:$0xff] }
  0x5d   : > { %3133 = vmatpush3.msra.mxu1 %v2577_v61  ;;  %2996 = vmatmul.mubr.f32.gmra.mxu0 %v3836_v9  ;;  %v425_v61 = vmul.f32 %v3728_v16, %v398_v57  ;;  %v2614_v16 = vld [vmem:[%s4713_s3 + $0x2f8] sm:$0xff] }
  0x5e   : > { %3052 = vmatmul.mubr.f32.gmra.mxu1 %v3963_v4  ;;  %3078 = vmatprep.subr.mxu0 %v2560_v5  ;;  %v471_v1 = vmax.f32 %v4073_v60, 0.0  ;;  %v2590_v57 = vld [vmem:[%s4713_s3 + $0x238] sm:$0xff] }
  0x5f   : > { %3134 = vmatprep.subr.mxu1 %v2576_v6  ;;  %3079 = vmatpush3.msra.mxu0 %v2560_v5  ;;  %v4080_v3 = vadd.f32 %v3733_v17, %v425_v61  ;;  %v2598_v5 = vld [vmem:[%s4713_s3 + $0x278] sm:$0xff]  ;;  %v2589_v61 = vld [vmem:[%s4713_s3 + $0x230] sm:$0xff] }
  0x60   : > { %3135 = vmatpush3.msra.mxu1 %v2576_v6  ;;  %3080 = vmatprep.subr.mxu0 %v2559_v11  ;;  %v503_v17 = vsel %vm4088_vm1, %v471_v1, 0.0 }
  0x61   : > { %3136 = vmatprep.subr.mxu1 %v2575_v12  ;;  %2998 = vmatprep.mubr.f32.mxu0 %v3847_v15  ;;  %v472_v7 = vmax.f32 %v4080_v3, 0.0  ;;  %523 = vst [vmem:[#allocation2 + $0xd9] sm:$0xff] %v503_v17  ;;  %v2604_v17 = vld [vmem:[%s4713_s3 + $0x2a8] sm:$0xff] }
  0x62   : > { %3054 = vmatprep.mubr.f32.mxu1 %v3987_v19  ;;  %3081 = vmatpush3.msra.mxu0 %v2559_v11  ;;  %v2613_v11 = vld [vmem:[%s4713_s3 + $0x2f0] sm:$0xff] }
  0x63   : > { %3137 = vmatpush3.msra.mxu1 %v2575_v12  ;;  %2999 = vmatmul.mubr.f32.gmra.mxu0 %v3849_v18  ;;  %v504_v12 = vsel %vm4088_vm1, %v472_v7, 0.0 }
  0x64   : > { %3055 = vmatmul.mubr.f32.gmra.mxu1 %v3991_v20  ;;  %3082 = vmatprep.subr.mxu0 %v2558_v21  ;;  %524 = vst [vmem:[#allocation2 + $0xe1] sm:$0xff] %v504_v12  ;;  %v4209_v12 = vld [vmem:[#allocation2 + $0x92] sm:$0xff] }
  0x65   : > { %3138 = vmatprep.subr.mxu1 %v2574_v22  ;;  %3083 = vmatpush3.msra.mxu0 %v2558_v21  ;;  %v2596_v21 = vld [vmem:[%s4713_s3 + $0x268] sm:$0xff] }
  0x66   : > { %3139 = vmatpush3.msra.mxu1 %v2574_v22  ;;  %3084 = vmatprep.subr.mxu0 %v2557_v23  ;;  %v2612_v22 = vld [vmem:[%s4713_s3 + $0x2e8] sm:$0xff] }
  0x67   : > { %3140 = vmatprep.subr.mxu1 %v2573_v24  ;;  %3001 = vmatprep.mubr.f32.mxu0 %v3867_v27 }
  0x68   : > { %3057 = vmatprep.mubr.f32.mxu1 %v4009_v25  ;;  %3085 = vmatpush3.msra.mxu0 %v2557_v23  ;;  %v2595_v23 = vld [vmem:[%s4713_s3 + $0x260] sm:$0xff] }
  0x69   : > { %3141 = vmatpush3.msra.mxu1 %v2573_v24  ;;  %3002 = vmatmul.mubr.f32.gmra.mxu0 %v3872_v34  ;;  %v2611_v24 = vld [vmem:[%s4713_s3 + $0x2e0] sm:$0xff] }
  0x6a   : > { %3058 = vmatmul.mubr.f32.gmra.mxu1 %v4011_v26  ;;  %3086 = vmatprep.subr.mxu0 %v2556_v30 }
  0x6b   : > { %3142 = vmatprep.subr.mxu1 %v2572_v32  ;;  %3087 = vmatpush3.msra.mxu0 %v2556_v30  ;;  %v4129_v30 = vld [vmem:[#allocation2 + $0x32] sm:$0xff] }
  0x6c   : > { %3143 = vmatpush3.msra.mxu1 %v2572_v32  ;;  %3088 = vmatprep.subr.mxu0 %v2555_v33  ;;  %v4131_v32 = vld [vmem:[#allocation2 + $0x3a] sm:$0xff] }
  0x6d   : > { %3144 = vmatprep.subr.mxu1 %v2571_v35  ;;  %3004 = vmatprep.mubr.f32.mxu0 %v3882_v40 }
  0x6e   : > { %3060 = vmatprep.mubr.f32.mxu1 %v4029_v36  ;;  %3089 = vmatpush3.msra.mxu0 %v2555_v33  ;;  %v2594_v33 = vld [vmem:[%s4713_s3 + $0x258] sm:$0xff] }
  0x6f   : > { %3145 = vmatpush3.msra.mxu1 %v2571_v35  ;;  %3005 = vmatmul.mubr.f32.gmra.mxu0 %v3887_v43  ;;  %v2610_v35 = vld [vmem:[%s4713_s3 + $0x2d8] sm:$0xff] }
  0x70   : > { %3061 = vmatmul.mubr.f32.gmra.mxu1 %v4031_v39  ;;  %3090 = vmatprep.subr.mxu0 %v2554_v41 }
  0x71   : > { %3146 = vmatprep.subr.mxu1 %v2570_v42  ;;  %3091 = vmatpush3.msra.mxu0 %v2554_v41  ;;  %v2593_v41 = vld [vmem:[%s4713_s3 + $0x250] sm:$0xff] }
  0x72   : > { %3147 = vmatpush3.msra.mxu1 %v2570_v42  ;;  %3092 = vmatprep.subr.mxu0 %v2553_v44  ;;  %v2609_v42 = vld [vmem:[%s4713_s3 + $0x2d0] sm:$0xff] }
  0x73   : > { %3148 = vmatprep.subr.mxu1 %v2569_v47  ;;  %3007 = vmatprep.mubr.f32.mxu0 %v3890_v45 }
  0x74   : > { %3063 = vmatprep.mubr.f32.mxu1 %v4049_v48  ;;  %3093 = vmatpush3.msra.mxu0 %v2553_v44  ;;  %v4149_v44 = vld [vmem:[#allocation2 + $0x4a] sm:$0xff] }
  0x75   : > { %3149 = vmatpush3.msra.mxu1 %v2569_v47  ;;  %3008 = vmatmul.mubr.f32.gmra.mxu0 %v3892_v46  ;;  %v4151_v47 = vld [vmem:[#allocation2 + $0x52] sm:$0xff] }
  0x76   : > { %3064 = vmatmul.mubr.f32.gmra.mxu1 %v4051_v50  ;;  %3094 = vmatprep.subr.mxu0 %v2552_v28 }
  0x77   : > { %3150 = vmatprep.subr.mxu1 %v2568_v37  ;;  %3095 = vmatpush3.msra.mxu0 %v2552_v28  ;;  %v2592_v28 = vld [vmem:[%s4713_s3 + $0x248] sm:$0xff] }
  0x78   : > { %3151 = vmatpush3.msra.mxu1 %v2568_v37  ;;  %3096 = vmatprep.subr.mxu0 %v2551_v53  ;;  %v2608_v37 = vld [vmem:[%s4713_s3 + $0x2c8] sm:$0xff] }
  0x79   : > { %3152 = vmatprep.subr.mxu1 %v2567_v54  ;;  %3097 = vmatpush3.msra.mxu0 %v2551_v53  ;;  %v4169_v53 = vld [vmem:[#allocation2 + $0x62] sm:$0xff] }
  0x7a   : > { %3098 = vmatprep.mubr.f32.mxu0 %v880_v58  ;;  %3153 = vmatpush3.msra.mxu1 %v2567_v54  ;;  %v4171_v54 = vld [vmem:[#allocation2 + $0x6a] sm:$0xff]  ;;  %v2606_v58 = vld [vmem:[%s4713_s3 + $0x2b8] sm:$0xff] }
  0x7b   : > { %3154 = vmatprep.mubr.f32.mxu1 %v3917_v52  ;;  %3099 = vmatmul.mubr.f32.vlgmr.msra.gmra.mxu0 %v881_v0  ;;  %v4105_v52 = vld [vmem:[#allocation2 + $0x1a] sm:$0xff]  ;;  %v2605_v0 = vld [vmem:[%s4713_s3 + $0x2b0] sm:$0xff] }
  0x7c   : > { %3155 = vmatmul.mubr.f32.vlgmr.msra.gmra.mxu1 %v3919_v29  ;;  %3178 = vmatprep.subr.mxu0 %v2598_v5  ;;  %v4111_v29 = vld [vmem:[#allocation2 + $0x22] sm:$0xff] }
  0x7d   : > { %3234 = vmatprep.subr.mxu1 %v2614_v16  ;;  %3179 = vmatpush3.msra.mxu0 %v2598_v5  ;;  %v4191_v5 = vld [vmem:[#allocation2 + $0x82] sm:$0xff] }
  0x7e   : > { %3235 = vmatpush3.msra.mxu1 %v2614_v16  ;;  %3180 = vmatprep.subr.mxu0 %v2597_v10  ;;  %v2588_v16 = vld [vmem:[%s4713_s3 + $0x228] sm:$0xff] }
  0x7f   : > { %3236 = vmatprep.subr.mxu1 %v2613_v11  ;;  %3101 = vmatprep.mubr.f32.mxu0 %v4105_v52 }
  0x80   : > { %3157 = vmatprep.mubr.f32.mxu1 %v3937_v55  ;;  %3181 = vmatpush3.msra.mxu0 %v2597_v10  ;;  %v2587_v10 = vld [vmem:[%s4713_s3 + $0x220] sm:$0xff] }
  0x81   : > { %3237 = vmatpush3.msra.mxu1 %v2613_v11  ;;  %3102 = vmatmul.mubr.f32.gmra.mxu0 %v4111_v29  ;;  %v2603_v11 = vld [vmem:[%s4713_s3 + $0x2a0] sm:$0xff] }
  0x82   : > { %3158 = vmatmul.mubr.f32.gmra.mxu1 %v3939_v56  ;;  %3182 = vmatprep.subr.mxu0 %v2596_v21 }
  0x83   : > { %3238 = vmatprep.subr.mxu1 %v2612_v22  ;;  %3183 = vmatpush3.msra.mxu0 %v2596_v21  ;;  %v4211_v21 = vld [vmem:[#allocation2 + $0x9a] sm:$0xff] }
  0x84   : > { %3239 = vmatpush3.msra.mxu1 %v2612_v22  ;;  %3184 = vmatprep.subr.mxu0 %v2595_v23  ;;  %v2586_v22 = vld [vmem:[%s4713_s3 + $0x218] sm:$0xff] }
  0x85   : > { %3240 = vmatprep.subr.mxu1 %v2611_v24  ;;  %3104 = vmatprep.mubr.f32.mxu0 %v4129_v30 }
  0x86   : > { %3160 = vmatprep.mubr.f32.mxu1 %v3957_v63  ;;  %3185 = vmatpush3.msra.mxu0 %v2595_v23  ;;  %v2602_v23 = vld [vmem:[%s4713_s3 + $0x298] sm:$0xff] }
  0x87   : > { %3241 = vmatpush3.msra.mxu1 %v2611_v24  ;;  %3105 = vmatmul.mubr.f32.gmra.mxu0 %v4131_v32  ;;  %v2585_v24 = vld [vmem:[%s4713_s3 + $0x210] sm:$0xff] }
  0x88   : > { %3161 = vmatmul.mubr.f32.gmra.mxu1 %v3963_v4  ;;  %3186 = vmatprep.subr.mxu0 %v2594_v33 }
  0x89   : > { %3242 = vmatprep.subr.mxu1 %v2610_v35  ;;  %3187 = vmatpush3.msra.mxu0 %v2594_v33  ;;  %v2601_v33 = vld [vmem:[%s4713_s3 + $0x290] sm:$0xff] }
  0x8a   : > { %3243 = vmatpush3.msra.mxu1 %v2610_v35  ;;  %3188 = vmatprep.subr.mxu0 %v2593_v41  ;;  %v4229_v35 = vld [vmem:[#allocation2 + $0xaa] sm:$0xff] }
  0x8b   : > { %3244 = vmatprep.subr.mxu1 %v2609_v42  ;;  %3107 = vmatprep.mubr.f32.mxu0 %v4149_v44 }
  0x8c   : > { %3163 = vmatprep.mubr.f32.mxu1 %v3987_v19  ;;  %3189 = vmatpush3.msra.mxu0 %v2593_v41  ;;  %v4231_v41 = vld [vmem:[#allocation2 + $0xc0] sm:$0xff] }
  0x8d   : > { %3245 = vmatpush3.msra.mxu1 %v2609_v42  ;;  %3108 = vmatmul.mubr.f32.gmra.mxu0 %v4151_v47  ;;  %v4233_v42 = vld [vmem:[#allocation2 + $0xb2] sm:$0xff] }
  0x8e   : > { %3164 = vmatmul.mubr.f32.gmra.mxu1 %v3991_v20  ;;  %3190 = vmatprep.subr.mxu0 %v2592_v28 }
  0x8f   : > { %3246 = vmatprep.subr.mxu1 %v2608_v37  ;;  %3191 = vmatpush3.msra.mxu0 %v2592_v28  ;;  %v4235_v28 = vld [vmem:[#allocation2 + $0xc8] sm:$0xff] }
  0x90   : > { %3247 = vmatpush3.msra.mxu1 %v2608_v37  ;;  %3192 = vmatprep.subr.mxu0 %v2591_v31  ;;  %v2584_v37 = vld [vmem:[%s4713_s3 + $0x208] sm:$0xff] }
  0x91   : > { %3248 = vmatprep.subr.mxu1 %v2607_v38  ;;  %3110 = vmatprep.mubr.f32.mxu0 %v4169_v53 }
  0x92   : > { %3166 = vmatprep.mubr.f32.mxu1 %v4009_v25  ;;  %3193 = vmatpush3.msra.mxu0 %v2591_v31  ;;  %v2600_v31 = vld [vmem:[%s4713_s3 + $0x288] sm:$0xff] }
  0x93   : > { %3249 = vmatpush3.msra.mxu1 %v2607_v38  ;;  %3111 = vmatmul.mubr.f32.gmra.mxu0 %v4171_v54  ;;  %v2583_v38 = vld [vmem:[%s4713_s3 + $0x200] sm:$0xff] }
  0x94   : > { %3167 = vmatmul.mubr.f32.gmra.mxu1 %v4011_v26  ;;  %3194 = vmatprep.subr.mxu0 %v2590_v57 }
  0x95   : > { %3250 = vmatprep.subr.mxu1 %v2606_v58  ;;  %3195 = vmatpush3.msra.mxu0 %v2590_v57  ;;  %v2599_v57 = vld [vmem:[%s4713_s3 + $0x280] sm:$0xff] }
  0x96   : > { %3251 = vmatpush3.msra.mxu1 %v2606_v58  ;;  %3196 = vmatprep.subr.mxu0 %v2589_v61  ;;  %v2630_v58 = vld [vmem:[%s4713_s3 + $0x378] sm:$0xff] }
  0x97   : > { %3252 = vmatprep.subr.mxu1 %v2605_v0  ;;  %3113 = vmatprep.mubr.f32.mxu0 %v4189_v2 }
  0x98   : > { %3169 = vmatprep.mubr.f32.mxu1 %v4029_v36  ;;  %3197 = vmatpush3.msra.mxu0 %v2589_v61  ;;  %v2646_v61 = vld [vmem:[%s4713_s3 + $0x3f8] sm:$0xff] }
  0x99   : > { %3253 = vmatpush3.msra.mxu1 %v2605_v0  ;;  %3114 = vmatmul.mubr.f32.gmra.mxu0 %v4191_v5  ;;  %v2629_v0 = vld [vmem:[%s4713_s3 + $0x370] sm:$0xff] }
  0x9a   : > { %3170 = vmatmul.mubr.f32.gmra.mxu1 %v4031_v39  ;;  %3198 = vmatprep.subr.mxu0 %v2588_v16 }
  0x9b   : > { %3254 = vmatprep.subr.mxu1 %v2604_v17  ;;  %3199 = vmatpush3.msra.mxu0 %v2588_v16  ;;  %v2626_v16 = vld [vmem:[%s4713_s3 + $0x358] sm:$0xff] }
  0x9c   : > { %3255 = vmatpush3.msra.mxu1 %v2604_v17  ;;  %3200 = vmatprep.subr.mxu0 %v2587_v10  ;;  %v2642_v17 = vld [vmem:[%s4713_s3 + $0x3d8] sm:$0xff] }
  0x9d   : > { %3256 = vmatprep.subr.mxu1 %v2603_v11  ;;  %3116 = vmatprep.mubr.f32.mxu0 %v4209_v12 }
  0x9e   : > { %3172 = vmatprep.mubr.f32.mxu1 %v4049_v48  ;;  %3201 = vmatpush3.msra.mxu0 %v2587_v10  ;;  %v2625_v10 = vld [vmem:[%s4713_s3 + $0x350] sm:$0xff] }
  0x9f   : > { %3257 = vmatpush3.msra.mxu1 %v2603_v11  ;;  %3117 = vmatmul.mubr.f32.gmra.mxu0 %v4211_v21  ;;  %v2641_v11 = vld [vmem:[%s4713_s3 + $0x3d0] sm:$0xff] }
  0xa0   : > { %3173 = vmatmul.mubr.f32.gmra.mxu1 %v4051_v50  ;;  %3202 = vmatprep.subr.mxu0 %v2586_v22 }
  0xa1   : > { %3258 = vmatprep.subr.mxu1 %v2602_v23  ;;  %3203 = vmatpush3.msra.mxu0 %v2586_v22  ;;  %v2624_v22 = vld [vmem:[%s4713_s3 + $0x348] sm:$0xff] }
  0xa2   : > { %3259 = vmatpush3.msra.mxu1 %v2602_v23  ;;  %3204 = vmatprep.subr.mxu0 %v2585_v24  ;;  %v2640_v23 = vld [vmem:[%s4713_s3 + $0x3c8] sm:$0xff] }
  0xa3   : > { %3260 = vmatprep.subr.mxu1 %v2601_v33  ;;  %3119 = vmatprep.mubr.f32.mxu0 %v4229_v35 }
  0xa4   : > { %3175 = vmatprep.mubr.f32.mxu1 %v4231_v41  ;;  %3205 = vmatpush3.msra.mxu0 %v2585_v24  ;;  %v2623_v24 = vld [vmem:[%s4713_s3 + $0x340] sm:$0xff] }
  0xa5   : > { %3261 = vmatpush3.msra.mxu1 %v2601_v33  ;;  %3120 = vmatmul.mubr.f32.gmra.mxu0 %v4233_v42  ;;  %v2639_v33 = vld [vmem:[%s4713_s3 + $0x3c0] sm:$0xff] }
  0xa6   : > { %3176 = vmatmul.mubr.f32.gmra.mxu1 %v4235_v28  ;;  %3206 = vmatprep.subr.mxu0 %v2584_v37 }
  0xa7   : > { %3262 = vmatprep.subr.mxu1 %v2600_v31  ;;  %3207 = vmatpush3.msra.mxu0 %v2584_v37  ;;  %v2622_v37 = vld [vmem:[%s4713_s3 + $0x338] sm:$0xff] }
  0xa8   : > { %3263 = vmatpush3.msra.mxu1 %v2600_v31  ;;  %3208 = vmatprep.subr.mxu0 %v2583_v38  ;;  %v2638_v31 = vld [vmem:[%s4713_s3 + $0x3b8] sm:$0xff] }
  0xa9   : > { %3264 = vmatprep.subr.mxu1 %v2599_v57  ;;  %3209 = vmatpush3.msra.mxu0 %v2583_v38  ;;  %v2621_v38 = vld [vmem:[%s4713_s3 + $0x330] sm:$0xff] }
  0xaa   : > { %3210 = vmatprep.mubr.f32.mxu0 %v3795_v49  ;;  %3265 = vmatpush3.msra.mxu1 %v2599_v57  ;;  %v2645_v49 = vld [vmem:[%s4713_s3 + $0x3f0] sm:$0xff] }
  0xab   : > { %3266 = vmatprep.mubr.f32.mxu1 %v4105_v52  ;;  %3211 = vmatmul.mubr.f32.vlgmr.msra.gmra.mxu0 %v3798_v51  ;;  %v2628_v51 = vld [vmem:[%s4713_s3 + $0x368] sm:$0xff]  ;;  %v2637_v57 = vld [vmem:[%s4713_s3 + $0x3b0] sm:$0xff] }
  0xac   : > { %3267 = vmatmul.mubr.f32.vlgmr.msra.gmra.mxu1 %v4111_v29  ;;  %3290 = vmatprep.subr.mxu0 %v2630_v58  ;;  %v2644_v52 = vld [vmem:[%s4713_s3 + $0x3e8] sm:$0xff]  ;;  %v2643_v29 = vld [vmem:[%s4713_s3 + $0x3e0] sm:$0xff] }
  0xad   : > { %3346 = vmatprep.subr.mxu1 %v2646_v61  ;;  %3291 = vmatpush3.msra.mxu0 %v2630_v58  ;;  %v2620_v58 = vld [vmem:[%s4713_s3 + $0x328] sm:$0xff] }
  0xae   : > { %3347 = vmatpush3.msra.mxu1 %v2646_v61  ;;  %3292 = vmatprep.subr.mxu0 %v2629_v0  ;;  %v2636_v61 = vld [vmem:[%s4713_s3 + $0x3a8] sm:$0xff] }
  0xaf   : > { %3348 = vmatprep.subr.mxu1 %v2645_v49  ;;  %3213 = vmatprep.mubr.f32.mxu0 %v3812_v59  ;;  %v2627_v59 = vld [vmem:[%s4713_s3 + $0x360] sm:$0xff] }
  0xb0   : > { %3269 = vmatprep.mubr.f32.mxu1 %v4129_v30  ;;  %3293 = vmatpush3.msra.mxu0 %v2629_v0  ;;  %v2619_v0 = vld [vmem:[%s4713_s3 + $0x320] sm:$0xff] }
  0xb1   : > { %3349 = vmatpush3.msra.mxu1 %v2645_v49  ;;  %3214 = vmatmul.mubr.f32.gmra.mxu0 %v3817_v62  ;;  %v2635_v49 = vld [vmem:[%s4713_s3 + $0x3a0] sm:$0xff] }
  0xb2   : > { %3270 = vmatmul.mubr.f32.gmra.mxu1 %v4131_v32  ;;  %3294 = vmatprep.subr.mxu0 %v2628_v51 }
  0xb3   : > { %3350 = vmatprep.subr.mxu1 %v2644_v52  ;;  %3295 = vmatpush3.msra.mxu0 %v2628_v51  ;;  %v2618_v51 = vld [vmem:[%s4713_s3 + $0x318] sm:$0xff] }
  0xb4   : > { %3351 = vmatpush3.msra.mxu1 %v2644_v52  ;;  %3296 = vmatprep.subr.mxu0 %v2627_v59  ;;  %v2634_v52 = vld [vmem:[%s4713_s3 + $0x398] sm:$0xff] }
  0xb5   : > { %3352 = vmatprep.subr.mxu1 %v2643_v29  ;;  %3216 = vmatprep.mubr.f32.mxu0 %v3834_v8 }
  0xb6   : > { %3272 = vmatprep.mubr.f32.mxu1 %v4149_v44  ;;  %3297 = vmatpush3.msra.mxu0 %v2627_v59  ;;  %v2633_v59 = vld [vmem:[%s4713_s3 + $0x390] sm:$0xff] }
  0xb7   : > { %3353 = vmatpush3.msra.mxu1 %v2643_v29  ;;  %3217 = vmatmul.mubr.f32.gmra.mxu0 %v3836_v9  ;;  %v4365_v29 = vld [vmem:[#allocation2 + $0xc2] sm:$0xff] }
  0xb8   : > { %3273 = vmatmul.mubr.f32.gmra.mxu1 %v4151_v47  ;;  %3298 = vmatprep.subr.mxu0 %v2626_v16 }
  0xb9   : > { %3354 = vmatprep.subr.mxu1 %v2642_v17  ;;  %3299 = vmatpush3.msra.mxu0 %v2626_v16  ;;  %v4367_v16 = vld [vmem:[#allocation2 + $0xca] sm:$0xff] }
  0xba   : > { %3355 = vmatpush3.msra.mxu1 %v2642_v17  ;;  %3300 = vmatprep.subr.mxu0 %v2625_v10  ;;  %v2632_v17 = vld [vmem:[%s4713_s3 + $0x388] sm:$0xff] }
  0xbb   : > { %3356 = vmatprep.subr.mxu1 %v2641_v11  ;;  %3219 = vmatprep.mubr.f32.mxu0 %v3847_v15 }
  0xbc   : > { %3275 = vmatprep.mubr.f32.mxu1 %v4169_v53  ;;  %3301 = vmatpush3.msra.mxu0 %v2625_v10  ;;  %v2615_v10 = vld [vmem:[%s4713_s3 + $0x300] sm:$0xff] }
  0xbd   : > { %3357 = vmatpush3.msra.mxu1 %v2641_v11  ;;  %3220 = vmatmul.mubr.f32.gmra.mxu0 %v3849_v18  ;;  %v2631_v11 = vld [vmem:[%s4713_s3 + $0x380] sm:$0xff] }
  0xbe   : > { %3276 = vmatmul.mubr.f32.gmra.mxu1 %v4171_v54  ;;  %3302 = vmatprep.subr.mxu0 %v2624_v22 }
  0xbf   : > { %3358 = vmatprep.subr.mxu1 %v2640_v23  ;;  %3303 = vmatpush3.msra.mxu0 %v2624_v22  ;;  %v2662_v22 = vld [vmem:[%s4713_s3 + $0x478] sm:$0xff] }
  0xc0   : > { %3359 = vmatpush3.msra.mxu1 %v2640_v23  ;;  %3304 = vmatprep.subr.mxu0 %v2623_v24  ;;  %v3533_v23 = vld [vmem:[#allocation2 + $0x31] sm:$0xff] }
  0xc1   : > { %3360 = vmatprep.subr.mxu1 %v2639_v33  ;;  %3222 = vmatprep.mubr.f32.mxu0 %v3867_v27 }
  0xc2   : > { %3278 = vmatprep.mubr.f32.mxu1 %v4189_v2  ;;  %3305 = vmatpush3.msra.mxu0 %v2623_v24  ;;  %v2661_v24 = vld [vmem:[%s4713_s3 + $0x470] sm:$0xff] }
  0xc3   : > { %3361 = vmatpush3.msra.mxu1 %v2639_v33  ;;  %3223 = vmatmul.mubr.f32.gmra.mxu0 %v3872_v34 }
  0xc4   : > { %3279 = vmatmul.mubr.f32.gmra.mxu1 %v4191_v5  ;;  %3306 = vmatprep.subr.mxu0 %v2622_v37 }
  0xc5   : > { %3362 = vmatprep.subr.mxu1 %v2638_v31  ;;  %3307 = vmatpush3.msra.mxu0 %v2622_v37 }
  0xc6   : > { %3363 = vmatpush3.msra.mxu1 %v2638_v31  ;;  %3308 = vmatprep.subr.mxu0 %v2621_v38 }
  0xc7   : > { %3364 = vmatprep.subr.mxu1 %v2637_v57  ;;  %3225 = vmatprep.mubr.f32.mxu0 %v3882_v40 }
  0xc8   : > { %3281 = vmatprep.mubr.f32.mxu1 %v4209_v12  ;;  %3309 = vmatpush3.msra.mxu0 %v2621_v38 }
  0xc9   : > { %3365 = vmatpush3.msra.mxu1 %v2637_v57  ;;  %3226 = vmatmul.mubr.f32.gmra.mxu0 %v3887_v43 }
  0xca   : > { %3282 = vmatmul.mubr.f32.gmra.mxu1 %v4211_v21  ;;  %3310 = vmatprep.subr.mxu0 %v2620_v58 }
  0xcb   : > { %3366 = vmatprep.subr.mxu1 %v2636_v61  ;;  %3311 = vmatpush3.msra.mxu0 %v2620_v58 }
  0xcc   : > { %3367 = vmatpush3.msra.mxu1 %v2636_v61  ;;  %3312 = vmatprep.subr.mxu0 %v2619_v0 }
  0xcd   : > { %3368 = vmatprep.subr.mxu1 %v2635_v49  ;;  %3228 = vmatprep.mubr.f32.mxu0 %v3890_v45  ;;  %v2617_v45 = vld [vmem:[%s4713_s3 + $0x310] sm:$0xff] }
  0xce   : > { %3284 = vmatprep.mubr.f32.mxu1 %v4229_v35  ;;  %3313 = vmatpush3.msra.mxu0 %v2619_v0 }
  0xcf   : > { %3369 = vmatpush3.msra.mxu1 %v2635_v49  ;;  %3229 = vmatmul.mubr.f32.gmra.mxu0 %v3892_v46  ;;  %v2616_v46 = vld [vmem:[%s4713_s3 + $0x308] sm:$0xff] }
  0xd0   : > { %3285 = vmatmul.mubr.f32.gmra.mxu1 %v4233_v42  ;;  %3314 = vmatprep.subr.mxu0 %v2618_v51 }
  0xd1   : > { %3370 = vmatprep.subr.mxu1 %v2634_v52  ;;  %3315 = vmatpush3.msra.mxu0 %v2618_v51 }
  0xd2   : > { %3371 = vmatpush3.msra.mxu1 %v2634_v52  ;;  %3316 = vmatprep.subr.mxu0 %v2617_v45 }
  0xd3   : > { %3372 = vmatprep.subr.mxu1 %v2633_v59  ;;  %3231 = vmatprep.mubr.f32.mxu0 %v3983_v13 }
  0xd4   : > { %3287 = vmatprep.mubr.f32.mxu1 %v4365_v29  ;;  %3317 = vmatpush3.msra.mxu0 %v2617_v45 }
  0xd5   : > { %3373 = vmatpush3.msra.mxu1 %v2633_v59  ;;  %3232 = vmatmul.mubr.f32.gmra.mxu0 %v3985_v14 }
  0xd6   : > { %3288 = vmatmul.mubr.f32.gmra.mxu1 %v4367_v16  ;;  %3318 = vmatprep.subr.mxu0 %v2616_v46 }
  0xd7   : > { %3374 = vmatprep.subr.mxu1 %v2632_v17  ;;  %3319 = vmatpush3.msra.mxu0 %v2616_v46 }
  0xd8   : > { %3375 = vmatpush3.msra.mxu1 %v2632_v17  ;;  %3320 = vmatprep.subr.mxu0 %v2615_v10 }
  0xd9   : > { %3376 = vmatprep.subr.mxu1 %v2631_v11  ;;  %3321 = vmatpush3.msra.mxu0 %v2615_v10 }
  0xda   : > { %3322 = vmatprep.mubr.f32.mxu0 %v3937_v55  ;;  %3377 = vmatpush3.msra.mxu1 %v2631_v11  ;;  %v2660_v55 = vld [vmem:[%s4713_s3 + $0x468] sm:$0xff] }
  0xdb   : > { %3378 = vmatprep.mubr.f32.mxu1 %v3533_v23  ;;  %3323 = vmatmul.mubr.f32.vlgmr.msra.gmra.mxu0 %v3939_v56  ;;  %v2652_v56 = vld [vmem:[%s4713_s3 + $0x428] sm:$0xff] }
  0xdc   : > { %3379 = vmatmul.mubr.f32.vlgmr.msra.gmra.mxu1 %v3817_v62  ;;  %3402 = vmatprep.subr.mxu0 %v2662_v22  ;;  %v2659_v62 = vld [vmem:[%s4713_s3 + $0x460] sm:$0xff] }
  0xdd   : > { %3458 = vmatprep.subr.mxu1 %v2662_v22  ;;  %3403 = vmatpush3.msra.mxu0 %v2662_v22 }
  0xde   : > { %3474 = vmatpush3.msra.mxu1 %v2662_v22  ;;  %3404 = vmatprep.subr.mxu0 %v2661_v24 }
  0xdf   : > { %3459 = vmatprep.subr.mxu1 %v2661_v24  ;;  %3325 = vmatprep.mubr.f32.mxu0 %v3957_v63  ;;  %v2651_v63 = vld [vmem:[%s4713_s3 + $0x420] sm:$0xff] }
  0xe0   : > { %3381 = vmatprep.mubr.f32.mxu1 %v3834_v8  ;;  %3405 = vmatpush3.msra.mxu0 %v2661_v24  ;;  %v2658_v8 = vld [vmem:[%s4713_s3 + $0x458] sm:$0xff] }
  0xe1   : > { %3475 = vmatpush3.msra.mxu1 %v2661_v24  ;;  %3326 = vmatmul.mubr.f32.gmra.mxu0 %v3963_v4  ;;  %v2650_v4 = vld [vmem:[%s4713_s3 + $0x418] sm:$0xff] }
  0xe2   : > { %3382 = vmatmul.mubr.f32.gmra.mxu1 %v3836_v9  ;;  %3406 = vmatprep.subr.mxu0 %v2660_v55  ;;  %v2657_v9 = vld [vmem:[%s4713_s3 + $0x450] sm:$0xff] }
  0xe3   : > { %3460 = vmatprep.subr.mxu1 %v2660_v55  ;;  %3407 = vmatpush3.msra.mxu0 %v2660_v55 }
  0xe4   : > { %3476 = vmatpush3.msra.mxu1 %v2660_v55  ;;  %3408 = vmatprep.subr.mxu0 %v2659_v62 }
  0xe5   : > { %3461 = vmatprep.subr.mxu1 %v2659_v62  ;;  %3328 = vmatprep.mubr.f32.mxu0 %v3987_v19  ;;  %v2649_v19 = vld [vmem:[%s4713_s3 + $0x410] sm:$0xff] }
  0xe6   : > { %3384 = vmatprep.mubr.f32.mxu1 %v3847_v15  ;;  %3409 = vmatpush3.msra.mxu0 %v2659_v62  ;;  %v2656_v15 = vld [vmem:[%s4713_s3 + $0x448] sm:$0xff] }
  0xe7   : > { %3477 = vmatpush3.msra.mxu1 %v2659_v62  ;;  %3329 = vmatmul.mubr.f32.gmra.mxu0 %v3991_v20  ;;  %v1672_v20 = vld [vmem:[#allocation2 + $0xd8] sm:$0xff] }
  0xe8   : > { %3385 = vmatmul.mubr.f32.gmra.mxu1 %v3849_v18  ;;  %3410 = vmatprep.subr.mxu0 %v2658_v8  ;;  %v2655_v18 = vld [vmem:[%s4713_s3 + $0x440] sm:$0xff] }
  0xe9   : > { %3462 = vmatprep.subr.mxu1 %v2658_v8  ;;  %3411 = vmatpush3.msra.mxu0 %v2658_v8 }
  0xea   : > { %3478 = vmatpush3.msra.mxu1 %v2658_v8  ;;  %3412 = vmatprep.subr.mxu0 %v2657_v9 }
  0xeb   : > { %3463 = vmatprep.subr.mxu1 %v2657_v9  ;;  %3331 = vmatprep.mubr.f32.mxu0 %v4009_v25  ;;  %v2647_v25 = vld [vmem:[%s4713_s3 + $0x400] sm:$0xff] }
  0xec   : > { %3387 = vmatprep.mubr.f32.mxu1 %v3867_v27  ;;  %3413 = vmatpush3.msra.mxu0 %v2657_v9  ;;  %v2654_v27 = vld [vmem:[%s4713_s3 + $0x438] sm:$0xff] }
  0xed   : > { %3479 = vmatpush3.msra.mxu1 %v2657_v9  ;;  %3332 = vmatmul.mubr.f32.gmra.mxu0 %v4011_v26 }
  0xee   : > { %3388 = vmatmul.mubr.f32.gmra.mxu1 %v3872_v34  ;;  %3414 = vmatprep.subr.mxu0 %v2656_v15  ;;  %v2653_v34 = vld [vmem:[%s4713_s3 + $0x430] sm:$0xff] }
  0xef   : > { %3464 = vmatprep.subr.mxu1 %v2656_v15  ;;  %3415 = vmatpush3.msra.mxu0 %v2656_v15 }
  0xf0   : > { %3480 = vmatpush3.msra.mxu1 %v2656_v15  ;;  %3416 = vmatprep.subr.mxu0 %v2655_v18 }
  0xf1   : > { %3465 = vmatprep.subr.mxu1 %v2655_v18  ;;  %3334 = vmatprep.mubr.f32.mxu0 %v4029_v36 }
  0xf2   : > { %3390 = vmatprep.mubr.f32.mxu1 %v3882_v40  ;;  %3417 = vmatpush3.msra.mxu0 %v2655_v18  ;;  %v3534_v40 = vld [vmem:[#allocation2 + $0xa9] sm:$0xff] }
  0xf3   : > { %3481 = vmatpush3.msra.mxu1 %v2655_v18  ;;  %3335 = vmatmul.mubr.f32.gmra.mxu0 %v4031_v39 }
  0xf4   : > { %3391 = vmatmul.mubr.f32.gmra.mxu1 %v3887_v43  ;;  %3418 = vmatprep.subr.mxu0 %v2654_v27  ;;  %v3535_v43 = vld [vmem:[#allocation2 + $0xb1] sm:$0xff] }
  0xf5   : > { %3466 = vmatprep.subr.mxu1 %v2654_v27  ;;  %3419 = vmatpush3.msra.mxu0 %v2654_v27 }
  0xf6   : > { %3482 = vmatpush3.msra.mxu1 %v2654_v27  ;;  %3420 = vmatprep.subr.mxu0 %v2653_v34 }
  0xf7   : > { %3467 = vmatprep.subr.mxu1 %v2653_v34  ;;  %3337 = vmatprep.mubr.f32.mxu0 %v4049_v48 }
  0xf8   : > { %3393 = vmatprep.mubr.f32.mxu1 %v3534_v40  ;;  %3421 = vmatpush3.msra.mxu0 %v2653_v34 }
  0xf9   : > { %3483 = vmatpush3.msra.mxu1 %v2653_v34  ;;  %3338 = vmatmul.mubr.f32.gmra.mxu0 %v4051_v50 }
  0xfa   : > { %3394 = vmatmul.mubr.f32.gmra.mxu1 %v3535_v43  ;;  %3422 = vmatprep.subr.mxu0 %v2652_v56 }
  0xfb   : > { %3468 = vmatprep.subr.mxu1 %v2652_v56  ;;  %3423 = vmatpush3.msra.mxu0 %v2652_v56 }
  0xfc   : > { %3484 = vmatpush3.msra.mxu1 %v2652_v56  ;;  %3424 = vmatprep.subr.mxu0 %v2651_v63 }
  0xfd   : > { %3469 = vmatprep.subr.mxu1 %v2651_v63  ;;  %3340 = vmatprep.mubr.f32.mxu0 %v4231_v41 }
  0xfe   : > { %3396 = vmatprep.mubr.f32.mxu1 %v3983_v13  ;;  %3425 = vmatpush3.msra.mxu0 %v2651_v63  ;;  %v1673_v13 = vld [vmem:[#allocation2 + $0xe0] sm:$0xff] }
  0xff   : > { %3485 = vmatpush3.msra.mxu1 %v2651_v63  ;;  %3341 = vmatmul.mubr.f32.gmra.mxu0 %v4235_v28 }
 0x100   : > { %3397 = vmatmul.mubr.f32.gmra.mxu1 %v3985_v14  ;;  %3426 = vmatprep.subr.mxu0 %v2650_v4  ;;  %v2648_v14 = vld [vmem:[%s4713_s3 + $0x408] sm:$0xff] }
 0x101   : > { %3470 = vmatprep.subr.mxu1 %v2650_v4  ;;  %3427 = vmatpush3.msra.mxu0 %v2650_v4 }
 0x102   : > { %3486 = vmatpush3.msra.mxu1 %v2650_v4  ;;  %3428 = vmatprep.subr.mxu0 %v2649_v19 }
 0x103   : > { %3471 = vmatprep.subr.mxu1 %v2649_v19  ;;  %3343 = vmatprep.mubr.f32.mxu0 %v1672_v20 }
 0x104   : > { %3538 = vmatprep.mubr.msk.f32.mxu1 %vm4088_vm1, %v471_v1  ;;  %3429 = vmatpush3.msra.mxu0 %v2649_v19  ;;  %v2060_v1 = vld [vmem:[#allocation2 + $0xda] sm:$0xff] }
 0x105   : > { %3487 = vmatpush3.msra.mxu1 %v2649_v19  ;;  %3344 = vmatmul.mubr.f32.gmra.mxu0 %v1673_v13 }
 0x106   : > { %3539 = vmatmul.mubr.msk.f32.gmra.mxu1 %vm4088_vm1, %v472_v7  ;;  %3430 = vmatprep.subr.mxu0 %v2648_v14 }
 0x107   : > { %3472 = vmatprep.subr.mxu1 %v2648_v14  ;;  %3431 = vmatpush3.msra.mxu0 %v2648_v14 }
 0x108   : > { %3488 = vmatpush3.msra.mxu1 %v2648_v14  ;;  %3432 = vmatprep.subr.mxu0 %v2647_v25 }
 0x109   : > { %3473 = vmatprep.subr.mxu1 %v2647_v25  ;;  %3433 = vmatpush3.msra.mxu0 %v2647_v25 }
 0x10a   : > { %3489 = vmatpush3.msra.mxu1 %v2647_v25  ;;  %3434 = vmatprep.mubr.f32.mxu0 %v4129_v30 }
 0x10b   : > { %3446 = vmatprep.mubr.f32.mxu1 %v4209_v12  ;;  %3435 = vmatmul.mubr.f32.vlgmr.msra.gmra.mxu0 %v4131_v32  ;;  %v2988_v26 = vpop.f32.mrf.mxu0 }
 0x10c   : > { %3447 = vmatmul.mubr.f32.vlgmr.msra.gmra.mxu1 %v4211_v21  ;;  %v3044_v36 = vpop.f32.mrf.mxu1  ;;  %3437 = vmatprep.mubr.f32.mxu0 %v4149_v44  ;;  %v2061_v44 = vld [vmem:[#allocation2 + $0xe2] sm:$0xff] }
 0x10d   : > { %3449 = vmatprep.mubr.f32.mxu1 %v4229_v35  ;;  %v807_v39 = vadd.f32 %v3044_v36, %v2988_v26  ;;  %v656_v48 = vpop.f32.mrf.mxu0 }
 0x10e   : > { %v801_v50 = vpop.f32.mrf.mxu1 }
 0x10f   : > { %v802_v60 = vadd.f32 %v801_v50, %v656_v48  ;;  %3438 = vmatmul.mubr.f32.gmra.mxu0 %v4151_v47 }
 0x110   : > { %3450 = vmatmul.mubr.f32.gmra.mxu1 %v4233_v42  ;;  %3440 = vmatprep.mubr.f32.mxu0 %v4169_v53 }
 0x111   : > { %3452 = vmatprep.mubr.f32.mxu1 %v4365_v29  ;;  %v2991_v3 = vpop.f32.mrf.mxu0 }
 0x112   : > { %v3047_v6 = vpop.f32.mrf.mxu1 }
 0x113   : > { %v817_v7 = vadd.f32 %v3047_v6, %v2991_v3  ;;  %3441 = vmatmul.mubr.f32.gmra.mxu0 %v4171_v54  ;;  %v666_v30 = vpop.f32.mrf.mxu0 }
 0x114   : > { %3453 = vmatmul.mubr.f32.gmra.mxu1 %v4367_v16  ;;  %v811_v32 = vpop.f32.mrf.mxu1  ;;  %3443 = vmatprep.mubr.f32.mxu0 %v4189_v2 }
 0x115   : > { %3455 = vmatprep.mubr.f32.mxu1 %v2060_v1  ;;  %v812_v47 = vadd.f32 %v811_v32, %v666_v30 }
 0x117   : > { %3444 = vmatmul.mubr.f32.gmra.mxu0 %v4191_v5  ;;  %v2994_v53 = vpop.f32.mrf.mxu0 }
 0x118   : > { %3456 = vmatmul.mubr.f32.gmra.mxu1 %v2061_v44  ;;  %v3050_v12 = vpop.f32.mrf.mxu1 }
 0x119   : > { %v827_v21 = vadd.f32 %v3050_v12, %v2994_v53  ;;  %v676_v35 = vpop.f32.mrf.mxu0 }
 0x11a   : > { %v821_v41 = vpop.f32.mrf.mxu1 }
 0x11b   : > { %v822_v42 = vadd.f32 %v821_v41, %v676_v35 }
 0x11d   : > { %v2997_v28 = vpop.f32.mrf.mxu0 }
 0x11e   : > { %v3053_v54 = vpop.f32.mrf.mxu1 }
 0x11f   : > { %v837_v33 = vadd.f32 %v3053_v54, %v2997_v28  ;;  %v686_v37 = vpop.f32.mrf.mxu0 }
 0x120   : > { %v831_v31 = vpop.f32.mrf.mxu1 }
 0x121   : > { %v832_v38 = vadd.f32 %v831_v31, %v686_v37 }
 0x123   : > { %v3000_v57 = vpop.f32.mrf.mxu0 }
 0x124   : > { %v3056_v2 = vpop.f32.mrf.mxu1 }
 0x125   : > { %v847_v58 = vadd.f32 %v3056_v2, %v3000_v57  ;;  %v696_v61 = vpop.f32.mrf.mxu0 }
 0x126   : > { %v841_v0 = vpop.f32.mrf.mxu1 }
 0x127   : > { %v842_v49 = vadd.f32 %v841_v0, %v696_v61 }
 0x129   : > { %v3003_v5 = vpop.f32.mrf.mxu0 }
 0x12a   : > { %v3059_v51 = vpop.f32.mrf.mxu1 }
 0x12b   : > { %v857_v52 = vadd.f32 %v3059_v51, %v3003_v5  ;;  %v706_v45 = vpop.f32.mrf.mxu0 }
 0x12c   : > { %v851_v59 = vpop.f32.mrf.mxu1 }
 0x12d   : > { %v852_v29 = vadd.f32 %v851_v59, %v706_v45 }
 0x12f   : > { %v3006_v16 = vpop.f32.mrf.mxu0 }
 0x130   : > { %v3062_v46 = vpop.f32.mrf.mxu1 }
 0x131   : > { %v867_v17 = vadd.f32 %v3062_v46, %v3006_v16  ;;  %v716_v10 = vpop.f32.mrf.mxu0 }
 0x132   : > { %v861_v11 = vpop.f32.mrf.mxu1 }
 0x133   : > { %v862_v22 = vadd.f32 %v861_v11, %v716_v10 }
 0x135   : > { %v3009_v23 = vpop.f32.mrf.mxu0 }
 0x136   : > { %v3065_v24 = vpop.f32.mrf.mxu1 }
 0x137   : > { %v877_v55 = vadd.f32 %v3065_v24, %v3009_v23  ;;  %v726_v62 = vpop.f32.mrf.mxu0 }
 0x138   : > { %v871_v8 = vpop.f32.mrf.mxu1 }
 0x139   : > { %v4480_v9 = vadd.f32 %v871_v8, %v726_v62 }
 0x13b   : > { %v3100_v15 = vpop.f32.mrf.mxu0 }
 0x13c   : > { %v3156_v18 = vpop.f32.mrf.mxu1  ;;  %v1059_v27 = vadd.f32 %v3100_v15, %v807_v39 }
 0x13d   : > { %v979_v34 = vpop.f32.mrf.mxu0 }
 0x13e   : > { %v1174_v40 = vpop.f32.mrf.mxu1  ;;  %v4482_v56 = vadd.f32 %v3156_v18, %v1059_v27  ;;  %v1058_v43 = vadd.f32 %v979_v34, %v802_v60 }
 0x140   : > { %v4484_v63 = vadd.f32 %v1174_v40, %v1058_v43 }
 0x141   : > { %v3103_v4 = vpop.f32.mrf.mxu0 }
 0x142   : > { %v3159_v19 = vpop.f32.mrf.mxu1  ;;  %v1061_v20 = vadd.f32 %v3103_v4, %v817_v7 }
 0x143   : > { %v989_v13 = vpop.f32.mrf.mxu0 }
 0x144   : > { %v1184_v14 = vpop.f32.mrf.mxu1  ;;  %v4486_v25 = vadd.f32 %v3159_v19, %v1061_v20  ;;  %v1060_v26 = vadd.f32 %v989_v13, %v812_v47 }
 0x146   : > { %v4488_v36 = vadd.f32 %v1184_v14, %v1060_v26 }
 0x147   : > { %v3106_v48 = vpop.f32.mrf.mxu0 }
 0x148   : > { %v3162_v50 = vpop.f32.mrf.mxu1  ;;  %v1063_v39 = vadd.f32 %v3106_v48, %v827_v21 }
 0x149   : > { %v999_v1 = vpop.f32.mrf.mxu0 }
 0x14a   : > { %v1194_v3 = vpop.f32.mrf.mxu1  ;;  %v4490_v6 = vadd.f32 %v3162_v50, %v1063_v39  ;;  %v1062_v60 = vadd.f32 %v999_v1, %v822_v42 }
 0x14c   : > { %v4492_v30 = vadd.f32 %v1194_v3, %v1062_v60 }
 0x14d   : > { %v3109_v32 = vpop.f32.mrf.mxu0 }
 0x14e   : > { %v3165_v44 = vpop.f32.mrf.mxu1  ;;  %v1065_v7 = vadd.f32 %v3109_v32, %v837_v33 }
 0x14f   : > { %v1009_v53 = vpop.f32.mrf.mxu0 }
 0x150   : > { %v1204_v12 = vpop.f32.mrf.mxu1  ;;  %v4494_v35 = vadd.f32 %v3165_v44, %v1065_v7  ;;  %v1064_v47 = vadd.f32 %v1009_v53, %v832_v38 }
 0x152   : > { %v4496_v41 = vadd.f32 %v1204_v12, %v1064_v47 }
 0x153   : > { %v3112_v28 = vpop.f32.mrf.mxu0 }
 0x154   : > { %v3168_v54 = vpop.f32.mrf.mxu1  ;;  %v1067_v21 = vadd.f32 %v3112_v28, %v847_v58 }
 0x155   : > { %v1019_v37 = vpop.f32.mrf.mxu0 }
 0x156   : > { %v1214_v31 = vpop.f32.mrf.mxu1  ;;  %v4498_v57 = vadd.f32 %v3168_v54, %v1067_v21  ;;  %v1066_v42 = vadd.f32 %v1019_v37, %v842_v49 }
 0x158   : > { %v4500_v2 = vadd.f32 %v1214_v31, %v1066_v42 }
 0x159   : > { %v3115_v61 = vpop.f32.mrf.mxu0 }
 0x15a   : > { %v3171_v0 = vpop.f32.mrf.mxu1  ;;  %v1069_v33 = vadd.f32 %v3115_v61, %v857_v52 }
 0x15b   : > { %v1029_v5 = vpop.f32.mrf.mxu0 }
 0x15c   : > { %v1224_v51 = vpop.f32.mrf.mxu1  ;;  %v4502_v45 = vadd.f32 %v3171_v0, %v1069_v33  ;;  %v1068_v38 = vadd.f32 %v1029_v5, %v852_v29 }
 0x15e   : > { %v4504_v59 = vadd.f32 %v1224_v51, %v1068_v38 }
 0x15f   : > { %v3118_v16 = vpop.f32.mrf.mxu0 }
 0x160   : > { %v3174_v46 = vpop.f32.mrf.mxu1  ;;  %v1071_v58 = vadd.f32 %v3118_v16, %v867_v17 }
 0x161   : > { %v1039_v10 = vpop.f32.mrf.mxu0 }
 0x162   : > { %v1234_v11 = vpop.f32.mrf.mxu1  ;;  %v4506_v23 = vadd.f32 %v3174_v46, %v1071_v58  ;;  %v1070_v49 = vadd.f32 %v1039_v10, %v862_v22 }
 0x164   : > { %v4508_v24 = vadd.f32 %v1234_v11, %v1070_v49 }
 0x165   : > { %v3121_v62 = vpop.f32.mrf.mxu0 }
 0x166   : > { %v3177_v8 = vpop.f32.mrf.mxu1  ;;  %v1073_v52 = vadd.f32 %v3121_v62, %v877_v55 }
 0x167   : > { %v1049_v15 = vpop.f32.mrf.mxu0 }
 0x168   : > { %v1244_v18 = vpop.f32.mrf.mxu1  ;;  %v4510_v27 = vadd.f32 %v3177_v8, %v1073_v52  ;;  %v1072_v29 = vadd.f32 %v1049_v15, %v4480_v9 }
 0x16a   : > { %v4513_v34 = vadd.f32 %v1244_v18, %v1072_v29 }
 0x16b   : > { %v3212_v40 = vpop.f32.mrf.mxu0 }
 0x16c   : > { %4724 = vst [vmem:[#allocation5_spill] sm:$0xff] %v4513_v34  ;;  %v4515_v17 = vpop.f32.mrf.mxu1 }
 0x16d   : > { %v1368_v43 = vpop.f32.mrf.mxu0 }
 0x16e   : > { %v4517_v4 = vpop.f32.mrf.mxu1 }
 0x171   : > { %v3215_v22 = vpop.f32.mrf.mxu0 }
 0x172   : > { %v4519_v19 = vpop.f32.mrf.mxu1 }
 0x173   : > { %v1378_v20 = vpop.f32.mrf.mxu0 }
 0x174   : > { %v4521_v13 = vpop.f32.mrf.mxu1 }
 0x177   : > { %v3218_v55 = vpop.f32.mrf.mxu0 }
 0x178   : > { %v4523_v14 = vpop.f32.mrf.mxu1 }
 0x179   : > { %v1388_v26 = vpop.f32.mrf.mxu0 }
 0x17a   : > { %v4525_v48 = vpop.f32.mrf.mxu1 }
 0x17d   : > { %v3221_v9 = vpop.f32.mrf.mxu0 }
 0x17e   : > { %v4527_v50 = vpop.f32.mrf.mxu1 }
 0x17f   : > { %v1398_v39 = vpop.f32.mrf.mxu0 }
 0x180   : > { %v4529_v1 = vpop.f32.mrf.mxu1 }
 0x183   : > { %v3224_v3 = vpop.f32.mrf.mxu0 }
 0x184   : > { %v3280_v60 = vpop.f32.mrf.mxu1 }
 0x185   : > { %v1408_v32 = vpop.f32.mrf.mxu0 }
 0x186   : > { %v1602_v44 = vpop.f32.mrf.mxu1 }
 0x189   : > { %v3227_v7 = vpop.f32.mrf.mxu0 }
 0x18a   : > { %v4531_v53 = vpop.f32.mrf.mxu1 }
 0x18b   : > { %v1418_v12 = vpop.f32.mrf.mxu0 }
 0x18c   : > { %v4533_v47 = vpop.f32.mrf.mxu1 }
 0x18f   : > { %v3230_v28 = vpop.f32.mrf.mxu0 }
 0x190   : > { %v4535_v54 = vpop.f32.mrf.mxu1 }
 0x191   : > { %4725 = vst [vmem:[#allocation6_spill] sm:$0xff] %v4535_v54  ;;  %v1428_v21 = vpop.f32.mrf.mxu0  ;;  %v1449_v54 = vadd.f32 %v1378_v20, %v4488_v36  ;;  %v1458_v36 = vadd.f32 %v3227_v7, %v4502_v45 }
 0x192   : > { %v4537_v37 = vpop.f32.mrf.mxu1 }
 0x193   : > { %4726 = vst [vmem:[#allocation7_spill] sm:$0xff] %v4537_v37 }
 0x195   : > { %v3233_v31 = vpop.f32.mrf.mxu0 }
 0x196   : > { %v4539_v42 = vpop.f32.mrf.mxu1 }
 0x197   : > { %4727 = vst [vmem:[#allocation8_spill] sm:$0xff] %v4539_v42  ;;  %v4541_v61 = vpop.f32.mrf.mxu0 }
 0x198   : > { %4728 = vst [vmem:[#allocation9_spill] sm:$0xff] %v4541_v61  ;;  %v4543_v0 = vpop.f32.mrf.mxu1  ;;  %v1452_v61 = vadd.f32 %v3218_v55, %v4490_v6  ;;  %v1457_v6 = vadd.f32 %v1418_v12, %v4504_v59  ;;  %v1462_v59 = vadd.f32 %v3233_v31, %v4510_v27  ;;  %v4745_v27 = vld [vmem:[#allocation6_spill] sm:$0xff] }
 0x199   : > { %4729 = vst [vmem:[#allocation10_spill] sm:$0xff] %v4543_v0 }
 0x19a   : > { %v1646_v20 = vadd.f32 %v4523_v14, %v1452_v61 }
 0x19b   : > { %v3324_v33 = vpop.f32.mrf.mxu0 }
 0x19c   : > { %v4545_v5 = vpop.f32.mrf.mxu1 }
 0x19d   : > { %4730 = vst [vmem:[#allocation11_spill] sm:$0xff] %v4545_v5  ;;  %v1757_v51 = vpop.f32.mrf.mxu0 }
 0x19e   : > { %v4547_v38 = vpop.f32.mrf.mxu1 }
 0x19f   : > { %4731 = vst [vmem:[#allocation12_spill] sm:$0xff] %v4547_v38 }
 0x1a1   : > { %v3327_v16 = vpop.f32.mrf.mxu0 }
 0x1a2   : > { %v4549_v46 = vpop.f32.mrf.mxu1 }
 0x1a3   : > { %4732 = vst [vmem:[#allocation13_spill] sm:$0xff] %v4549_v46  ;;  %v1767_v58 = vpop.f32.mrf.mxu0 }
 0x1a4   : > { %v4551_v10 = vpop.f32.mrf.mxu1  ;;  %v4747_v31 = vld [vmem:[#allocation11_spill] sm:$0xff] }
 0x1a5   : > { %4733 = vst [vmem:[#allocation14_spill] sm:$0xff] %v4551_v10 }
 0x1a7   : > { %v3330_v11 = vpop.f32.mrf.mxu0 }
 0x1a8   : > { %v4553_v49 = vpop.f32.mrf.mxu1  ;;  %v1841_v12 = vadd.f32 %v3330_v11, %v1646_v20 }
 0x1a9   : > { %4734 = vst [vmem:[#allocation15_spill] sm:$0xff] %v4553_v49  ;;  %v4555_v62 = vpop.f32.mrf.mxu0 }
 0x1aa   : > { %4735 = vst [vmem:[#allocation16_spill] sm:$0xff] %v4555_v62  ;;  %v4557_v8 = vpop.f32.mrf.mxu1 }
 0x1ab   : > { %4736 = vst [vmem:[#allocation17_spill] sm:$0xff] %v4557_v8  ;;  %v1448_v8 = vadd.f32 %v3212_v40, %v4482_v56  ;;  %v1451_v40 = vadd.f32 %v1388_v26, %v4492_v30  ;;  %v1460_v30 = vadd.f32 %v3230_v28, %v4506_v23  ;;  %v1651_v23 = vadd.f32 %v4533_v47, %v1457_v6 }
 0x1ad   : > { %v4559_v52 = vpop.f32.mrf.mxu0  ;;  %v1642_v56 = vadd.f32 %v4515_v17, %v1448_v8  ;;  %v1645_v45 = vadd.f32 %v4525_v48, %v1451_v40  ;;  %v1654_v28 = vadd.f32 %v4745_v27, %v1460_v30 }
 0x1ae   : > { %4737 = vst [vmem:[#allocation18_spill] sm:$0xff] %v4559_v52  ;;  %v4561_v15 = vpop.f32.mrf.mxu1  ;;  %v1447_v52 = vadd.f32 %v1368_v43, %v4484_v63 }
 0x1af   : > { %4738 = vst [vmem:[#allocation19_spill] sm:$0xff] %v4561_v15  ;;  %v4563_v18 = vpop.f32.mrf.mxu0 }
 0x1b0   : > { %4739 = vst [vmem:[#allocation20_spill] sm:$0xff] %v4563_v18  ;;  %v4565_v29 = vpop.f32.mrf.mxu1  ;;  %v1456_v18 = vadd.f32 %v3224_v3, %v4498_v57  ;;  %v1641_v63 = vadd.f32 %v4517_v4, %v1447_v52  ;;  %v1454_v57 = vadd.f32 %v3221_v9, %v4494_v35  ;;  %v1459_v35 = vadd.f32 %v1428_v21, %v4508_v24  ;;  %v4743_v24 = vld [vmem:[#allocation5_spill] sm:$0xff] }
 0x1b1   : > { %4740 = vst [vmem:[#allocation21_spill] sm:$0xff] %v4565_v29  ;;  %v1450_v29 = vadd.f32 %v3215_v22, %v4486_v25  ;;  %v1453_v25 = vadd.f32 %v1398_v39, %v4496_v41  ;;  %v1643_v22 = vadd.f32 %v4521_v13, %v1449_v54  ;;  %v1837_v41 = vadd.f32 %v3324_v33, %v1642_v56  ;;  %v4746_v54 = vld [vmem:[#allocation7_spill] sm:$0xff]  ;;  %v4754_v6 = vld [vmem:[#allocation16_spill] sm:$0xff] }
 0x1b2   : > { %v1650_v43 = vadd.f32 %v3280_v60, %v1456_v18  ;;  %v1836_v9 = vadd.f32 %v1757_v51, %v1641_v63  ;;  %v1648_v14 = vadd.f32 %v4527_v50, %v1454_v57  ;;  %v1652_v60 = vadd.f32 %v4531_v53, %v1458_v36  ;;  %v4748_v50 = vld [vmem:[#allocation8_spill] sm:$0xff]  ;;  %v4750_v18 = vld [vmem:[#allocation10_spill] sm:$0xff]  ;;  %v4753_v57 = vld [vmem:[#allocation15_spill] sm:$0xff] }
 0x1b3   : > { %v3336_v0 = vpop.f32.mrf.mxu0  ;;  %v1647_v3 = vadd.f32 %v4529_v1, %v1453_v25  ;;  %v1838_v48 = vadd.f32 %v1767_v58, %v1643_v22  ;;  %v1653_v21 = vadd.f32 %v4746_v54, %v1459_v35  ;;  %v2031_v61 = vadd.f32 %v4747_v31, %v1837_v41  ;;  %v4749_v1 = vld [vmem:[#allocation12_spill] sm:$0xff]  ;;  %v4752_v63 = vld [vmem:[#allocation14_spill] sm:$0xff] }
 0x1b4   : > { %v3392_v46 = vpop.f32.mrf.mxu1  ;;  %v1845_v26 = vadd.f32 %v3336_v0, %v1650_v43  ;;  %v1656_v33 = vadd.f32 %v4748_v50, %v1462_v59 }
 0x1b5   : > { %v1797_v38 = vpop.f32.mrf.mxu0  ;;  %v2032_v40 = vadd.f32 %v4752_v63, %v1838_v48  ;;  %v4755_v22 = vld [vmem:[#allocation18_spill] sm:$0xff] }
 0x1b6   : > { %v1991_v42 = vpop.f32.mrf.mxu1  ;;  %v2039_v0 = vadd.f32 %v3392_v46, %v1845_v26  ;;  %v4751_v46 = vld [vmem:[#allocation13_spill] sm:$0xff]  ;;  %v1843_v20 = vadd.f32 %v4755_v22, %v1648_v14 }
 0x1b9   : > { %v3339_v10 = vpop.f32.mrf.mxu0 }
 0x1ba   : > { %v4567_v5 = vpop.f32.mrf.mxu1  ;;  %v1847_v51 = vadd.f32 %v3339_v10, %v1652_v60 }
 0x1bb   : > { %4741 = vst [vmem:[#allocation22_spill] sm:$0xff] %v4567_v5  ;;  %v1807_v49 = vpop.f32.mrf.mxu0  ;;  %v1455_v5 = vadd.f32 %v1408_v32, %v4500_v2  ;;  %v1644_v2 = vadd.f32 %v4519_v19, %v1450_v29  ;;  %v4744_v32 = vld [vmem:[#allocation9_spill] sm:$0xff] }
 0x1bc   : > { %v4569_v37 = vpop.f32.mrf.mxu1  ;;  %v1846_v58 = vadd.f32 %v1807_v49, %v1651_v23 }
 0x1bd   : > { %4742 = vst [vmem:[#allocation23_spill] sm:$0xff] %v4569_v37  ;;  %v1649_v17 = vadd.f32 %v1602_v44, %v1455_v5  ;;  %v1461_v44 = vadd.f32 %v4744_v32, %v4743_v24  ;;  %v1839_v7 = vadd.f32 %v3327_v16, %v1644_v2  ;;  %v2030_v5 = vadd.f32 %v4749_v1, %v1836_v9  ;;  %v4759_v1 = vld [vmem:[#allocation17_spill] sm:$0xff] }
 0x1be   : > { %v1840_v2 = vadd.f32 %v4754_v6, %v1645_v45 }
 0x1bf   : > { %v3342_v62 = vpop.f32.mrf.mxu0  ;;  %v1844_v19 = vadd.f32 %v1797_v38, %v1649_v17  ;;  %v4616_v38 = vld [vmem:[%s4714_s4] ss:$0 sm:$0xff]  ;;  %v1655_v29 = vadd.f32 %v4750_v18, %v1461_v44  ;;  %v2033_v56 = vadd.f32 %v4751_v46, %v1839_v7  ;;  %v4756_v17 = vld [vmem:[#allocation20_spill] sm:$0xff] }
 0x1c0   : > { %v4573_v15 = vpop.f32.mrf.mxu1  ;;  %v1849_v11 = vadd.f32 %v3342_v62, %v1654_v28  ;;  %v1842_v30 = vadd.f32 %v4756_v17, %v1647_v3 }
 0x1c1   : > { %v4580_v34 = vpop.f32.mrf.mxu0  ;;  %v2038_v53 = vadd.f32 %v1991_v42, %v1844_v19  ;;  %v2035_v42 = vadd.f32 %v4753_v57, %v1841_v12 }
 0x1c2   : > { %v4582_v37 = vpop.f32.mrf.mxu1  ;;  %v4757_v35 = vld [vmem:[#allocation22_spill] sm:$0xff]  ;;  %v2043_v60 = vadd.f32 %v4573_v15, %v1849_v11  ;;  %v1848_v14 = vadd.f32 %v4580_v34, %v1653_v21 }
 0x1c3   : > { %v2041_v41 = vadd.f32 %v4757_v35, %v1847_v51 }
 0x1c4   : > { %v4758_v9 = vld [vmem:[#allocation23_spill] sm:$0xff] }
 0x1c5   : > { %v3345_v55 = vpop.f32.mrf.mxu0  ;;  %v2040_v19 = vadd.f32 %v4758_v9, %v1846_v58 }
 0x1c6   : > { %v4594_v4 = vpop.f32.mrf.mxu1  ;;  %v1851_v3 = vadd.f32 %v3345_v55, %v1656_v33 }
 0x1c7   : > { %v1827_v39 = vpop.f32.mrf.mxu0 }
 0x1c8   : > { %v4600_v13 = vpop.f32.mrf.mxu1  ;;  %v1850_v28 = vadd.f32 %v1827_v39, %v1655_v29  ;;  %v2042_v39 = vadd.f32 %v4582_v37, %v1848_v14  ;;  %v4761_v29 = vld [vmem:[#allocation21_spill] sm:$0xff]  ;;  %v2045_v37 = vadd.f32 %v4594_v4, %v1851_v3 }
 0x1c9   : > { %v2036_v46 = vadd.f32 %v4761_v29, %v1842_v30 }
 0x1cb   : > { %v3436_v47 = vpop.f32.mrf.mxu0 }
 0x1cc   : > { %v3448_v16 = vpop.f32.mrf.mxu1  ;;  %v2225_v8 = vadd.f32 %v3436_v47, %v2031_v61 }
 0x1cd   : > { %v2233_v52 = vadd.f32 %v3448_v16, %v2039_v0  ;;  %v2145_v10 = vpop.f32.mrf.mxu0 }
 0x1ce   : > { %v2185_v25 = vpop.f32.mrf.mxu1  ;;  %v2248_v43 = vadd.f32 %v4616_v38, %v2225_v8  ;;  %v2224_v49 = vadd.f32 %v2145_v10, %v2030_v5  ;;  %v2034_v5 = vadd.f32 %v4759_v1, %v1840_v2 }
 0x1cf   : > { %v4624_v36 = vadd.f32 %v4616_v38, %v2233_v52  ;;  %v2232_v62 = vadd.f32 %v2185_v25, %v2038_v53  ;;  %v3439_v26 = vpop.f32.mrf.mxu0  ;;  %v4760_v53 = vld [vmem:[#allocation19_spill] sm:$0xff] }
 0x1d0   : > { %v3451_v59 = vpop.f32.mrf.mxu1  ;;  %2324 = vst [vmem:[%s3668_s29 + $0x8] sm:$0xff] %v2248_v43  ;;  %v2247_v23 = vadd.f32 %v4616_v38, %v2224_v49  ;;  %v2227_v24 = vadd.f32 %v3439_v26, %v2033_v56  ;;  %v2286_v48 = vmul.f32 %v2248_v43, %v2248_v43  ;;  %v2037_v51 = vadd.f32 %v4760_v53, %v1843_v20 }
 0x1d1   : > { %2332 = vst [vmem:[%s3668_s29 + $0x48] sm:$0xff] %v4624_v36  ;;  %v4637_v45 = vadd.f32 %v4616_v38, %v2232_v62  ;;  %v2235_v32 = vadd.f32 %v3451_v59, %v2041_v41  ;;  %v2155_v44 = vpop.f32.mrf.mxu0 }
 0x1d2   : > { %v2195_v7 = vpop.f32.mrf.mxu1  ;;  %v2263_v12 = vadd.f32 %v2248_v43, %v2247_v23  ;;  %v2285_v27 = vmul.f32 %v2247_v23, %v2247_v23  ;;  %2323 = vst [vmem:[%s3668_s29] sm:$0xff] %v2247_v23  ;;  %v2226_v15 = vadd.f32 %v2155_v44, %v2032_v40  ;;  %v2250_v54 = vadd.f32 %v4616_v38, %v2227_v24 }
 0x1d3   : > { %2331 = vst [vmem:[%s3668_s29 + $0x40] sm:$0xff] %v4637_v45  ;;  %v4645_v31 = vadd.f32 %v4616_v38, %v2235_v32  ;;  %v2234_v34 = vadd.f32 %v2195_v7, %v2040_v19  ;;  %v3442_v55 = vpop.f32.mrf.mxu0 }
 0x1d4   : > { %v3454_v21 = vpop.f32.mrf.mxu1  ;;  %v2301_v61 = vadd.f32 %v2286_v48, %v2285_v27  ;;  %v2249_v0 = vadd.f32 %v4616_v38, %v2226_v15  ;;  %v2229_v50 = vadd.f32 %v3442_v55, %v2035_v42  ;;  %2326 = vst [vmem:[%s3668_s29 + $0x18] sm:$0xff] %v2250_v54  ;;  %v2044_v42 = vadd.f32 %v4600_v13, %v1850_v28 }
 0x1d5   : > { %v2237_v33 = vadd.f32 %v3454_v21, %v2043_v60  ;;  %2334 = vst [vmem:[%s3668_s29 + $0x58] sm:$0xff] %v4645_v31  ;;  %v2257_v47 = vadd.f32 %v4616_v38, %v2234_v34  ;;  %v2165_v16 = vpop.f32.mrf.mxu0  ;;  %v2288_v10 = vmul.f32 %v2250_v54, %v2250_v54  ;;  %v2293_v48 = vmul.f32 %v4637_v45, %v4637_v45 }
 0x1d6   : > { %v2205_v58 = vpop.f32.mrf.mxu1  ;;  %v2264_v11 = vadd.f32 %v2263_v12, %v2249_v0  ;;  %v2287_v8 = vmul.f32 %v2249_v0, %v2249_v0  ;;  %2325 = vst [vmem:[%s3668_s29 + $0x10] sm:$0xff] %v2249_v0  ;;  %v2252_v52 = vadd.f32 %v4616_v38, %v2229_v50  ;;  %v2228_v56 = vadd.f32 %v2165_v16, %v2034_v5 }
 0x1d7   : > { %v2260_v18 = vadd.f32 %v4616_v38, %v2237_v33  ;;  %2333 = vst [vmem:[%s3668_s29 + $0x50] sm:$0xff] %v2257_v47  ;;  %v2236_v63 = vadd.f32 %v2205_v58, %v2042_v39  ;;  %v3445_v40 = vpop.f32.mrf.mxu0  ;;  %v2296_v21 = vmul.f32 %v4645_v31, %v4645_v31 }
 0x1d8   : > { %v3457_v57 = vpop.f32.mrf.mxu1  ;;  %v2302_v25 = vadd.f32 %v2301_v61, %v2287_v8  ;;  %2328 = vst [vmem:[%s3668_s29 + $0x28] sm:$0xff] %v2252_v52  ;;  %v2265_v43 = vadd.f32 %v2264_v11, %v2250_v54  ;;  %v2251_v49 = vadd.f32 %v4616_v38, %v2228_v56  ;;  %v2231_v6 = vadd.f32 %v3445_v40, %v2037_v51 }
 0x1d9   : > { %2336 = vst [vmem:[%s3668_s29 + $0x68] sm:$0xff] %v2260_v18  ;;  %v2259_v62 = vadd.f32 %v4616_v38, %v2236_v63  ;;  %v2239_v4 = vadd.f32 %v3457_v57, %v2045_v37  ;;  %v2175_v2 = vpop.f32.mrf.mxu0  ;;  %v2290_v19 = vmul.f32 %v2252_v52, %v2252_v52  ;;  %v2295_v54 = vmul.f32 %v2257_v47, %v2257_v47 }
 0x1da   : > { %v2215_v22 = vpop.f32.mrf.mxu1  ;;  %v2303_v20 = vadd.f32 %v2302_v25, %v2288_v10  ;;  %v2230_v17 = vadd.f32 %v2175_v2, %v2036_v46  ;;  %v2266_v30 = vadd.f32 %v2265_v43, %v2251_v49  ;;  %v2289_v35 = vmul.f32 %v2251_v49, %v2251_v49  ;;  %2327 = vst [vmem:[%s3668_s29 + $0x20] sm:$0xff] %v2251_v49 }
 0x1db   : > { %v2238_v13 = vadd.f32 %v2215_v22, %v2044_v42  ;;  %2335 = vst [vmem:[%s3668_s29 + $0x60] sm:$0xff] %v2259_v62  ;;  %v2254_v41 = vadd.f32 %v4616_v38, %v2231_v6  ;;  %v2262_v26 = vadd.f32 %v4616_v38, %v2239_v4  ;;  %v2297_v50 = vmul.f32 %v2259_v62, %v2259_v62 }
 0x1dc   : > { %v2253_v59 = vadd.f32 %v4616_v38, %v2230_v17  ;;  %v2304_v60 = vadd.f32 %v2303_v20, %v2289_v35  ;;  %v2267_v23 = vadd.f32 %v2266_v30, %v2252_v52 }
 0x1dd   : > { %v2261_v9 = vadd.f32 %v4616_v38, %v2238_v13  ;;  %2330 = vst [vmem:[%s3668_s29 + $0x38] sm:$0xff] %v2254_v41  ;;  %2338 = vst [vmem:[%s3668_s29 + $0x78] sm:$0xff] %v2262_v26  ;;  %v2292_v32 = vmul.f32 %v2254_v41, %v2254_v41  ;;  %v2294_v38 = vmul.f32 %v4624_v36, %v4624_v36 }
 0x1de   : > { %v2291_v14 = vmul.f32 %v2253_v59, %v2253_v59  ;;  %2329 = vst [vmem:[%s3668_s29 + $0x30] sm:$0xff] %v2253_v59  ;;  %v2268_v3 = vadd.f32 %v2267_v23, %v2253_v59  ;;  %v2305_v24 = vadd.f32 %v2304_v60, %v2290_v19 }
 0x1df   : > { %2337 = vst [vmem:[%s3668_s29 + $0x70] sm:$0xff] %v2261_v9  ;;  %v2299_v39 = vmul.f32 %v2261_v9, %v2261_v9 }
 0x1e0   : > { %v2269_v44 = vadd.f32 %v2268_v3, %v2254_v41  ;;  %v2306_v7 = vadd.f32 %v2305_v24, %v2291_v14 }
 0x1e2   : > { %v2270_v12 = vadd.f32 %v2269_v44, %v4637_v45  ;;  %v2307_v27 = vadd.f32 %v2306_v7, %v2292_v32  ;;  %v2298_v45 = vmul.f32 %v2260_v18, %v2260_v18 }
 0x1e4   : > { %v2271_v15 = vadd.f32 %v2270_v12, %v4624_v36  ;;  %v2308_v28 = vadd.f32 %v2307_v27, %v2293_v48  ;;  %v2300_v36 = vmul.f32 %v2262_v26, %v2262_v26 }
 0x1e6   : > { %v2309_v34 = vadd.f32 %v2308_v28, %v2294_v38  ;;  %v2272_v55 = vadd.f32 %v2271_v15, %v2257_v47 }
 0x1e8   : > { %v2273_v61 = vadd.f32 %v2272_v55, %v4645_v31  ;;  %v2310_v0 = vadd.f32 %v2309_v34, %v2295_v54 }
 0x1ea   : > { %v2274_v33 = vadd.f32 %v2273_v61, %v2259_v62  ;;  %v2311_v1 = vadd.f32 %v2310_v0, %v2296_v21 }
 0x1ec   : > { %v2275_v5 = vadd.f32 %v2274_v33, %v2260_v18  ;;  %v2312_v53 = vadd.f32 %v2311_v1, %v2297_v50 }
 0x1ee   : > { %v2276_v51 = vadd.f32 %v2275_v5, %v2261_v9  ;;  %v2313_v16 = vadd.f32 %v2312_v53, %v2298_v45 }
 0x1f0   : > { %v2277_v58 = vadd.f32 %v2276_v51, %v2262_v26  ;;  %v2314_v47 = vadd.f32 %v2313_v16, %v2299_v39 }
 0x1f2   : > { %v2278_v11 = vrot.slane %v2277_v58, 4  ;;  %v2315_v8 = vadd.f32 %v2314_v47, %v2300_v36 }
 0x1f4   : > { %v2279_v52 = vadd.f32 %v2278_v11, %v2277_v58  ;;  %v2316_v29 = vrot.slane %v2315_v8, 4 }
 0x1f6   : > { %v2280_v31 = vrot.slane %v2279_v52, 2  ;;  %v2317_v46 = vadd.f32 %v2316_v29, %v2315_v8 }
 0x1f8   : > { %v2281_v37 = vadd.f32 %v2280_v31, %v2279_v52  ;;  %v2318_v56 = vrot.slane %v2317_v46, 2 }
 0x1fa   : > { %v2282_v63 = vrot.slane %v2281_v37, 1  ;;  %v2319_v40 = vadd.f32 %v2318_v56, %v2317_v46 }
 0x1fc   : > { %v2283_v18 = vadd.f32 %v2282_v63, %v2281_v37  ;;  %v2320_v57 = vrot.slane %v2319_v40, 1 }
 0x1fe   : > { %2284 = vst [vmem:[%s347_s8] sm:$0x1] %v2283_v18  ;;  %v2321_v42 = vadd.f32 %v2320_v57, %v2319_v40 }
 0x200   : > { %2322 = vst [vmem:[%s354_s15] sm:$0x1] %v2321_v42 }
 0x201 PF: > { %s18_s28 = sadd.s32 1, %s3578_s28   ;;  %s4762_s11 = sld [smem:[#allocation3_spill]] }
 0x202   : > { %p15_p10 = scmp.ge.s32.totalorder %s18_s28, 6   ;;  %s4763_s13 = sld [smem:[#allocation4_spill]] }
 0x203   : > { %s4764_s24 = smov %s3570_s26  ;;  %s4765_s25 = smov %s3574_s27 }
 0x204   :  { %17 = sbr.rel (!%p15_p10) target bundleno = 3 (0x3), region = 108 }
 0x207   : > { %s4766_s26 = smov %s4762_s11 }
 0x208   : > { %s4767_s27 = smov %s4763_s13 }

</bundles_post_ra>
